<compile_context>
chip_gen: v5e
topology: v5e:2x2
jax: 0.10.0
libtpu: 0.0.40
codegen_flags: <defaults>
</compile_context>

<pallas_src>
import functools

import jax
import jax.numpy as jnp
from jax import lax
from jax.experimental import pallas as pl
from jax.experimental.pallas import tpu as pltpu

LANE = 128


def _round_up(v, m):
    return (v + m - 1) // m * m


# ===========================================================================
# Path 1: small channel counts (VPU broadcast-FMA, NCHW-native, no channel pad)
# ===========================================================================
def _attention_small_kernel(wg_ref, wx_ref, shift_ref, wpsi_ref, spsi_ref,
                            g_ref, x_ref, o_ref, *, Cg, Cl, F_int):
    # g_ref: (1, Cg, TS, 128) f32    x_ref: (1, Cl, TS, 128) f32
    # o_ref: (1, Cl, TS, 128) bf16
    # wg_ref: (F_int*Cg,) f32 SMEM   wx_ref: (F_int*Cl,) f32 SMEM
    # shift_ref / wpsi_ref: (F_int,) f32 SMEM    spsi_ref: (1,) f32 SMEM
    g_ch = [g_ref[0, c] for c in range(Cg)]          # (TS, 128) slabs, dense vregs
    x_ch = [x_ref[0, c] for c in range(Cl)]

    # Accumulate the psi logit over F_int without materializing the (F_int, TS, 128)
    # intermediate; weights come in as SMEM scalars (splat once, reuse across the slab).
    logit = None
    for f in range(F_int):
        acc = g_ch[0] * wg_ref[f * Cg + 0]
        for c in range(1, Cg):
            acc = acc + g_ch[c] * wg_ref[f * Cg + c]
        for c in range(Cl):
            acc = acc + x_ch[c] * wx_ref[f * Cl + c]
        acc = acc + shift_ref[f]
        term = jnp.maximum(acc, 0.0) * wpsi_ref[f]
        logit = term if logit is None else logit + term
    logit = logit + spsi_ref[0]

    # sigmoid on the EUP (exp + approximate reciprocal), VALU stays free for the FMAs.
    psi = pl.reciprocal(1.0 + jnp.exp(-logit), approx=True)

    for c in range(Cl):
        o_ref[0, c] = (x_ch[c] * psi).astype(o_ref.dtype)


def attention_block_small(g_nchw, x_nchw, wg, wx, shift, wpsi, spsi, *, ts_max=256):
    N, Cg, H, W = g_nchw.shape
    _, Cl, _, _ = x_nchw.shape
    F_int = shift.shape[0]
    HW = H * W
    P = pl.cdiv(HW, LANE)
    if P <= ts_max:
        TS, P_p = P, P
    else:
        TS = ts_max
        P_p = _round_up(P, TS)

    # NCHW is already "channels on a leading axis, pixels contiguous": a free reshape to
    # (N, C, P, 128) gives dense-lane tiles.  Activations stay f32 (no host cast pass);
    # the kernel emits bf16 to halve the write stream.
    def prep(a, C):
        a = a.reshape(N, C, HW)
        if P_p * LANE != HW:
            a = jnp.pad(a, ((0, 0), (0, 0), (0, P_p * LANE - HW)))
        return a.reshape(N, C, P_p, LANE)

    g4 = prep(g_nchw, Cg)
    x4 = prep(x_nchw, Cl)

    M_eff = N * P_p * LANE
    flops = M_eff * (2 * F_int * (Cg + Cl) + 3 * F_int + 2 * Cl)
    bytes_accessed = (4 * M_eff * (Cg + Cl) + 2 * M_eff * Cl
                      + 4 * (wg.size + wx.size + 2 * F_int + 1))

    smem_spec = pl.BlockSpec(memory_space=pltpu.MemorySpace.SMEM)
    kernel = functools.partial(_attention_small_kernel, Cg=Cg, Cl=Cl, F_int=F_int)

    out = pl.pallas_call(
        kernel,
        out_shape=jax.ShapeDtypeStruct((N, Cl, P_p, LANE), jnp.bfloat16),
        grid_spec=pltpu.PrefetchScalarGridSpec(
            num_scalar_prefetch=0,
            grid=(N, P_p // TS),
            in_specs=[
                smem_spec,                                              # wg (flat)
                smem_spec,                                              # wx (flat)
                smem_spec,                                              # shift
                smem_spec,                                              # wpsi
                smem_spec,                                              # spsi
                pl.BlockSpec((1, Cg, TS, LANE), lambda n, p: (n, 0, p, 0)),
                pl.BlockSpec((1, Cl, TS, LANE), lambda n, p: (n, 0, p, 0)),
            ],
            out_specs=pl.BlockSpec((1, Cl, TS, LANE), lambda n, p: (n, 0, p, 0)),
        ),
        compiler_params=pltpu.CompilerParams(
            dimension_semantics=("parallel", "parallel")),
        cost_estimate=pl.CostEstimate(flops=int(flops), transcendentals=int(M_eff),
                                      bytes_accessed=int(bytes_accessed)),
    )(wg.reshape(-1), wx.reshape(-1), shift, wpsi, spsi, g4, x4)

    out = out.reshape(N, Cl, P_p * LANE)[:, :, :HW]
    return out.reshape(N, Cl, H, W)


# ===========================================================================
# Path 2: large channel counts (MXU, lane-dense NHWC tiles, resident weights)
# ===========================================================================
def _attention_mxu_kernel(g_ref, x_ref, wg_ref, wx_ref, shift_ref, wpsi_ref,
                          spsi_ref, o_ref):
    # g_ref: (TM, Cg_p) bf16   x_ref: (TM, Cl_p) bf16   o_ref: (TM, Cl_p) bf16
    # wg_ref/wx_ref: bf16 (BN-scale folded)   shift/wpsi: (1, Ci_p) f32   spsi: (1,1) f32
    a = (jnp.dot(g_ref[...], wg_ref[...], preferred_element_type=jnp.float32)
         + jnp.dot(x_ref[...], wx_ref[...], preferred_element_type=jnp.float32)
         + shift_ref[...])
    a = jnp.maximum(a, 0.0)                                         # ReLU
    logit = jnp.sum(a * wpsi_ref[...], axis=-1, keepdims=True) + spsi_ref[...]
    psi = pl.reciprocal(1.0 + jnp.exp(-logit), approx=True)         # sigmoid on EUP
    # re-read x here (no long f32 live range across the matmuls / reduction)
    o_ref[...] = (x_ref[...].astype(jnp.float32) * psi).astype(o_ref.dtype)


def attention_block_mxu(g_nchw, x_nchw, wg, wx, shift, wpsi, spsi, *, block_m=1024):
    N, Cg, H, W = g_nchw.shape
    _, Cl, _, _ = x_nchw.shape
    F_int = shift.shape[0]
    M = N * H * W
    Cg_p = _round_up(Cg, LANE)
    Cl_p = _round_up(Cl, LANE)
    Ci_p = _round_up(F_int, LANE)

    # --- tile size under an explicit VMEM budget (headroom under v7x 64 MiB) ---
    per_row = 2 * (2 * Cg_p + 2 * Cl_p + 2 * Cl_p)   # double-buffered bf16 g/x/out bytes
    weight_bytes = 2 * (Cg_p + Cl_p) * Ci_p          # resident bf16 weights
    tm = min(block_m, _round_up(M, LANE))
    while tm > LANE and tm * per_row + 2 * weight_bytes > (40 << 20):
        tm //= 2
    while tm > LANE and pl.cdiv(M, tm) < 2:          # keep grid >= 2 (megacore on v7x)
        tm //= 2
    tm = max(tm, LANE)
    M_p = _round_up(M, tm)

    # NCHW -> NHWC -> (M, C).  The relayout is required for the lane-dense MXU path;
    # the pad + bf16 cast fuse into the same pass under jit.
    g2 = jnp.transpose(g_nchw, (0, 2, 3, 1)).reshape(M, Cg)
    x2 = jnp.transpose(x_nchw, (0, 2, 3, 1)).reshape(M, Cl)
    g2 = jnp.pad(g2, ((0, M_p - M), (0, Cg_p - Cg))).astype(jnp.bfloat16)
    x2 = jnp.pad(x2, ((0, M_p - M), (0, Cl_p - Cl))).astype(jnp.bfloat16)

    wg_p = jnp.pad(wg.T, ((0, Cg_p - Cg), (0, Ci_p - F_int))).astype(jnp.bfloat16)
    wx_p = jnp.pad(wx.T, ((0, Cl_p - Cl), (0, Ci_p - F_int))).astype(jnp.bfloat16)
    shift_p = jnp.pad(shift, (0, Ci_p - F_int)).reshape(1, Ci_p)
    wpsi_p = jnp.pad(wpsi, (0, Ci_p - F_int)).reshape(1, Ci_p)
    spsi_p = spsi.reshape(1, 1)

    if weight_bytes > (1 << 20):
        # Big resident weights (constant index_map): single-buffer to free VMEM headroom.
        wg_spec = pl.BlockSpec((Cg_p, Ci_p), lambda i: (0, 0), pipeline_mode=pl.Buffered(1))
        wx_spec = pl.BlockSpec((Cl_p, Ci_p), lambda i: (0, 0), pipeline_mode=pl.Buffered(1))
    else:
        wg_spec = pl.BlockSpec((Cg_p, Ci_p), lambda i: (0, 0))
        wx_spec = pl.BlockSpec((Cl_p, Ci_p), lambda i: (0, 0))

    vmem_limit = int(min(60 << 20, max(tm * per_row + 2 * weight_bytes + (4 << 20),
                                       32 << 20)))

    flops = 2 * M_p * Ci_p * (Cg_p + Cl_p) + 5 * M_p * Ci_p + 2 * M_p * Cl_p
    bytes_accessed = 2 * M_p * (Cg_p + 2 * Cl_p) + weight_bytes + 4 * (2 * Ci_p + 1)

    out = pl.pallas_call(
        _attention_mxu_kernel,
        out_shape=jax.ShapeDtypeStruct((M_p, Cl_p), jnp.bfloat16),
        grid_spec=pltpu.PrefetchScalarGridSpec(
            num_scalar_prefetch=0,
            grid=(M_p // tm,),
            in_specs=[
                pl.BlockSpec((tm, Cg_p), lambda i: (i, 0)),   # g tile (streams)
                pl.BlockSpec((tm, Cl_p), lambda i: (i, 0)),   # x tile (streams)
                wg_spec,                                      # Wg (resident)
                wx_spec,                                      # Wx (resident)
                pl.BlockSpec((1, Ci_p), lambda i: (0, 0)),    # shift
                pl.BlockSpec((1, Ci_p), lambda i: (0, 0)),    # wpsi
                pl.BlockSpec((1, 1), lambda i: (0, 0)),       # psi shift
            ],
            out_specs=pl.BlockSpec((tm, Cl_p), lambda i: (i, 0)),
        ),
        compiler_params=pltpu.CompilerParams(
            dimension_semantics=("parallel",),
            vmem_limit_bytes=vmem_limit),
        cost_estimate=pl.CostEstimate(flops=int(flops), transcendentals=int(M_p),
                                      bytes_accessed=int(bytes_accessed)),
    )(g2, x2, wg_p, wx_p, shift_p, wpsi_p, spsi_p)

    out = out[:M, :Cl].reshape(N, H, W, Cl)
    return jnp.transpose(out, (0, 3, 1, 2))


# ------------------------------ Module wrapper -------------------------------
class AttentionBlockPallas:
    """Mirror of PyTorch Attention_block(F_g, F_l, F_int); inference-mode BN.

    Returns bf16 NCHW (halves the kernel's HBM write traffic)."""

    def __init__(self, F_g, F_l, F_int, *, key, block_m=1024, ts_max=256):
        self.F_g, self.F_l, self.F_int = F_g, F_l, F_int
        self.eps = 1e-5
        self.block_m = block_m
        self.ts_max = ts_max

        ks = jax.random.split(key, 18)

        # W_g: Conv2d(F_g, F_int, 1, bias=True) + BatchNorm2d(F_int)
        self.w_g = 0.1 * jax.random.normal(ks[0], (F_int, F_g, 1, 1), jnp.float32)
        self.b_g = 0.1 * jax.random.normal(ks[1], (F_int,), jnp.float32)
        self.gamma_g = 1.0 + 0.1 * jax.random.normal(ks[2], (F_int,), jnp.float32)
        self.beta_g = 0.1 * jax.random.normal(ks[3], (F_int,), jnp.float32)
        self.mean_g = 0.1 * jax.random.normal(ks[4], (F_int,), jnp.float32)
        self.var_g = 1.0 + 0.1 * jax.random.uniform(ks[5], (F_int,), jnp.float32)

        # W_x: Conv2d(F_l, F_int, 1, bias=True) + BatchNorm2d(F_int)
        self.w_x = 0.1 * jax.random.normal(ks[6], (F_int, F_l, 1, 1), jnp.float32)
        self.b_x = 0.1 * jax.random.normal(ks[7], (F_int,), jnp.float32)
        self.gamma_x = 1.0 + 0.1 * jax.random.normal(ks[8], (F_int,), jnp.float32)
        self.beta_x = 0.1 * jax.random.normal(ks[9], (F_int,), jnp.float32)
        self.mean_x = 0.1 * jax.random.normal(ks[10], (F_int,), jnp.float32)
        self.var_x = 1.0 + 0.1 * jax.random.uniform(ks[11], (F_int,), jnp.float32)

        # psi: Conv2d(F_int, 1, 1, bias=True) + BatchNorm2d(1) + Sigmoid
        self.w_psi = 0.1 * jax.random.normal(ks[12], (1, F_int, 1, 1), jnp.float32)
        self.b_psi = 0.1 * jax.random.normal(ks[13], (1,), jnp.float32)
        self.gamma_p = 1.0 + 0.1 * jax.random.normal(ks[14], (1,), jnp.float32)
        self.beta_p = 0.1 * jax.random.normal(ks[15], (1,), jnp.float32)
        self.mean_p = 0.1 * jax.random.normal(ks[16], (1,), jnp.float32)
        self.var_p = 1.0 + 0.1 * jax.random.uniform(ks[17], (1,), jnp.float32)

        self._forward = jax.jit(self._forward_impl)

    def _folded_params(self):
        sg = self.gamma_g / jnp.sqrt(self.var_g + self.eps)
        sx = self.gamma_x / jnp.sqrt(self.var_x + self.eps)
        sp = self.gamma_p / jnp.sqrt(self.var_p + self.eps)                # (1,)
        wg = self.w_g[:, :, 0, 0] * sg[:, None]                            # (F_int, F_g)
        wx = self.w_x[:, :, 0, 0] * sx[:, None]                            # (F_int, F_l)
        shift = ((self.b_g - self.mean_g) * sg + self.beta_g
                 + (self.b_x - self.mean_x) * sx + self.beta_x)            # (F_int,)
        wpsi = self.w_psi[0, :, 0, 0] * sp[0]                              # (F_int,)
        spsi = (self.b_psi - self.mean_p) * sp + self.beta_p               # (1,)
        return wg, wx, shift, wpsi, spsi

    def _forward_impl(self, g, x):
        wg, wx, shift, wpsi, spsi = self._folded_params()
        small = (self.F_int * (self.F_g + self.F_l) <= 2048) and (self.F_int <= 128)
        if small:
            return attention_block_small(g, x, wg, wx, shift, wpsi, spsi,
                                         ts_max=self.ts_max)
        return attention_block_mxu(g, x, wg, wx, shift, wpsi, spsi,
                                   block_m=self.block_m)

    def __call__(self, g, x):
        return self._forward(g, x)


# ------------------------------ Pure-JAX reference ---------------------------
def reference(mod, g, x):
    def conv1x1(inp, w, b):
        y = lax.conv_general_dilated(inp, w, (1, 1), "VALID",
                                     dimension_numbers=("NCHW", "OIHW", "NCHW"),
                                     precision=lax.Precision.HIGHEST)
        return y + b[None, :, None, None]

    def bn(y, gamma, beta, mean, var):
        s = gamma / jnp.sqrt(var + mod.eps)
        return y * s[None, :, None, None] + (beta - mean * s)[None, :, None, None]

    g1 = bn(conv1x1(g, mod.w_g, mod.b_g), mod.gamma_g, mod.beta_g, mod.mean_g, mod.var_g)
    x1 = bn(conv1x1(x, mod.w_x, mod.b_x), mod.gamma_x, mod.beta_x, mod.mean_x, mod.var_x)
    a = jnp.maximum(g1 + x1, 0.0)
    p = bn(conv1x1(a, mod.w_psi, mod.b_psi), mod.gamma_p, mod.beta_p, mod.mean_p, mod.var_p)
    p = 1.0 / (1.0 + jnp.exp(-p))
    return x * p


if __name__ == "__main__":
    key = jax.random.PRNGKey(0)
    k1, k2, k3, k4, k5, k6 = jax.random.split(key, 6)

    # Config 1: the shipped small-channel sizes -> VPU / no-channel-padding path.
    mod_s = AttentionBlockPallas(4, 4, 32, key=k1)
    g_s = jax.random.normal(k2, (2, 4, 16, 16), jnp.float32)
    x_s = jax.random.normal(k3, (2, 4, 16, 16), jnp.float32)
    y_s = mod_s(g_s, x_s)
    jax.block_until_ready(y_s)
    y_s_ref = reference(mod_s, g_s, x_s)
    assert y_s.shape == y_s_ref.shape == (2, 4, 16, 16)
    # bf16 output + bf16-ish compute -> relaxed tolerance vs the f32 reference.
    assert jnp.allclose(y_s.astype(jnp.float32), y_s_ref, atol=3e-2, rtol=3e-2)

    # Config 2: real-sized channels -> MXU path (bf16 streams, resident weights).
    mod_l = AttentionBlockPallas(128, 128, 64, key=k4)
    g_l = jax.random.normal(k5, (2, 128, 16, 16), jnp.float32)
    x_l = jax.random.normal(k6, (2, 128, 16, 16), jnp.float32)
    y_l = mod_l(g_l, x_l)
    jax.block_until_ready(y_l)
    y_l_ref = reference(mod_l, g_l, x_l)
    assert y_l.shape == y_l_ref.shape == (2, 128, 16, 16)
    assert jnp.allclose(y_l.astype(jnp.float32), y_l_ref, atol=3e-2, rtol=3e-2)

    print("KERNEL_OK")
</pallas_src>

<mosaic_0001>
module attributes {stable_mosaic.version = 11 : i64} {
  func.func @_attention_small_kernel(%arg0: i32, %arg1: i32, %arg2: memref<128xf32, #tpu.memory_space<smem>>, %arg3: memref<128xf32, #tpu.memory_space<smem>>, %arg4: memref<32xf32, #tpu.memory_space<smem>>, %arg5: memref<32xf32, #tpu.memory_space<smem>>, %arg6: memref<1xf32, #tpu.memory_space<smem>>, %arg7: memref<1x4x2x128xf32, #tpu.memory_space<vmem>>, %arg8: memref<1x4x2x128xf32, #tpu.memory_space<vmem>>, %arg9: memref<1x4x2x128xbf16, #tpu.memory_space<vmem>>) attributes {dimension_semantics = [#tpu.dimension_semantics<parallel>, #tpu.dimension_semantics<parallel>], iteration_bounds = array<i64: 2, 1>, scalar_prefetch = 0 : i64, scratch_operands = 0 : i64, tpu.core_type = #tpu.core_type<tc>, window_params = [{transform_indices = @transform_0, window_bounds = array<i64: 128>}, {transform_indices = @transform_1, window_bounds = array<i64: 128>}, {transform_indices = @transform_2, window_bounds = array<i64: 32>}, {transform_indices = @transform_3, window_bounds = array<i64: 32>}, {transform_indices = @transform_4, window_bounds = array<i64: 1>}, {transform_indices = @transform_5, window_bounds = array<i64: 1, 4, 2, 128>}, {transform_indices = @transform_6, window_bounds = array<i64: 1, 4, 2, 128>}, {transform_indices = @transform_7, window_bounds = array<i64: 1, 4, 2, 128>}]} {
    %c0 = arith.constant 0 : index
    %c0_0 = arith.constant 0 : index
    %c0_1 = arith.constant 0 : index
    %c0_2 = arith.constant 0 : index
    %0 = vector.load %arg7[%c0, %c0_0, %c0_1, %c0_2] : memref<1x4x2x128xf32, #tpu.memory_space<vmem>>, vector<1x1x2x128xf32>
    %1 = vector.shape_cast %0 : vector<1x1x2x128xf32> to vector<2x128xf32>
    %c0_3 = arith.constant 0 : index
    %c1 = arith.constant 1 : index
    %c0_4 = arith.constant 0 : index
    %c0_5 = arith.constant 0 : index
    %2 = vector.load %arg7[%c0_3, %c1, %c0_4, %c0_5] : memref<1x4x2x128xf32, #tpu.memory_space<vmem>>, vector<1x1x2x128xf32>
    %3 = vector.shape_cast %2 : vector<1x1x2x128xf32> to vector<2x128xf32>
    %c0_6 = arith.constant 0 : index
    %c2 = arith.constant 2 : index
    %c0_7 = arith.constant 0 : index
    %c0_8 = arith.constant 0 : index
    %4 = vector.load %arg7[%c0_6, %c2, %c0_7, %c0_8] : memref<1x4x2x128xf32, #tpu.memory_space<vmem>>, vector<1x1x2x128xf32>
    %5 = vector.shape_cast %4 : vector<1x1x2x128xf32> to vector<2x128xf32>
    %c0_9 = arith.constant 0 : index
    %c3 = arith.constant 3 : index
    %c0_10 = arith.constant 0 : index
    %c0_11 = arith.constant 0 : index
    %6 = vector.load %arg7[%c0_9, %c3, %c0_10, %c0_11] : memref<1x4x2x128xf32, #tpu.memory_space<vmem>>, vector<1x1x2x128xf32>
    %7 = vector.shape_cast %6 : vector<1x1x2x128xf32> to vector<2x128xf32>
    %c0_12 = arith.constant 0 : index
    %c0_13 = arith.constant 0 : index
    %c0_14 = arith.constant 0 : index
    %c0_15 = arith.constant 0 : index
    %8 = vector.load %arg8[%c0_12, %c0_13, %c0_14, %c0_15] : memref<1x4x2x128xf32, #tpu.memory_space<vmem>>, vector<1x1x2x128xf32>
    %9 = vector.shape_cast %8 : vector<1x1x2x128xf32> to vector<2x128xf32>
    %c0_16 = arith.constant 0 : index
    %c1_17 = arith.constant 1 : index
    %c0_18 = arith.constant 0 : index
    %c0_19 = arith.constant 0 : index
    %10 = vector.load %arg8[%c0_16, %c1_17, %c0_18, %c0_19] : memref<1x4x2x128xf32, #tpu.memory_space<vmem>>, vector<1x1x2x128xf32>
    %11 = vector.shape_cast %10 : vector<1x1x2x128xf32> to vector<2x128xf32>
    %c0_20 = arith.constant 0 : index
    %c2_21 = arith.constant 2 : index
    %c0_22 = arith.constant 0 : index
    %c0_23 = arith.constant 0 : index
    %12 = vector.load %arg8[%c0_20, %c2_21, %c0_22, %c0_23] : memref<1x4x2x128xf32, #tpu.memory_space<vmem>>, vector<1x1x2x128xf32>
    %13 = vector.shape_cast %12 : vector<1x1x2x128xf32> to vector<2x128xf32>
    %c0_24 = arith.constant 0 : index
    %c3_25 = arith.constant 3 : index
    %c0_26 = arith.constant 0 : index
    %c0_27 = arith.constant 0 : index
    %14 = vector.load %arg8[%c0_24, %c3_25, %c0_26, %c0_27] : memref<1x4x2x128xf32, #tpu.memory_space<vmem>>, vector<1x1x2x128xf32>
    %15 = vector.shape_cast %14 : vector<1x1x2x128xf32> to vector<2x128xf32>
    %c0_28 = arith.constant 0 : index
    %16 = memref.load %arg2[%c0_28] : memref<128xf32, #tpu.memory_space<smem>>
    %17 = vector.broadcast %16 : f32 to vector<2x128xf32>
    %18 = arith.mulf %1, %17 : vector<2x128xf32>
    %c1_29 = arith.constant 1 : index
    %19 = memref.load %arg2[%c1_29] : memref<128xf32, #tpu.memory_space<smem>>
    %20 = vector.broadcast %19 : f32 to vector<2x128xf32>
    %21 = arith.mulf %3, %20 : vector<2x128xf32>
    %22 = arith.addf %18, %21 : vector<2x128xf32>
    %c2_30 = arith.constant 2 : index
    %23 = memref.load %arg2[%c2_30] : memref<128xf32, #tpu.memory_space<smem>>
    %24 = vector.broadcast %23 : f32 to vector<2x128xf32>
    %25 = arith.mulf %5, %24 : vector<2x128xf32>
    %26 = arith.addf %22, %25 : vector<2x128xf32>
    %c3_31 = arith.constant 3 : index
    %27 = memref.load %arg2[%c3_31] : memref<128xf32, #tpu.memory_space<smem>>
    %28 = vector.broadcast %27 : f32 to vector<2x128xf32>
    %29 = arith.mulf %7, %28 : vector<2x128xf32>
    %30 = arith.addf %26, %29 : vector<2x128xf32>
    %c0_32 = arith.constant 0 : index
    %31 = memref.load %arg3[%c0_32] : memref<128xf32, #tpu.memory_space<smem>>
    %32 = vector.broadcast %31 : f32 to vector<2x128xf32>
    %33 = arith.mulf %9, %32 : vector<2x128xf32>
    %34 = arith.addf %30, %33 : vector<2x128xf32>
    %c1_33 = arith.constant 1 : index
    %35 = memref.load %arg3[%c1_33] : memref<128xf32, #tpu.memory_space<smem>>
    %36 = vector.broadcast %35 : f32 to vector<2x128xf32>
    %37 = arith.mulf %11, %36 : vector<2x128xf32>
    %38 = arith.addf %34, %37 : vector<2x128xf32>
    %c2_34 = arith.constant 2 : index
    %39 = memref.load %arg3[%c2_34] : memref<128xf32, #tpu.memory_space<smem>>
    %40 = vector.broadcast %39 : f32 to vector<2x128xf32>
    %41 = arith.mulf %13, %40 : vector<2x128xf32>
    %42 = arith.addf %38, %41 : vector<2x128xf32>
    %c3_35 = arith.constant 3 : index
    %43 = memref.load %arg3[%c3_35] : memref<128xf32, #tpu.memory_space<smem>>
    %44 = vector.broadcast %43 : f32 to vector<2x128xf32>
    %45 = arith.mulf %15, %44 : vector<2x128xf32>
    %46 = arith.addf %42, %45 : vector<2x128xf32>
    %c0_36 = arith.constant 0 : index
    %47 = memref.load %arg4[%c0_36] : memref<32xf32, #tpu.memory_space<smem>>
    %48 = vector.broadcast %47 : f32 to vector<2x128xf32>
    %49 = arith.addf %46, %48 : vector<2x128xf32>
    %cst = arith.constant 0.000000e+00 : f32
    %50 = vector.broadcast %cst : f32 to vector<2x128xf32>
    %51 = arith.maximumf %49, %50 : vector<2x128xf32>
    %c0_37 = arith.constant 0 : index
    %52 = memref.load %arg5[%c0_37] : memref<32xf32, #tpu.memory_space<smem>>
    %53 = vector.broadcast %52 : f32 to vector<2x128xf32>
    %54 = arith.mulf %51, %53 : vector<2x128xf32>
    %c4 = arith.constant 4 : index
    %55 = memref.load %arg2[%c4] : memref<128xf32, #tpu.memory_space<smem>>
    %56 = vector.broadcast %55 : f32 to vector<2x128xf32>
    %57 = arith.mulf %1, %56 : vector<2x128xf32>
    %c5 = arith.constant 5 : index
    %58 = memref.load %arg2[%c5] : memref<128xf32, #tpu.memory_space<smem>>
    %59 = vector.broadcast %58 : f32 to vector<2x128xf32>
    %60 = arith.mulf %3, %59 : vector<2x128xf32>
    %61 = arith.addf %57, %60 : vector<2x128xf32>
    %c6 = arith.constant 6 : index
    %62 = memref.load %arg2[%c6] : memref<128xf32, #tpu.memory_space<smem>>
    %63 = vector.broadcast %62 : f32 to vector<2x128xf32>
    %64 = arith.mulf %5, %63 : vector<2x128xf32>
    %65 = arith.addf %61, %64 : vector<2x128xf32>
    %c7 = arith.constant 7 : index
    %66 = memref.load %arg2[%c7] : memref<128xf32, #tpu.memory_space<smem>>
    %67 = vector.broadcast %66 : f32 to vector<2x128xf32>
    %68 = arith.mulf %7, %67 : vector<2x128xf32>
    %69 = arith.addf %65, %68 : vector<2x128xf32>
    %c4_38 = arith.constant 4 : index
    %70 = memref.load %arg3[%c4_38] : memref<128xf32, #tpu.memory_space<smem>>
    %71 = vector.broadcast %70 : f32 to vector<2x128xf32>
    %72 = arith.mulf %9, %71 : vector<2x128xf32>
    %73 = arith.addf %69, %72 : vector<2x128xf32>
    %c5_39 = arith.constant 5 : index
    %74 = memref.load %arg3[%c5_39] : memref<128xf32, #tpu.memory_space<smem>>
    %75 = vector.broadcast %74 : f32 to vector<2x128xf32>
    %76 = arith.mulf %11, %75 : vector<2x128xf32>
    %77 = arith.addf %73, %76 : vector<2x128xf32>
    %c6_40 = arith.constant 6 : index
    %78 = memref.load %arg3[%c6_40] : memref<128xf32, #tpu.memory_space<smem>>
    %79 = vector.broadcast %78 : f32 to vector<2x128xf32>
    %80 = arith.mulf %13, %79 : vector<2x128xf32>
    %81 = arith.addf %77, %80 : vector<2x128xf32>
    %c7_41 = arith.constant 7 : index
    %82 = memref.load %arg3[%c7_41] : memref<128xf32, #tpu.memory_space<smem>>
    %83 = vector.broadcast %82 : f32 to vector<2x128xf32>
    %84 = arith.mulf %15, %83 : vector<2x128xf32>
    %85 = arith.addf %81, %84 : vector<2x128xf32>
    %c1_42 = arith.constant 1 : index
    %86 = memref.load %arg4[%c1_42] : memref<32xf32, #tpu.memory_space<smem>>
    %87 = vector.broadcast %86 : f32 to vector<2x128xf32>
    %88 = arith.addf %85, %87 : vector<2x128xf32>
    %cst_43 = arith.constant 0.000000e+00 : f32
    %89 = vector.broadcast %cst_43 : f32 to vector<2x128xf32>
    %90 = arith.maximumf %88, %89 : vector<2x128xf32>
    %c1_44 = arith.constant 1 : index
    %91 = memref.load %arg5[%c1_44] : memref<32xf32, #tpu.memory_space<smem>>
    %92 = vector.broadcast %91 : f32 to vector<2x128xf32>
    %93 = arith.mulf %90, %92 : vector<2x128xf32>
    %94 = arith.addf %54, %93 : vector<2x128xf32>
    %c8 = arith.constant 8 : index
    %95 = memref.load %arg2[%c8] : memref<128xf32, #tpu.memory_space<smem>>
    %96 = vector.broadcast %95 : f32 to vector<2x128xf32>
    %97 = arith.mulf %1, %96 : vector<2x128xf32>
    %c9 = arith.constant 9 : index
    %98 = memref.load %arg2[%c9] : memref<128xf32, #tpu.memory_space<smem>>
    %99 = vector.broadcast %98 : f32 to vector<2x128xf32>
    %100 = arith.mulf %3, %99 : vector<2x128xf32>
    %101 = arith.addf %97, %100 : vector<2x128xf32>
    %c10 = arith.constant 10 : index
    %102 = memref.load %arg2[%c10] : memref<128xf32, #tpu.memory_space<smem>>
    %103 = vector.broadcast %102 : f32 to vector<2x128xf32>
    %104 = arith.mulf %5, %103 : vector<2x128xf32>
    %105 = arith.addf %101, %104 : vector<2x128xf32>
    %c11 = arith.constant 11 : index
    %106 = memref.load %arg2[%c11] : memref<128xf32, #tpu.memory_space<smem>>
    %107 = vector.broadcast %106 : f32 to vector<2x128xf32>
    %108 = arith.mulf %7, %107 : vector<2x128xf32>
    %109 = arith.addf %105, %108 : vector<2x128xf32>
    %c8_45 = arith.constant 8 : index
    %110 = memref.load %arg3[%c8_45] : memref<128xf32, #tpu.memory_space<smem>>
    %111 = vector.broadcast %110 : f32 to vector<2x128xf32>
    %112 = arith.mulf %9, %111 : vector<2x128xf32>
    %113 = arith.addf %109, %112 : vector<2x128xf32>
    %c9_46 = arith.constant 9 : index
    %114 = memref.load %arg3[%c9_46] : memref<128xf32, #tpu.memory_space<smem>>
    %115 = vector.broadcast %114 : f32 to vector<2x128xf32>
    %116 = arith.mulf %11, %115 : vector<2x128xf32>
    %117 = arith.addf %113, %116 : vector<2x128xf32>
    %c10_47 = arith.constant 10 : index
    %118 = memref.load %arg3[%c10_47] : memref<128xf32, #tpu.memory_space<smem>>
    %119 = vector.broadcast %118 : f32 to vector<2x128xf32>
    %120 = arith.mulf %13, %119 : vector<2x128xf32>
    %121 = arith.addf %117, %120 : vector<2x128xf32>
    %c11_48 = arith.constant 11 : index
    %122 = memref.load %arg3[%c11_48] : memref<128xf32, #tpu.memory_space<smem>>
    %123 = vector.broadcast %122 : f32 to vector<2x128xf32>
    %124 = arith.mulf %15, %123 : vector<2x128xf32>
    %125 = arith.addf %121, %124 : vector<2x128xf32>
    %c2_49 = arith.constant 2 : index
    %126 = memref.load %arg4[%c2_49] : memref<32xf32, #tpu.memory_space<smem>>
    %127 = vector.broadcast %126 : f32 to vector<2x128xf32>
    %128 = arith.addf %125, %127 : vector<2x128xf32>
    %cst_50 = arith.constant 0.000000e+00 : f32
    %129 = vector.broadcast %cst_50 : f32 to vector<2x128xf32>
    %130 = arith.maximumf %128, %129 : vector<2x128xf32>
    %c2_51 = arith.constant 2 : index
    %131 = memref.load %arg5[%c2_51] : memref<32xf32, #tpu.memory_space<smem>>
    %132 = vector.broadcast %131 : f32 to vector<2x128xf32>
    %133 = arith.mulf %130, %132 : vector<2x128xf32>
    %134 = arith.addf %94, %133 : vector<2x128xf32>
    %c12 = arith.constant 12 : index
    %135 = memref.load %arg2[%c12] : memref<128xf32, #tpu.memory_space<smem>>
    %136 = vector.broadcast %135 : f32 to vector<2x128xf32>
    %137 = arith.mulf %1, %136 : vector<2x128xf32>
    %c13 = arith.constant 13 : index
    %138 = memref.load %arg2[%c13] : memref<128xf32, #tpu.memory_space<smem>>
    %139 = vector.broadcast %138 : f32 to vector<2x128xf32>
    %140 = arith.mulf %3, %139 : vector<2x128xf32>
    %141 = arith.addf %137, %140 : vector<2x128xf32>
    %c14 = arith.constant 14 : index
    %142 = memref.load %arg2[%c14] : memref<128xf32, #tpu.memory_space<smem>>
    %143 = vector.broadcast %142 : f32 to vector<2x128xf32>
    %144 = arith.mulf %5, %143 : vector<2x128xf32>
    %145 = arith.addf %141, %144 : vector<2x128xf32>
    %c15 = arith.constant 15 : index
    %146 = memref.load %arg2[%c15] : memref<128xf32, #tpu.memory_space<smem>>
    %147 = vector.broadcast %146 : f32 to vector<2x128xf32>
    %148 = arith.mulf %7, %147 : vector<2x128xf32>
    %149 = arith.addf %145, %148 : vector<2x128xf32>
    %c12_52 = arith.constant 12 : index
    %150 = memref.load %arg3[%c12_52] : memref<128xf32, #tpu.memory_space<smem>>
    %151 = vector.broadcast %150 : f32 to vector<2x128xf32>
    %152 = arith.mulf %9, %151 : vector<2x128xf32>
    %153 = arith.addf %149, %152 : vector<2x128xf32>
    %c13_53 = arith.constant 13 : index
    %154 = memref.load %arg3[%c13_53] : memref<128xf32, #tpu.memory_space<smem>>
    %155 = vector.broadcast %154 : f32 to vector<2x128xf32>
    %156 = arith.mulf %11, %155 : vector<2x128xf32>
    %157 = arith.addf %153, %156 : vector<2x128xf32>
    %c14_54 = arith.constant 14 : index
    %158 = memref.load %arg3[%c14_54] : memref<128xf32, #tpu.memory_space<smem>>
    %159 = vector.broadcast %158 : f32 to vector<2x128xf32>
    %160 = arith.mulf %13, %159 : vector<2x128xf32>
    %161 = arith.addf %157, %160 : vector<2x128xf32>
    %c15_55 = arith.constant 15 : index
    %162 = memref.load %arg3[%c15_55] : memref<128xf32, #tpu.memory_space<smem>>
    %163 = vector.broadcast %162 : f32 to vector<2x128xf32>
    %164 = arith.mulf %15, %163 : vector<2x128xf32>
    %165 = arith.addf %161, %164 : vector<2x128xf32>
    %c3_56 = arith.constant 3 : index
    %166 = memref.load %arg4[%c3_56] : memref<32xf32, #tpu.memory_space<smem>>
    %167 = vector.broadcast %166 : f32 to vector<2x128xf32>
    %168 = arith.addf %165, %167 : vector<2x128xf32>
    %cst_57 = arith.constant 0.000000e+00 : f32
    %169 = vector.broadcast %cst_57 : f32 to vector<2x128xf32>
    %170 = arith.maximumf %168, %169 : vector<2x128xf32>
    %c3_58 = arith.constant 3 : index
    %171 = memref.load %arg5[%c3_58] : memref<32xf32, #tpu.memory_space<smem>>
    %172 = vector.broadcast %171 : f32 to vector<2x128xf32>
    %173 = arith.mulf %170, %172 : vector<2x128xf32>
    %174 = arith.addf %134, %173 : vector<2x128xf32>
    %c16 = arith.constant 16 : index
    %175 = memref.load %arg2[%c16] : memref<128xf32, #tpu.memory_space<smem>>
    %176 = vector.broadcast %175 : f32 to vector<2x128xf32>
    %177 = arith.mulf %1, %176 : vector<2x128xf32>
    %c17 = arith.constant 17 : index
    %178 = memref.load %arg2[%c17] : memref<128xf32, #tpu.memory_space<smem>>
    %179 = vector.broadcast %178 : f32 to vector<2x128xf32>
    %180 = arith.mulf %3, %179 : vector<2x128xf32>
    %181 = arith.addf %177, %180 : vector<2x128xf32>
    %c18 = arith.constant 18 : index
    %182 = memref.load %arg2[%c18] : memref<128xf32, #tpu.memory_space<smem>>
    %183 = vector.broadcast %182 : f32 to vector<2x128xf32>
    %184 = arith.mulf %5, %183 : vector<2x128xf32>
    %185 = arith.addf %181, %184 : vector<2x128xf32>
    %c19 = arith.constant 19 : index
    %186 = memref.load %arg2[%c19] : memref<128xf32, #tpu.memory_space<smem>>
    %187 = vector.broadcast %186 : f32 to vector<2x128xf32>
    %188 = arith.mulf %7, %187 : vector<2x128xf32>
    %189 = arith.addf %185, %188 : vector<2x128xf32>
    %c16_59 = arith.constant 16 : index
    %190 = memref.load %arg3[%c16_59] : memref<128xf32, #tpu.memory_space<smem>>
    %191 = vector.broadcast %190 : f32 to vector<2x128xf32>
    %192 = arith.mulf %9, %191 : vector<2x128xf32>
    %193 = arith.addf %189, %192 : vector<2x128xf32>
    %c17_60 = arith.constant 17 : index
    %194 = memref.load %arg3[%c17_60] : memref<128xf32, #tpu.memory_space<smem>>
    %195 = vector.broadcast %194 : f32 to vector<2x128xf32>
    %196 = arith.mulf %11, %195 : vector<2x128xf32>
    %197 = arith.addf %193, %196 : vector<2x128xf32>
    %c18_61 = arith.constant 18 : index
    %198 = memref.load %arg3[%c18_61] : memref<128xf32, #tpu.memory_space<smem>>
    %199 = vector.broadcast %198 : f32 to vector<2x128xf32>
    %200 = arith.mulf %13, %199 : vector<2x128xf32>
    %201 = arith.addf %197, %200 : vector<2x128xf32>
    %c19_62 = arith.constant 19 : index
    %202 = memref.load %arg3[%c19_62] : memref<128xf32, #tpu.memory_space<smem>>
    %203 = vector.broadcast %202 : f32 to vector<2x128xf32>
    %204 = arith.mulf %15, %203 : vector<2x128xf32>
    %205 = arith.addf %201, %204 : vector<2x128xf32>
    %c4_63 = arith.constant 4 : index
    %206 = memref.load %arg4[%c4_63] : memref<32xf32, #tpu.memory_space<smem>>
    %207 = vector.broadcast %206 : f32 to vector<2x128xf32>
    %208 = arith.addf %205, %207 : vector<2x128xf32>
    %cst_64 = arith.constant 0.000000e+00 : f32
    %209 = vector.broadcast %cst_64 : f32 to vector<2x128xf32>
    %210 = arith.maximumf %208, %209 : vector<2x128xf32>
    %c4_65 = arith.constant 4 : index
    %211 = memref.load %arg5[%c4_65] : memref<32xf32, #tpu.memory_space<smem>>
    %212 = vector.broadcast %211 : f32 to vector<2x128xf32>
    %213 = arith.mulf %210, %212 : vector<2x128xf32>
    %214 = arith.addf %174, %213 : vector<2x128xf32>
    %c20 = arith.constant 20 : index
    %215 = memref.load %arg2[%c20] : memref<128xf32, #tpu.memory_space<smem>>
    %216 = vector.broadcast %215 : f32 to vector<2x128xf32>
    %217 = arith.mulf %1, %216 : vector<2x128xf32>
    %c21 = arith.constant 21 : index
    %218 = memref.load %arg2[%c21] : memref<128xf32, #tpu.memory_space<smem>>
    %219 = vector.broadcast %218 : f32 to vector<2x128xf32>
    %220 = arith.mulf %3, %219 : vector<2x128xf32>
    %221 = arith.addf %217, %220 : vector<2x128xf32>
    %c22 = arith.constant 22 : index
    %222 = memref.load %arg2[%c22] : memref<128xf32, #tpu.memory_space<smem>>
    %223 = vector.broadcast %222 : f32 to vector<2x128xf32>
    %224 = arith.mulf %5, %223 : vector<2x128xf32>
    %225 = arith.addf %221, %224 : vector<2x128xf32>
    %c23 = arith.constant 23 : index
    %226 = memref.load %arg2[%c23] : memref<128xf32, #tpu.memory_space<smem>>
    %227 = vector.broadcast %226 : f32 to vector<2x128xf32>
    %228 = arith.mulf %7, %227 : vector<2x128xf32>
    %229 = arith.addf %225, %228 : vector<2x128xf32>
    %c20_66 = arith.constant 20 : index
    %230 = memref.load %arg3[%c20_66] : memref<128xf32, #tpu.memory_space<smem>>
    %231 = vector.broadcast %230 : f32 to vector<2x128xf32>
    %232 = arith.mulf %9, %231 : vector<2x128xf32>
    %233 = arith.addf %229, %232 : vector<2x128xf32>
    %c21_67 = arith.constant 21 : index
    %234 = memref.load %arg3[%c21_67] : memref<128xf32, #tpu.memory_space<smem>>
    %235 = vector.broadcast %234 : f32 to vector<2x128xf32>
    %236 = arith.mulf %11, %235 : vector<2x128xf32>
    %237 = arith.addf %233, %236 : vector<2x128xf32>
    %c22_68 = arith.constant 22 : index
    %238 = memref.load %arg3[%c22_68] : memref<128xf32, #tpu.memory_space<smem>>
    %239 = vector.broadcast %238 : f32 to vector<2x128xf32>
    %240 = arith.mulf %13, %239 : vector<2x128xf32>
    %241 = arith.addf %237, %240 : vector<2x128xf32>
    %c23_69 = arith.constant 23 : index
    %242 = memref.load %arg3[%c23_69] : memref<128xf32, #tpu.memory_space<smem>>
    %243 = vector.broadcast %242 : f32 to vector<2x128xf32>
    %244 = arith.mulf %15, %243 : vector<2x128xf32>
    %245 = arith.addf %241, %244 : vector<2x128xf32>
    %c5_70 = arith.constant 5 : index
    %246 = memref.load %arg4[%c5_70] : memref<32xf32, #tpu.memory_space<smem>>
    %247 = vector.broadcast %246 : f32 to vector<2x128xf32>
    %248 = arith.addf %245, %247 : vector<2x128xf32>
    %cst_71 = arith.constant 0.000000e+00 : f32
    %249 = vector.broadcast %cst_71 : f32 to vector<2x128xf32>
    %250 = arith.maximumf %248, %249 : vector<2x128xf32>
    %c5_72 = arith.constant 5 : index
    %251 = memref.load %arg5[%c5_72] : memref<32xf32, #tpu.memory_space<smem>>
    %252 = vector.broadcast %251 : f32 to vector<2x128xf32>
    %253 = arith.mulf %250, %252 : vector<2x128xf32>
    %254 = arith.addf %214, %253 : vector<2x128xf32>
    %c24 = arith.constant 24 : index
    %255 = memref.load %arg2[%c24] : memref<128xf32, #tpu.memory_space<smem>>
    %256 = vector.broadcast %255 : f32 to vector<2x128xf32>
    %257 = arith.mulf %1, %256 : vector<2x128xf32>
    %c25 = arith.constant 25 : index
    %258 = memref.load %arg2[%c25] : memref<128xf32, #tpu.memory_space<smem>>
    %259 = vector.broadcast %258 : f32 to vector<2x128xf32>
    %260 = arith.mulf %3, %259 : vector<2x128xf32>
    %261 = arith.addf %257, %260 : vector<2x128xf32>
    %c26 = arith.constant 26 : index
    %262 = memref.load %arg2[%c26] : memref<128xf32, #tpu.memory_space<smem>>
    %263 = vector.broadcast %262 : f32 to vector<2x128xf32>
    %264 = arith.mulf %5, %263 : vector<2x128xf32>
    %265 = arith.addf %261, %264 : vector<2x128xf32>
    %c27 = arith.constant 27 : index
    %266 = memref.load %arg2[%c27] : memref<128xf32, #tpu.memory_space<smem>>
    %267 = vector.broadcast %266 : f32 to vector<2x128xf32>
    %268 = arith.mulf %7, %267 : vector<2x128xf32>
    %269 = arith.addf %265, %268 : vector<2x128xf32>
    %c24_73 = arith.constant 24 : index
    %270 = memref.load %arg3[%c24_73] : memref<128xf32, #tpu.memory_space<smem>>
    %271 = vector.broadcast %270 : f32 to vector<2x128xf32>
    %272 = arith.mulf %9, %271 : vector<2x128xf32>
    %273 = arith.addf %269, %272 : vector<2x128xf32>
    %c25_74 = arith.constant 25 : index
    %274 = memref.load %arg3[%c25_74] : memref<128xf32, #tpu.memory_space<smem>>
    %275 = vector.broadcast %274 : f32 to vector<2x128xf32>
    %276 = arith.mulf %11, %275 : vector<2x128xf32>
    %277 = arith.addf %273, %276 : vector<2x128xf32>
    %c26_75 = arith.constant 26 : index
    %278 = memref.load %arg3[%c26_75] : memref<128xf32, #tpu.memory_space<smem>>
    %279 = vector.broadcast %278 : f32 to vector<2x128xf32>
    %280 = arith.mulf %13, %279 : vector<2x128xf32>
    %281 = arith.addf %277, %280 : vector<2x128xf32>
    %c27_76 = arith.constant 27 : index
    %282 = memref.load %arg3[%c27_76] : memref<128xf32, #tpu.memory_space<smem>>
    %283 = vector.broadcast %282 : f32 to vector<2x128xf32>
    %284 = arith.mulf %15, %283 : vector<2x128xf32>
    %285 = arith.addf %281, %284 : vector<2x128xf32>
    %c6_77 = arith.constant 6 : index
    %286 = memref.load %arg4[%c6_77] : memref<32xf32, #tpu.memory_space<smem>>
    %287 = vector.broadcast %286 : f32 to vector<2x128xf32>
    %288 = arith.addf %285, %287 : vector<2x128xf32>
    %cst_78 = arith.constant 0.000000e+00 : f32
    %289 = vector.broadcast %cst_78 : f32 to vector<2x128xf32>
    %290 = arith.maximumf %288, %289 : vector<2x128xf32>
    %c6_79 = arith.constant 6 : index
    %291 = memref.load %arg5[%c6_79] : memref<32xf32, #tpu.memory_space<smem>>
    %292 = vector.broadcast %291 : f32 to vector<2x128xf32>
    %293 = arith.mulf %290, %292 : vector<2x128xf32>
    %294 = arith.addf %254, %293 : vector<2x128xf32>
    %c28 = arith.constant 28 : index
    %295 = memref.load %arg2[%c28] : memref<128xf32, #tpu.memory_space<smem>>
    %296 = vector.broadcast %295 : f32 to vector<2x128xf32>
    %297 = arith.mulf %1, %296 : vector<2x128xf32>
    %c29 = arith.constant 29 : index
    %298 = memref.load %arg2[%c29] : memref<128xf32, #tpu.memory_space<smem>>
    %299 = vector.broadcast %298 : f32 to vector<2x128xf32>
    %300 = arith.mulf %3, %299 : vector<2x128xf32>
    %301 = arith.addf %297, %300 : vector<2x128xf32>
    %c30 = arith.constant 30 : index
    %302 = memref.load %arg2[%c30] : memref<128xf32, #tpu.memory_space<smem>>
    %303 = vector.broadcast %302 : f32 to vector<2x128xf32>
    %304 = arith.mulf %5, %303 : vector<2x128xf32>
    %305 = arith.addf %301, %304 : vector<2x128xf32>
    %c31 = arith.constant 31 : index
    %306 = memref.load %arg2[%c31] : memref<128xf32, #tpu.memory_space<smem>>
    %307 = vector.broadcast %306 : f32 to vector<2x128xf32>
    %308 = arith.mulf %7, %307 : vector<2x128xf32>
    %309 = arith.addf %305, %308 : vector<2x128xf32>
    %c28_80 = arith.constant 28 : index
    %310 = memref.load %arg3[%c28_80] : memref<128xf32, #tpu.memory_space<smem>>
    %311 = vector.broadcast %310 : f32 to vector<2x128xf32>
    %312 = arith.mulf %9, %311 : vector<2x128xf32>
    %313 = arith.addf %309, %312 : vector<2x128xf32>
    %c29_81 = arith.constant 29 : index
    %314 = memref.load %arg3[%c29_81] : memref<128xf32, #tpu.memory_space<smem>>
    %315 = vector.broadcast %314 : f32 to vector<2x128xf32>
    %316 = arith.mulf %11, %315 : vector<2x128xf32>
    %317 = arith.addf %313, %316 : vector<2x128xf32>
    %c30_82 = arith.constant 30 : index
    %318 = memref.load %arg3[%c30_82] : memref<128xf32, #tpu.memory_space<smem>>
    %319 = vector.broadcast %318 : f32 to vector<2x128xf32>
    %320 = arith.mulf %13, %319 : vector<2x128xf32>
    %321 = arith.addf %317, %320 : vector<2x128xf32>
    %c31_83 = arith.constant 31 : index
    %322 = memref.load %arg3[%c31_83] : memref<128xf32, #tpu.memory_space<smem>>
    %323 = vector.broadcast %322 : f32 to vector<2x128xf32>
    %324 = arith.mulf %15, %323 : vector<2x128xf32>
    %325 = arith.addf %321, %324 : vector<2x128xf32>
    %c7_84 = arith.constant 7 : index
    %326 = memref.load %arg4[%c7_84] : memref<32xf32, #tpu.memory_space<smem>>
    %327 = vector.broadcast %326 : f32 to vector<2x128xf32>
    %328 = arith.addf %325, %327 : vector<2x128xf32>
    %cst_85 = arith.constant 0.000000e+00 : f32
    %329 = vector.broadcast %cst_85 : f32 to vector<2x128xf32>
    %330 = arith.maximumf %328, %329 : vector<2x128xf32>
    %c7_86 = arith.constant 7 : index
    %331 = memref.load %arg5[%c7_86] : memref<32xf32, #tpu.memory_space<smem>>
    %332 = vector.broadcast %331 : f32 to vector<2x128xf32>
    %333 = arith.mulf %330, %332 : vector<2x128xf32>
    %334 = arith.addf %294, %333 : vector<2x128xf32>
    %c32 = arith.constant 32 : index
    %335 = memref.load %arg2[%c32] : memref<128xf32, #tpu.memory_space<smem>>
    %336 = vector.broadcast %335 : f32 to vector<2x128xf32>
    %337 = arith.mulf %1, %336 : vector<2x128xf32>
    %c33 = arith.constant 33 : index
    %338 = memref.load %arg2[%c33] : memref<128xf32, #tpu.memory_space<smem>>
    %339 = vector.broadcast %338 : f32 to vector<2x128xf32>
    %340 = arith.mulf %3, %339 : vector<2x128xf32>
    %341 = arith.addf %337, %340 : vector<2x128xf32>
    %c34 = arith.constant 34 : index
    %342 = memref.load %arg2[%c34] : memref<128xf32, #tpu.memory_space<smem>>
    %343 = vector.broadcast %342 : f32 to vector<2x128xf32>
    %344 = arith.mulf %5, %343 : vector<2x128xf32>
    %345 = arith.addf %341, %344 : vector<2x128xf32>
    %c35 = arith.constant 35 : index
    %346 = memref.load %arg2[%c35] : memref<128xf32, #tpu.memory_space<smem>>
    %347 = vector.broadcast %346 : f32 to vector<2x128xf32>
    %348 = arith.mulf %7, %347 : vector<2x128xf32>
    %349 = arith.addf %345, %348 : vector<2x128xf32>
    %c32_87 = arith.constant 32 : index
    %350 = memref.load %arg3[%c32_87] : memref<128xf32, #tpu.memory_space<smem>>
    %351 = vector.broadcast %350 : f32 to vector<2x128xf32>
    %352 = arith.mulf %9, %351 : vector<2x128xf32>
    %353 = arith.addf %349, %352 : vector<2x128xf32>
    %c33_88 = arith.constant 33 : index
    %354 = memref.load %arg3[%c33_88] : memref<128xf32, #tpu.memory_space<smem>>
    %355 = vector.broadcast %354 : f32 to vector<2x128xf32>
    %356 = arith.mulf %11, %355 : vector<2x128xf32>
    %357 = arith.addf %353, %356 : vector<2x128xf32>
    %c34_89 = arith.constant 34 : index
    %358 = memref.load %arg3[%c34_89] : memref<128xf32, #tpu.memory_space<smem>>
    %359 = vector.broadcast %358 : f32 to vector<2x128xf32>
    %360 = arith.mulf %13, %359 : vector<2x128xf32>
    %361 = arith.addf %357, %360 : vector<2x128xf32>
    %c35_90 = arith.constant 35 : index
    %362 = memref.load %arg3[%c35_90] : memref<128xf32, #tpu.memory_space<smem>>
    %363 = vector.broadcast %362 : f32 to vector<2x128xf32>
    %364 = arith.mulf %15, %363 : vector<2x128xf32>
    %365 = arith.addf %361, %364 : vector<2x128xf32>
    %c8_91 = arith.constant 8 : index
    %366 = memref.load %arg4[%c8_91] : memref<32xf32, #tpu.memory_space<smem>>
    %367 = vector.broadcast %366 : f32 to vector<2x128xf32>
    %368 = arith.addf %365, %367 : vector<2x128xf32>
    %cst_92 = arith.constant 0.000000e+00 : f32
    %369 = vector.broadcast %cst_92 : f32 to vector<2x128xf32>
    %370 = arith.maximumf %368, %369 : vector<2x128xf32>
    %c8_93 = arith.constant 8 : index
    %371 = memref.load %arg5[%c8_93] : memref<32xf32, #tpu.memory_space<smem>>
    %372 = vector.broadcast %371 : f32 to vector<2x128xf32>
    %373 = arith.mulf %370, %372 : vector<2x128xf32>
    %374 = arith.addf %334, %373 : vector<2x128xf32>
    %c36 = arith.constant 36 : index
    %375 = memref.load %arg2[%c36] : memref<128xf32, #tpu.memory_space<smem>>
    %376 = vector.broadcast %375 : f32 to vector<2x128xf32>
    %377 = arith.mulf %1, %376 : vector<2x128xf32>
    %c37 = arith.constant 37 : index
    %378 = memref.load %arg2[%c37] : memref<128xf32, #tpu.memory_space<smem>>
    %379 = vector.broadcast %378 : f32 to vector<2x128xf32>
    %380 = arith.mulf %3, %379 : vector<2x128xf32>
    %381 = arith.addf %377, %380 : vector<2x128xf32>
    %c38 = arith.constant 38 : index
    %382 = memref.load %arg2[%c38] : memref<128xf32, #tpu.memory_space<smem>>
    %383 = vector.broadcast %382 : f32 to vector<2x128xf32>
    %384 = arith.mulf %5, %383 : vector<2x128xf32>
    %385 = arith.addf %381, %384 : vector<2x128xf32>
    %c39 = arith.constant 39 : index
    %386 = memref.load %arg2[%c39] : memref<128xf32, #tpu.memory_space<smem>>
    %387 = vector.broadcast %386 : f32 to vector<2x128xf32>
    %388 = arith.mulf %7, %387 : vector<2x128xf32>
    %389 = arith.addf %385, %388 : vector<2x128xf32>
    %c36_94 = arith.constant 36 : index
    %390 = memref.load %arg3[%c36_94] : memref<128xf32, #tpu.memory_space<smem>>
    %391 = vector.broadcast %390 : f32 to vector<2x128xf32>
    %392 = arith.mulf %9, %391 : vector<2x128xf32>
    %393 = arith.addf %389, %392 : vector<2x128xf32>
    %c37_95 = arith.constant 37 : index
    %394 = memref.load %arg3[%c37_95] : memref<128xf32, #tpu.memory_space<smem>>
    %395 = vector.broadcast %394 : f32 to vector<2x128xf32>
    %396 = arith.mulf %11, %395 : vector<2x128xf32>
    %397 = arith.addf %393, %396 : vector<2x128xf32>
    %c38_96 = arith.constant 38 : index
    %398 = memref.load %arg3[%c38_96] : memref<128xf32, #tpu.memory_space<smem>>
    %399 = vector.broadcast %398 : f32 to vector<2x128xf32>
    %400 = arith.mulf %13, %399 : vector<2x128xf32>
    %401 = arith.addf %397, %400 : vector<2x128xf32>
    %c39_97 = arith.constant 39 : index
    %402 = memref.load %arg3[%c39_97] : memref<128xf32, #tpu.memory_space<smem>>
    %403 = vector.broadcast %402 : f32 to vector<2x128xf32>
    %404 = arith.mulf %15, %403 : vector<2x128xf32>
    %405 = arith.addf %401, %404 : vector<2x128xf32>
    %c9_98 = arith.constant 9 : index
    %406 = memref.load %arg4[%c9_98] : memref<32xf32, #tpu.memory_space<smem>>
    %407 = vector.broadcast %406 : f32 to vector<2x128xf32>
    %408 = arith.addf %405, %407 : vector<2x128xf32>
    %cst_99 = arith.constant 0.000000e+00 : f32
    %409 = vector.broadcast %cst_99 : f32 to vector<2x128xf32>
    %410 = arith.maximumf %408, %409 : vector<2x128xf32>
    %c9_100 = arith.constant 9 : index
    %411 = memref.load %arg5[%c9_100] : memref<32xf32, #tpu.memory_space<smem>>
    %412 = vector.broadcast %411 : f32 to vector<2x128xf32>
    %413 = arith.mulf %410, %412 : vector<2x128xf32>
    %414 = arith.addf %374, %413 : vector<2x128xf32>
    %c40 = arith.constant 40 : index
    %415 = memref.load %arg2[%c40] : memref<128xf32, #tpu.memory_space<smem>>
    %416 = vector.broadcast %415 : f32 to vector<2x128xf32>
    %417 = arith.mulf %1, %416 : vector<2x128xf32>
    %c41 = arith.constant 41 : index
    %418 = memref.load %arg2[%c41] : memref<128xf32, #tpu.memory_space<smem>>
    %419 = vector.broadcast %418 : f32 to vector<2x128xf32>
    %420 = arith.mulf %3, %419 : vector<2x128xf32>
    %421 = arith.addf %417, %420 : vector<2x128xf32>
    %c42 = arith.constant 42 : index
    %422 = memref.load %arg2[%c42] : memref<128xf32, #tpu.memory_space<smem>>
    %423 = vector.broadcast %422 : f32 to vector<2x128xf32>
    %424 = arith.mulf %5, %423 : vector<2x128xf32>
    %425 = arith.addf %421, %424 : vector<2x128xf32>
    %c43 = arith.constant 43 : index
    %426 = memref.load %arg2[%c43] : memref<128xf32, #tpu.memory_space<smem>>
    %427 = vector.broadcast %426 : f32 to vector<2x128xf32>
    %428 = arith.mulf %7, %427 : vector<2x128xf32>
    %429 = arith.addf %425, %428 : vector<2x128xf32>
    %c40_101 = arith.constant 40 : index
    %430 = memref.load %arg3[%c40_101] : memref<128xf32, #tpu.memory_space<smem>>
    %431 = vector.broadcast %430 : f32 to vector<2x128xf32>
    %432 = arith.mulf %9, %431 : vector<2x128xf32>
    %433 = arith.addf %429, %432 : vector<2x128xf32>
    %c41_102 = arith.constant 41 : index
    %434 = memref.load %arg3[%c41_102] : memref<128xf32, #tpu.memory_space<smem>>
    %435 = vector.broadcast %434 : f32 to vector<2x128xf32>
    %436 = arith.mulf %11, %435 : vector<2x128xf32>
    %437 = arith.addf %433, %436 : vector<2x128xf32>
    %c42_103 = arith.constant 42 : index
    %438 = memref.load %arg3[%c42_103] : memref<128xf32, #tpu.memory_space<smem>>
    %439 = vector.broadcast %438 : f32 to vector<2x128xf32>
    %440 = arith.mulf %13, %439 : vector<2x128xf32>
    %441 = arith.addf %437, %440 : vector<2x128xf32>
    %c43_104 = arith.constant 43 : index
    %442 = memref.load %arg3[%c43_104] : memref<128xf32, #tpu.memory_space<smem>>
    %443 = vector.broadcast %442 : f32 to vector<2x128xf32>
    %444 = arith.mulf %15, %443 : vector<2x128xf32>
    %445 = arith.addf %441, %444 : vector<2x128xf32>
    %c10_105 = arith.constant 10 : index
    %446 = memref.load %arg4[%c10_105] : memref<32xf32, #tpu.memory_space<smem>>
    %447 = vector.broadcast %446 : f32 to vector<2x128xf32>
    %448 = arith.addf %445, %447 : vector<2x128xf32>
    %cst_106 = arith.constant 0.000000e+00 : f32
    %449 = vector.broadcast %cst_106 : f32 to vector<2x128xf32>
    %450 = arith.maximumf %448, %449 : vector<2x128xf32>
    %c10_107 = arith.constant 10 : index
    %451 = memref.load %arg5[%c10_107] : memref<32xf32, #tpu.memory_space<smem>>
    %452 = vector.broadcast %451 : f32 to vector<2x128xf32>
    %453 = arith.mulf %450, %452 : vector<2x128xf32>
    %454 = arith.addf %414, %453 : vector<2x128xf32>
    %c44 = arith.constant 44 : index
    %455 = memref.load %arg2[%c44] : memref<128xf32, #tpu.memory_space<smem>>
    %456 = vector.broadcast %455 : f32 to vector<2x128xf32>
    %457 = arith.mulf %1, %456 : vector<2x128xf32>
    %c45 = arith.constant 45 : index
    %458 = memref.load %arg2[%c45] : memref<128xf32, #tpu.memory_space<smem>>
    %459 = vector.broadcast %458 : f32 to vector<2x128xf32>
    %460 = arith.mulf %3, %459 : vector<2x128xf32>
    %461 = arith.addf %457, %460 : vector<2x128xf32>
    %c46 = arith.constant 46 : index
    %462 = memref.load %arg2[%c46] : memref<128xf32, #tpu.memory_space<smem>>
    %463 = vector.broadcast %462 : f32 to vector<2x128xf32>
    %464 = arith.mulf %5, %463 : vector<2x128xf32>
    %465 = arith.addf %461, %464 : vector<2x128xf32>
    %c47 = arith.constant 47 : index
    %466 = memref.load %arg2[%c47] : memref<128xf32, #tpu.memory_space<smem>>
    %467 = vector.broadcast %466 : f32 to vector<2x128xf32>
    %468 = arith.mulf %7, %467 : vector<2x128xf32>
    %469 = arith.addf %465, %468 : vector<2x128xf32>
    %c44_108 = arith.constant 44 : index
    %470 = memref.load %arg3[%c44_108] : memref<128xf32, #tpu.memory_space<smem>>
    %471 = vector.broadcast %470 : f32 to vector<2x128xf32>
    %472 = arith.mulf %9, %471 : vector<2x128xf32>
    %473 = arith.addf %469, %472 : vector<2x128xf32>
    %c45_109 = arith.constant 45 : index
    %474 = memref.load %arg3[%c45_109] : memref<128xf32, #tpu.memory_space<smem>>
    %475 = vector.broadcast %474 : f32 to vector<2x128xf32>
    %476 = arith.mulf %11, %475 : vector<2x128xf32>
    %477 = arith.addf %473, %476 : vector<2x128xf32>
    %c46_110 = arith.constant 46 : index
    %478 = memref.load %arg3[%c46_110] : memref<128xf32, #tpu.memory_space<smem>>
    %479 = vector.broadcast %478 : f32 to vector<2x128xf32>
    %480 = arith.mulf %13, %479 : vector<2x128xf32>
    %481 = arith.addf %477, %480 : vector<2x128xf32>
    %c47_111 = arith.constant 47 : index
    %482 = memref.load %arg3[%c47_111] : memref<128xf32, #tpu.memory_space<smem>>
    %483 = vector.broadcast %482 : f32 to vector<2x128xf32>
    %484 = arith.mulf %15, %483 : vector<2x128xf32>
    %485 = arith.addf %481, %484 : vector<2x128xf32>
    %c11_112 = arith.constant 11 : index
    %486 = memref.load %arg4[%c11_112] : memref<32xf32, #tpu.memory_space<smem>>
    %487 = vector.broadcast %486 : f32 to vector<2x128xf32>
    %488 = arith.addf %485, %487 : vector<2x128xf32>
    %cst_113 = arith.constant 0.000000e+00 : f32
    %489 = vector.broadcast %cst_113 : f32 to vector<2x128xf32>
    %490 = arith.maximumf %488, %489 : vector<2x128xf32>
    %c11_114 = arith.constant 11 : index
    %491 = memref.load %arg5[%c11_114] : memref<32xf32, #tpu.memory_space<smem>>
    %492 = vector.broadcast %491 : f32 to vector<2x128xf32>
    %493 = arith.mulf %490, %492 : vector<2x128xf32>
    %494 = arith.addf %454, %493 : vector<2x128xf32>
    %c48 = arith.constant 48 : index
    %495 = memref.load %arg2[%c48] : memref<128xf32, #tpu.memory_space<smem>>
    %496 = vector.broadcast %495 : f32 to vector<2x128xf32>
    %497 = arith.mulf %1, %496 : vector<2x128xf32>
    %c49 = arith.constant 49 : index
    %498 = memref.load %arg2[%c49] : memref<128xf32, #tpu.memory_space<smem>>
    %499 = vector.broadcast %498 : f32 to vector<2x128xf32>
    %500 = arith.mulf %3, %499 : vector<2x128xf32>
    %501 = arith.addf %497, %500 : vector<2x128xf32>
    %c50 = arith.constant 50 : index
    %502 = memref.load %arg2[%c50] : memref<128xf32, #tpu.memory_space<smem>>
    %503 = vector.broadcast %502 : f32 to vector<2x128xf32>
    %504 = arith.mulf %5, %503 : vector<2x128xf32>
    %505 = arith.addf %501, %504 : vector<2x128xf32>
    %c51 = arith.constant 51 : index
    %506 = memref.load %arg2[%c51] : memref<128xf32, #tpu.memory_space<smem>>
    %507 = vector.broadcast %506 : f32 to vector<2x128xf32>
    %508 = arith.mulf %7, %507 : vector<2x128xf32>
    %509 = arith.addf %505, %508 : vector<2x128xf32>
    %c48_115 = arith.constant 48 : index
    %510 = memref.load %arg3[%c48_115] : memref<128xf32, #tpu.memory_space<smem>>
    %511 = vector.broadcast %510 : f32 to vector<2x128xf32>
    %512 = arith.mulf %9, %511 : vector<2x128xf32>
    %513 = arith.addf %509, %512 : vector<2x128xf32>
    %c49_116 = arith.constant 49 : index
    %514 = memref.load %arg3[%c49_116] : memref<128xf32, #tpu.memory_space<smem>>
    %515 = vector.broadcast %514 : f32 to vector<2x128xf32>
    %516 = arith.mulf %11, %515 : vector<2x128xf32>
    %517 = arith.addf %513, %516 : vector<2x128xf32>
    %c50_117 = arith.constant 50 : index
    %518 = memref.load %arg3[%c50_117] : memref<128xf32, #tpu.memory_space<smem>>
    %519 = vector.broadcast %518 : f32 to vector<2x128xf32>
    %520 = arith.mulf %13, %519 : vector<2x128xf32>
    %521 = arith.addf %517, %520 : vector<2x128xf32>
    %c51_118 = arith.constant 51 : index
    %522 = memref.load %arg3[%c51_118] : memref<128xf32, #tpu.memory_space<smem>>
    %523 = vector.broadcast %522 : f32 to vector<2x128xf32>
    %524 = arith.mulf %15, %523 : vector<2x128xf32>
    %525 = arith.addf %521, %524 : vector<2x128xf32>
    %c12_119 = arith.constant 12 : index
    %526 = memref.load %arg4[%c12_119] : memref<32xf32, #tpu.memory_space<smem>>
    %527 = vector.broadcast %526 : f32 to vector<2x128xf32>
    %528 = arith.addf %525, %527 : vector<2x128xf32>
    %cst_120 = arith.constant 0.000000e+00 : f32
    %529 = vector.broadcast %cst_120 : f32 to vector<2x128xf32>
    %530 = arith.maximumf %528, %529 : vector<2x128xf32>
    %c12_121 = arith.constant 12 : index
    %531 = memref.load %arg5[%c12_121] : memref<32xf32, #tpu.memory_space<smem>>
    %532 = vector.broadcast %531 : f32 to vector<2x128xf32>
    %533 = arith.mulf %530, %532 : vector<2x128xf32>
    %534 = arith.addf %494, %533 : vector<2x128xf32>
    %c52 = arith.constant 52 : index
    %535 = memref.load %arg2[%c52] : memref<128xf32, #tpu.memory_space<smem>>
    %536 = vector.broadcast %535 : f32 to vector<2x128xf32>
    %537 = arith.mulf %1, %536 : vector<2x128xf32>
    %c53 = arith.constant 53 : index
    %538 = memref.load %arg2[%c53] : memref<128xf32, #tpu.memory_space<smem>>
    %539 = vector.broadcast %538 : f32 to vector<2x128xf32>
    %540 = arith.mulf %3, %539 : vector<2x128xf32>
    %541 = arith.addf %537, %540 : vector<2x128xf32>
    %c54 = arith.constant 54 : index
    %542 = memref.load %arg2[%c54] : memref<128xf32, #tpu.memory_space<smem>>
    %543 = vector.broadcast %542 : f32 to vector<2x128xf32>
    %544 = arith.mulf %5, %543 : vector<2x128xf32>
    %545 = arith.addf %541, %544 : vector<2x128xf32>
    %c55 = arith.constant 55 : index
    %546 = memref.load %arg2[%c55] : memref<128xf32, #tpu.memory_space<smem>>
    %547 = vector.broadcast %546 : f32 to vector<2x128xf32>
    %548 = arith.mulf %7, %547 : vector<2x128xf32>
    %549 = arith.addf %545, %548 : vector<2x128xf32>
    %c52_122 = arith.constant 52 : index
    %550 = memref.load %arg3[%c52_122] : memref<128xf32, #tpu.memory_space<smem>>
    %551 = vector.broadcast %550 : f32 to vector<2x128xf32>
    %552 = arith.mulf %9, %551 : vector<2x128xf32>
    %553 = arith.addf %549, %552 : vector<2x128xf32>
    %c53_123 = arith.constant 53 : index
    %554 = memref.load %arg3[%c53_123] : memref<128xf32, #tpu.memory_space<smem>>
    %555 = vector.broadcast %554 : f32 to vector<2x128xf32>
    %556 = arith.mulf %11, %555 : vector<2x128xf32>
    %557 = arith.addf %553, %556 : vector<2x128xf32>
    %c54_124 = arith.constant 54 : index
    %558 = memref.load %arg3[%c54_124] : memref<128xf32, #tpu.memory_space<smem>>
    %559 = vector.broadcast %558 : f32 to vector<2x128xf32>
    %560 = arith.mulf %13, %559 : vector<2x128xf32>
    %561 = arith.addf %557, %560 : vector<2x128xf32>
    %c55_125 = arith.constant 55 : index
    %562 = memref.load %arg3[%c55_125] : memref<128xf32, #tpu.memory_space<smem>>
    %563 = vector.broadcast %562 : f32 to vector<2x128xf32>
    %564 = arith.mulf %15, %563 : vector<2x128xf32>
    %565 = arith.addf %561, %564 : vector<2x128xf32>
    %c13_126 = arith.constant 13 : index
    %566 = memref.load %arg4[%c13_126] : memref<32xf32, #tpu.memory_space<smem>>
    %567 = vector.broadcast %566 : f32 to vector<2x128xf32>
    %568 = arith.addf %565, %567 : vector<2x128xf32>
    %cst_127 = arith.constant 0.000000e+00 : f32
    %569 = vector.broadcast %cst_127 : f32 to vector<2x128xf32>
    %570 = arith.maximumf %568, %569 : vector<2x128xf32>
    %c13_128 = arith.constant 13 : index
    %571 = memref.load %arg5[%c13_128] : memref<32xf32, #tpu.memory_space<smem>>
    %572 = vector.broadcast %571 : f32 to vector<2x128xf32>
    %573 = arith.mulf %570, %572 : vector<2x128xf32>
    %574 = arith.addf %534, %573 : vector<2x128xf32>
    %c56 = arith.constant 56 : index
    %575 = memref.load %arg2[%c56] : memref<128xf32, #tpu.memory_space<smem>>
    %576 = vector.broadcast %575 : f32 to vector<2x128xf32>
    %577 = arith.mulf %1, %576 : vector<2x128xf32>
    %c57 = arith.constant 57 : index
    %578 = memref.load %arg2[%c57] : memref<128xf32, #tpu.memory_space<smem>>
    %579 = vector.broadcast %578 : f32 to vector<2x128xf32>
    %580 = arith.mulf %3, %579 : vector<2x128xf32>
    %581 = arith.addf %577, %580 : vector<2x128xf32>
    %c58 = arith.constant 58 : index
    %582 = memref.load %arg2[%c58] : memref<128xf32, #tpu.memory_space<smem>>
    %583 = vector.broadcast %582 : f32 to vector<2x128xf32>
    %584 = arith.mulf %5, %583 : vector<2x128xf32>
    %585 = arith.addf %581, %584 : vector<2x128xf32>
    %c59 = arith.constant 59 : index
    %586 = memref.load %arg2[%c59] : memref<128xf32, #tpu.memory_space<smem>>
    %587 = vector.broadcast %586 : f32 to vector<2x128xf32>
    %588 = arith.mulf %7, %587 : vector<2x128xf32>
    %589 = arith.addf %585, %588 : vector<2x128xf32>
    %c56_129 = arith.constant 56 : index
    %590 = memref.load %arg3[%c56_129] : memref<128xf32, #tpu.memory_space<smem>>
    %591 = vector.broadcast %590 : f32 to vector<2x128xf32>
    %592 = arith.mulf %9, %591 : vector<2x128xf32>
    %593 = arith.addf %589, %592 : vector<2x128xf32>
    %c57_130 = arith.constant 57 : index
    %594 = memref.load %arg3[%c57_130] : memref<128xf32, #tpu.memory_space<smem>>
    %595 = vector.broadcast %594 : f32 to vector<2x128xf32>
    %596 = arith.mulf %11, %595 : vector<2x128xf32>
    %597 = arith.addf %593, %596 : vector<2x128xf32>
    %c58_131 = arith.constant 58 : index
    %598 = memref.load %arg3[%c58_131] : memref<128xf32, #tpu.memory_space<smem>>
    %599 = vector.broadcast %598 : f32 to vector<2x128xf32>
    %600 = arith.mulf %13, %599 : vector<2x128xf32>
    %601 = arith.addf %597, %600 : vector<2x128xf32>
    %c59_132 = arith.constant 59 : index
    %602 = memref.load %arg3[%c59_132] : memref<128xf32, #tpu.memory_space<smem>>
    %603 = vector.broadcast %602 : f32 to vector<2x128xf32>
    %604 = arith.mulf %15, %603 : vector<2x128xf32>
    %605 = arith.addf %601, %604 : vector<2x128xf32>
    %c14_133 = arith.constant 14 : index
    %606 = memref.load %arg4[%c14_133] : memref<32xf32, #tpu.memory_space<smem>>
    %607 = vector.broadcast %606 : f32 to vector<2x128xf32>
    %608 = arith.addf %605, %607 : vector<2x128xf32>
    %cst_134 = arith.constant 0.000000e+00 : f32
    %609 = vector.broadcast %cst_134 : f32 to vector<2x128xf32>
    %610 = arith.maximumf %608, %609 : vector<2x128xf32>
    %c14_135 = arith.constant 14 : index
    %611 = memref.load %arg5[%c14_135] : memref<32xf32, #tpu.memory_space<smem>>
    %612 = vector.broadcast %611 : f32 to vector<2x128xf32>
    %613 = arith.mulf %610, %612 : vector<2x128xf32>
    %614 = arith.addf %574, %613 : vector<2x128xf32>
    %c60 = arith.constant 60 : index
    %615 = memref.load %arg2[%c60] : memref<128xf32, #tpu.memory_space<smem>>
    %616 = vector.broadcast %615 : f32 to vector<2x128xf32>
    %617 = arith.mulf %1, %616 : vector<2x128xf32>
    %c61 = arith.constant 61 : index
    %618 = memref.load %arg2[%c61] : memref<128xf32, #tpu.memory_space<smem>>
    %619 = vector.broadcast %618 : f32 to vector<2x128xf32>
    %620 = arith.mulf %3, %619 : vector<2x128xf32>
    %621 = arith.addf %617, %620 : vector<2x128xf32>
    %c62 = arith.constant 62 : index
    %622 = memref.load %arg2[%c62] : memref<128xf32, #tpu.memory_space<smem>>
    %623 = vector.broadcast %622 : f32 to vector<2x128xf32>
    %624 = arith.mulf %5, %623 : vector<2x128xf32>
    %625 = arith.addf %621, %624 : vector<2x128xf32>
    %c63 = arith.constant 63 : index
    %626 = memref.load %arg2[%c63] : memref<128xf32, #tpu.memory_space<smem>>
    %627 = vector.broadcast %626 : f32 to vector<2x128xf32>
    %628 = arith.mulf %7, %627 : vector<2x128xf32>
    %629 = arith.addf %625, %628 : vector<2x128xf32>
    %c60_136 = arith.constant 60 : index
    %630 = memref.load %arg3[%c60_136] : memref<128xf32, #tpu.memory_space<smem>>
    %631 = vector.broadcast %630 : f32 to vector<2x128xf32>
    %632 = arith.mulf %9, %631 : vector<2x128xf32>
    %633 = arith.addf %629, %632 : vector<2x128xf32>
    %c61_137 = arith.constant 61 : index
    %634 = memref.load %arg3[%c61_137] : memref<128xf32, #tpu.memory_space<smem>>
    %635 = vector.broadcast %634 : f32 to vector<2x128xf32>
    %636 = arith.mulf %11, %635 : vector<2x128xf32>
    %637 = arith.addf %633, %636 : vector<2x128xf32>
    %c62_138 = arith.constant 62 : index
    %638 = memref.load %arg3[%c62_138] : memref<128xf32, #tpu.memory_space<smem>>
    %639 = vector.broadcast %638 : f32 to vector<2x128xf32>
    %640 = arith.mulf %13, %639 : vector<2x128xf32>
    %641 = arith.addf %637, %640 : vector<2x128xf32>
    %c63_139 = arith.constant 63 : index
    %642 = memref.load %arg3[%c63_139] : memref<128xf32, #tpu.memory_space<smem>>
    %643 = vector.broadcast %642 : f32 to vector<2x128xf32>
    %644 = arith.mulf %15, %643 : vector<2x128xf32>
    %645 = arith.addf %641, %644 : vector<2x128xf32>
    %c15_140 = arith.constant 15 : index
    %646 = memref.load %arg4[%c15_140] : memref<32xf32, #tpu.memory_space<smem>>
    %647 = vector.broadcast %646 : f32 to vector<2x128xf32>
    %648 = arith.addf %645, %647 : vector<2x128xf32>
    %cst_141 = arith.constant 0.000000e+00 : f32
    %649 = vector.broadcast %cst_141 : f32 to vector<2x128xf32>
    %650 = arith.maximumf %648, %649 : vector<2x128xf32>
    %c15_142 = arith.constant 15 : index
    %651 = memref.load %arg5[%c15_142] : memref<32xf32, #tpu.memory_space<smem>>
    %652 = vector.broadcast %651 : f32 to vector<2x128xf32>
    %653 = arith.mulf %650, %652 : vector<2x128xf32>
    %654 = arith.addf %614, %653 : vector<2x128xf32>
    %c64 = arith.constant 64 : index
    %655 = memref.load %arg2[%c64] : memref<128xf32, #tpu.memory_space<smem>>
    %656 = vector.broadcast %655 : f32 to vector<2x128xf32>
    %657 = arith.mulf %1, %656 : vector<2x128xf32>
    %c65 = arith.constant 65 : index
    %658 = memref.load %arg2[%c65] : memref<128xf32, #tpu.memory_space<smem>>
    %659 = vector.broadcast %658 : f32 to vector<2x128xf32>
    %660 = arith.mulf %3, %659 : vector<2x128xf32>
    %661 = arith.addf %657, %660 : vector<2x128xf32>
    %c66 = arith.constant 66 : index
    %662 = memref.load %arg2[%c66] : memref<128xf32, #tpu.memory_space<smem>>
    %663 = vector.broadcast %662 : f32 to vector<2x128xf32>
    %664 = arith.mulf %5, %663 : vector<2x128xf32>
    %665 = arith.addf %661, %664 : vector<2x128xf32>
    %c67 = arith.constant 67 : index
    %666 = memref.load %arg2[%c67] : memref<128xf32, #tpu.memory_space<smem>>
    %667 = vector.broadcast %666 : f32 to vector<2x128xf32>
    %668 = arith.mulf %7, %667 : vector<2x128xf32>
    %669 = arith.addf %665, %668 : vector<2x128xf32>
    %c64_143 = arith.constant 64 : index
    %670 = memref.load %arg3[%c64_143] : memref<128xf32, #tpu.memory_space<smem>>
    %671 = vector.broadcast %670 : f32 to vector<2x128xf32>
    %672 = arith.mulf %9, %671 : vector<2x128xf32>
    %673 = arith.addf %669, %672 : vector<2x128xf32>
    %c65_144 = arith.constant 65 : index
    %674 = memref.load %arg3[%c65_144] : memref<128xf32, #tpu.memory_space<smem>>
    %675 = vector.broadcast %674 : f32 to vector<2x128xf32>
    %676 = arith.mulf %11, %675 : vector<2x128xf32>
    %677 = arith.addf %673, %676 : vector<2x128xf32>
    %c66_145 = arith.constant 66 : index
    %678 = memref.load %arg3[%c66_145] : memref<128xf32, #tpu.memory_space<smem>>
    %679 = vector.broadcast %678 : f32 to vector<2x128xf32>
    %680 = arith.mulf %13, %679 : vector<2x128xf32>
    %681 = arith.addf %677, %680 : vector<2x128xf32>
    %c67_146 = arith.constant 67 : index
    %682 = memref.load %arg3[%c67_146] : memref<128xf32, #tpu.memory_space<smem>>
    %683 = vector.broadcast %682 : f32 to vector<2x128xf32>
    %684 = arith.mulf %15, %683 : vector<2x128xf32>
    %685 = arith.addf %681, %684 : vector<2x128xf32>
    %c16_147 = arith.constant 16 : index
    %686 = memref.load %arg4[%c16_147] : memref<32xf32, #tpu.memory_space<smem>>
    %687 = vector.broadcast %686 : f32 to vector<2x128xf32>
    %688 = arith.addf %685, %687 : vector<2x128xf32>
    %cst_148 = arith.constant 0.000000e+00 : f32
    %689 = vector.broadcast %cst_148 : f32 to vector<2x128xf32>
    %690 = arith.maximumf %688, %689 : vector<2x128xf32>
    %c16_149 = arith.constant 16 : index
    %691 = memref.load %arg5[%c16_149] : memref<32xf32, #tpu.memory_space<smem>>
    %692 = vector.broadcast %691 : f32 to vector<2x128xf32>
    %693 = arith.mulf %690, %692 : vector<2x128xf32>
    %694 = arith.addf %654, %693 : vector<2x128xf32>
    %c68 = arith.constant 68 : index
    %695 = memref.load %arg2[%c68] : memref<128xf32, #tpu.memory_space<smem>>
    %696 = vector.broadcast %695 : f32 to vector<2x128xf32>
    %697 = arith.mulf %1, %696 : vector<2x128xf32>
    %c69 = arith.constant 69 : index
    %698 = memref.load %arg2[%c69] : memref<128xf32, #tpu.memory_space<smem>>
    %699 = vector.broadcast %698 : f32 to vector<2x128xf32>
    %700 = arith.mulf %3, %699 : vector<2x128xf32>
    %701 = arith.addf %697, %700 : vector<2x128xf32>
    %c70 = arith.constant 70 : index
    %702 = memref.load %arg2[%c70] : memref<128xf32, #tpu.memory_space<smem>>
    %703 = vector.broadcast %702 : f32 to vector<2x128xf32>
    %704 = arith.mulf %5, %703 : vector<2x128xf32>
    %705 = arith.addf %701, %704 : vector<2x128xf32>
    %c71 = arith.constant 71 : index
    %706 = memref.load %arg2[%c71] : memref<128xf32, #tpu.memory_space<smem>>
    %707 = vector.broadcast %706 : f32 to vector<2x128xf32>
    %708 = arith.mulf %7, %707 : vector<2x128xf32>
    %709 = arith.addf %705, %708 : vector<2x128xf32>
    %c68_150 = arith.constant 68 : index
    %710 = memref.load %arg3[%c68_150] : memref<128xf32, #tpu.memory_space<smem>>
    %711 = vector.broadcast %710 : f32 to vector<2x128xf32>
    %712 = arith.mulf %9, %711 : vector<2x128xf32>
    %713 = arith.addf %709, %712 : vector<2x128xf32>
    %c69_151 = arith.constant 69 : index
    %714 = memref.load %arg3[%c69_151] : memref<128xf32, #tpu.memory_space<smem>>
    %715 = vector.broadcast %714 : f32 to vector<2x128xf32>
    %716 = arith.mulf %11, %715 : vector<2x128xf32>
    %717 = arith.addf %713, %716 : vector<2x128xf32>
    %c70_152 = arith.constant 70 : index
    %718 = memref.load %arg3[%c70_152] : memref<128xf32, #tpu.memory_space<smem>>
    %719 = vector.broadcast %718 : f32 to vector<2x128xf32>
    %720 = arith.mulf %13, %719 : vector<2x128xf32>
    %721 = arith.addf %717, %720 : vector<2x128xf32>
    %c71_153 = arith.constant 71 : index
    %722 = memref.load %arg3[%c71_153] : memref<128xf32, #tpu.memory_space<smem>>
    %723 = vector.broadcast %722 : f32 to vector<2x128xf32>
    %724 = arith.mulf %15, %723 : vector<2x128xf32>
    %725 = arith.addf %721, %724 : vector<2x128xf32>
    %c17_154 = arith.constant 17 : index
    %726 = memref.load %arg4[%c17_154] : memref<32xf32, #tpu.memory_space<smem>>
    %727 = vector.broadcast %726 : f32 to vector<2x128xf32>
    %728 = arith.addf %725, %727 : vector<2x128xf32>
    %cst_155 = arith.constant 0.000000e+00 : f32
    %729 = vector.broadcast %cst_155 : f32 to vector<2x128xf32>
    %730 = arith.maximumf %728, %729 : vector<2x128xf32>
    %c17_156 = arith.constant 17 : index
    %731 = memref.load %arg5[%c17_156] : memref<32xf32, #tpu.memory_space<smem>>
    %732 = vector.broadcast %731 : f32 to vector<2x128xf32>
    %733 = arith.mulf %730, %732 : vector<2x128xf32>
    %734 = arith.addf %694, %733 : vector<2x128xf32>
    %c72 = arith.constant 72 : index
    %735 = memref.load %arg2[%c72] : memref<128xf32, #tpu.memory_space<smem>>
    %736 = vector.broadcast %735 : f32 to vector<2x128xf32>
    %737 = arith.mulf %1, %736 : vector<2x128xf32>
    %c73 = arith.constant 73 : index
    %738 = memref.load %arg2[%c73] : memref<128xf32, #tpu.memory_space<smem>>
    %739 = vector.broadcast %738 : f32 to vector<2x128xf32>
    %740 = arith.mulf %3, %739 : vector<2x128xf32>
    %741 = arith.addf %737, %740 : vector<2x128xf32>
    %c74 = arith.constant 74 : index
    %742 = memref.load %arg2[%c74] : memref<128xf32, #tpu.memory_space<smem>>
    %743 = vector.broadcast %742 : f32 to vector<2x128xf32>
    %744 = arith.mulf %5, %743 : vector<2x128xf32>
    %745 = arith.addf %741, %744 : vector<2x128xf32>
    %c75 = arith.constant 75 : index
    %746 = memref.load %arg2[%c75] : memref<128xf32, #tpu.memory_space<smem>>
    %747 = vector.broadcast %746 : f32 to vector<2x128xf32>
    %748 = arith.mulf %7, %747 : vector<2x128xf32>
    %749 = arith.addf %745, %748 : vector<2x128xf32>
    %c72_157 = arith.constant 72 : index
    %750 = memref.load %arg3[%c72_157] : memref<128xf32, #tpu.memory_space<smem>>
    %751 = vector.broadcast %750 : f32 to vector<2x128xf32>
    %752 = arith.mulf %9, %751 : vector<2x128xf32>
    %753 = arith.addf %749, %752 : vector<2x128xf32>
    %c73_158 = arith.constant 73 : index
    %754 = memref.load %arg3[%c73_158] : memref<128xf32, #tpu.memory_space<smem>>
    %755 = vector.broadcast %754 : f32 to vector<2x128xf32>
    %756 = arith.mulf %11, %755 : vector<2x128xf32>
    %757 = arith.addf %753, %756 : vector<2x128xf32>
    %c74_159 = arith.constant 74 : index
    %758 = memref.load %arg3[%c74_159] : memref<128xf32, #tpu.memory_space<smem>>
    %759 = vector.broadcast %758 : f32 to vector<2x128xf32>
    %760 = arith.mulf %13, %759 : vector<2x128xf32>
    %761 = arith.addf %757, %760 : vector<2x128xf32>
    %c75_160 = arith.constant 75 : index
    %762 = memref.load %arg3[%c75_160] : memref<128xf32, #tpu.memory_space<smem>>
    %763 = vector.broadcast %762 : f32 to vector<2x128xf32>
    %764 = arith.mulf %15, %763 : vector<2x128xf32>
    %765 = arith.addf %761, %764 : vector<2x128xf32>
    %c18_161 = arith.constant 18 : index
    %766 = memref.load %arg4[%c18_161] : memref<32xf32, #tpu.memory_space<smem>>
    %767 = vector.broadcast %766 : f32 to vector<2x128xf32>
    %768 = arith.addf %765, %767 : vector<2x128xf32>
    %cst_162 = arith.constant 0.000000e+00 : f32
    %769 = vector.broadcast %cst_162 : f32 to vector<2x128xf32>
    %770 = arith.maximumf %768, %769 : vector<2x128xf32>
    %c18_163 = arith.constant 18 : index
    %771 = memref.load %arg5[%c18_163] : memref<32xf32, #tpu.memory_space<smem>>
    %772 = vector.broadcast %771 : f32 to vector<2x128xf32>
    %773 = arith.mulf %770, %772 : vector<2x128xf32>
    %774 = arith.addf %734, %773 : vector<2x128xf32>
    %c76 = arith.constant 76 : index
    %775 = memref.load %arg2[%c76] : memref<128xf32, #tpu.memory_space<smem>>
    %776 = vector.broadcast %775 : f32 to vector<2x128xf32>
    %777 = arith.mulf %1, %776 : vector<2x128xf32>
    %c77 = arith.constant 77 : index
    %778 = memref.load %arg2[%c77] : memref<128xf32, #tpu.memory_space<smem>>
    %779 = vector.broadcast %778 : f32 to vector<2x128xf32>
    %780 = arith.mulf %3, %779 : vector<2x128xf32>
    %781 = arith.addf %777, %780 : vector<2x128xf32>
    %c78 = arith.constant 78 : index
    %782 = memref.load %arg2[%c78] : memref<128xf32, #tpu.memory_space<smem>>
    %783 = vector.broadcast %782 : f32 to vector<2x128xf32>
    %784 = arith.mulf %5, %783 : vector<2x128xf32>
    %785 = arith.addf %781, %784 : vector<2x128xf32>
    %c79 = arith.constant 79 : index
    %786 = memref.load %arg2[%c79] : memref<128xf32, #tpu.memory_space<smem>>
    %787 = vector.broadcast %786 : f32 to vector<2x128xf32>
    %788 = arith.mulf %7, %787 : vector<2x128xf32>
    %789 = arith.addf %785, %788 : vector<2x128xf32>
    %c76_164 = arith.constant 76 : index
    %790 = memref.load %arg3[%c76_164] : memref<128xf32, #tpu.memory_space<smem>>
    %791 = vector.broadcast %790 : f32 to vector<2x128xf32>
    %792 = arith.mulf %9, %791 : vector<2x128xf32>
    %793 = arith.addf %789, %792 : vector<2x128xf32>
    %c77_165 = arith.constant 77 : index
    %794 = memref.load %arg3[%c77_165] : memref<128xf32, #tpu.memory_space<smem>>
    %795 = vector.broadcast %794 : f32 to vector<2x128xf32>
    %796 = arith.mulf %11, %795 : vector<2x128xf32>
    %797 = arith.addf %793, %796 : vector<2x128xf32>
    %c78_166 = arith.constant 78 : index
    %798 = memref.load %arg3[%c78_166] : memref<128xf32, #tpu.memory_space<smem>>
    %799 = vector.broadcast %798 : f32 to vector<2x128xf32>
    %800 = arith.mulf %13, %799 : vector<2x128xf32>
    %801 = arith.addf %797, %800 : vector<2x128xf32>
    %c79_167 = arith.constant 79 : index
    %802 = memref.load %arg3[%c79_167] : memref<128xf32, #tpu.memory_space<smem>>
    %803 = vector.broadcast %802 : f32 to vector<2x128xf32>
    %804 = arith.mulf %15, %803 : vector<2x128xf32>
    %805 = arith.addf %801, %804 : vector<2x128xf32>
    %c19_168 = arith.constant 19 : index
    %806 = memref.load %arg4[%c19_168] : memref<32xf32, #tpu.memory_space<smem>>
    %807 = vector.broadcast %806 : f32 to vector<2x128xf32>
    %808 = arith.addf %805, %807 : vector<2x128xf32>
    %cst_169 = arith.constant 0.000000e+00 : f32
    %809 = vector.broadcast %cst_169 : f32 to vector<2x128xf32>
    %810 = arith.maximumf %808, %809 : vector<2x128xf32>
    %c19_170 = arith.constant 19 : index
    %811 = memref.load %arg5[%c19_170] : memref<32xf32, #tpu.memory_space<smem>>
    %812 = vector.broadcast %811 : f32 to vector<2x128xf32>
    %813 = arith.mulf %810, %812 : vector<2x128xf32>
    %814 = arith.addf %774, %813 : vector<2x128xf32>
    %c80 = arith.constant 80 : index
    %815 = memref.load %arg2[%c80] : memref<128xf32, #tpu.memory_space<smem>>
    %816 = vector.broadcast %815 : f32 to vector<2x128xf32>
    %817 = arith.mulf %1, %816 : vector<2x128xf32>
    %c81 = arith.constant 81 : index
    %818 = memref.load %arg2[%c81] : memref<128xf32, #tpu.memory_space<smem>>
    %819 = vector.broadcast %818 : f32 to vector<2x128xf32>
    %820 = arith.mulf %3, %819 : vector<2x128xf32>
    %821 = arith.addf %817, %820 : vector<2x128xf32>
    %c82 = arith.constant 82 : index
    %822 = memref.load %arg2[%c82] : memref<128xf32, #tpu.memory_space<smem>>
    %823 = vector.broadcast %822 : f32 to vector<2x128xf32>
    %824 = arith.mulf %5, %823 : vector<2x128xf32>
    %825 = arith.addf %821, %824 : vector<2x128xf32>
    %c83 = arith.constant 83 : index
    %826 = memref.load %arg2[%c83] : memref<128xf32, #tpu.memory_space<smem>>
    %827 = vector.broadcast %826 : f32 to vector<2x128xf32>
    %828 = arith.mulf %7, %827 : vector<2x128xf32>
    %829 = arith.addf %825, %828 : vector<2x128xf32>
    %c80_171 = arith.constant 80 : index
    %830 = memref.load %arg3[%c80_171] : memref<128xf32, #tpu.memory_space<smem>>
    %831 = vector.broadcast %830 : f32 to vector<2x128xf32>
    %832 = arith.mulf %9, %831 : vector<2x128xf32>
    %833 = arith.addf %829, %832 : vector<2x128xf32>
    %c81_172 = arith.constant 81 : index
    %834 = memref.load %arg3[%c81_172] : memref<128xf32, #tpu.memory_space<smem>>
    %835 = vector.broadcast %834 : f32 to vector<2x128xf32>
    %836 = arith.mulf %11, %835 : vector<2x128xf32>
    %837 = arith.addf %833, %836 : vector<2x128xf32>
    %c82_173 = arith.constant 82 : index
    %838 = memref.load %arg3[%c82_173] : memref<128xf32, #tpu.memory_space<smem>>
    %839 = vector.broadcast %838 : f32 to vector<2x128xf32>
    %840 = arith.mulf %13, %839 : vector<2x128xf32>
    %841 = arith.addf %837, %840 : vector<2x128xf32>
    %c83_174 = arith.constant 83 : index
    %842 = memref.load %arg3[%c83_174] : memref<128xf32, #tpu.memory_space<smem>>
    %843 = vector.broadcast %842 : f32 to vector<2x128xf32>
    %844 = arith.mulf %15, %843 : vector<2x128xf32>
    %845 = arith.addf %841, %844 : vector<2x128xf32>
    %c20_175 = arith.constant 20 : index
    %846 = memref.load %arg4[%c20_175] : memref<32xf32, #tpu.memory_space<smem>>
    %847 = vector.broadcast %846 : f32 to vector<2x128xf32>
    %848 = arith.addf %845, %847 : vector<2x128xf32>
    %cst_176 = arith.constant 0.000000e+00 : f32
    %849 = vector.broadcast %cst_176 : f32 to vector<2x128xf32>
    %850 = arith.maximumf %848, %849 : vector<2x128xf32>
    %c20_177 = arith.constant 20 : index
    %851 = memref.load %arg5[%c20_177] : memref<32xf32, #tpu.memory_space<smem>>
    %852 = vector.broadcast %851 : f32 to vector<2x128xf32>
    %853 = arith.mulf %850, %852 : vector<2x128xf32>
    %854 = arith.addf %814, %853 : vector<2x128xf32>
    %c84 = arith.constant 84 : index
    %855 = memref.load %arg2[%c84] : memref<128xf32, #tpu.memory_space<smem>>
    %856 = vector.broadcast %855 : f32 to vector<2x128xf32>
    %857 = arith.mulf %1, %856 : vector<2x128xf32>
    %c85 = arith.constant 85 : index
    %858 = memref.load %arg2[%c85] : memref<128xf32, #tpu.memory_space<smem>>
    %859 = vector.broadcast %858 : f32 to vector<2x128xf32>
    %860 = arith.mulf %3, %859 : vector<2x128xf32>
    %861 = arith.addf %857, %860 : vector<2x128xf32>
    %c86 = arith.constant 86 : index
    %862 = memref.load %arg2[%c86] : memref<128xf32, #tpu.memory_space<smem>>
    %863 = vector.broadcast %862 : f32 to vector<2x128xf32>
    %864 = arith.mulf %5, %863 : vector<2x128xf32>
    %865 = arith.addf %861, %864 : vector<2x128xf32>
    %c87 = arith.constant 87 : index
    %866 = memref.load %arg2[%c87] : memref<128xf32, #tpu.memory_space<smem>>
    %867 = vector.broadcast %866 : f32 to vector<2x128xf32>
    %868 = arith.mulf %7, %867 : vector<2x128xf32>
    %869 = arith.addf %865, %868 : vector<2x128xf32>
    %c84_178 = arith.constant 84 : index
    %870 = memref.load %arg3[%c84_178] : memref<128xf32, #tpu.memory_space<smem>>
    %871 = vector.broadcast %870 : f32 to vector<2x128xf32>
    %872 = arith.mulf %9, %871 : vector<2x128xf32>
    %873 = arith.addf %869, %872 : vector<2x128xf32>
    %c85_179 = arith.constant 85 : index
    %874 = memref.load %arg3[%c85_179] : memref<128xf32, #tpu.memory_space<smem>>
    %875 = vector.broadcast %874 : f32 to vector<2x128xf32>
    %876 = arith.mulf %11, %875 : vector<2x128xf32>
    %877 = arith.addf %873, %876 : vector<2x128xf32>
    %c86_180 = arith.constant 86 : index
    %878 = memref.load %arg3[%c86_180] : memref<128xf32, #tpu.memory_space<smem>>
    %879 = vector.broadcast %878 : f32 to vector<2x128xf32>
    %880 = arith.mulf %13, %879 : vector<2x128xf32>
    %881 = arith.addf %877, %880 : vector<2x128xf32>
    %c87_181 = arith.constant 87 : index
    %882 = memref.load %arg3[%c87_181] : memref<128xf32, #tpu.memory_space<smem>>
    %883 = vector.broadcast %882 : f32 to vector<2x128xf32>
    %884 = arith.mulf %15, %883 : vector<2x128xf32>
    %885 = arith.addf %881, %884 : vector<2x128xf32>
    %c21_182 = arith.constant 21 : index
    %886 = memref.load %arg4[%c21_182] : memref<32xf32, #tpu.memory_space<smem>>
    %887 = vector.broadcast %886 : f32 to vector<2x128xf32>
    %888 = arith.addf %885, %887 : vector<2x128xf32>
    %cst_183 = arith.constant 0.000000e+00 : f32
    %889 = vector.broadcast %cst_183 : f32 to vector<2x128xf32>
    %890 = arith.maximumf %888, %889 : vector<2x128xf32>
    %c21_184 = arith.constant 21 : index
    %891 = memref.load %arg5[%c21_184] : memref<32xf32, #tpu.memory_space<smem>>
    %892 = vector.broadcast %891 : f32 to vector<2x128xf32>
    %893 = arith.mulf %890, %892 : vector<2x128xf32>
    %894 = arith.addf %854, %893 : vector<2x128xf32>
    %c88 = arith.constant 88 : index
    %895 = memref.load %arg2[%c88] : memref<128xf32, #tpu.memory_space<smem>>
    %896 = vector.broadcast %895 : f32 to vector<2x128xf32>
    %897 = arith.mulf %1, %896 : vector<2x128xf32>
    %c89 = arith.constant 89 : index
    %898 = memref.load %arg2[%c89] : memref<128xf32, #tpu.memory_space<smem>>
    %899 = vector.broadcast %898 : f32 to vector<2x128xf32>
    %900 = arith.mulf %3, %899 : vector<2x128xf32>
    %901 = arith.addf %897, %900 : vector<2x128xf32>
    %c90 = arith.constant 90 : index
    %902 = memref.load %arg2[%c90] : memref<128xf32, #tpu.memory_space<smem>>
    %903 = vector.broadcast %902 : f32 to vector<2x128xf32>
    %904 = arith.mulf %5, %903 : vector<2x128xf32>
    %905 = arith.addf %901, %904 : vector<2x128xf32>
    %c91 = arith.constant 91 : index
    %906 = memref.load %arg2[%c91] : memref<128xf32, #tpu.memory_space<smem>>
    %907 = vector.broadcast %906 : f32 to vector<2x128xf32>
    %908 = arith.mulf %7, %907 : vector<2x128xf32>
    %909 = arith.addf %905, %908 : vector<2x128xf32>
    %c88_185 = arith.constant 88 : index
    %910 = memref.load %arg3[%c88_185] : memref<128xf32, #tpu.memory_space<smem>>
    %911 = vector.broadcast %910 : f32 to vector<2x128xf32>
    %912 = arith.mulf %9, %911 : vector<2x128xf32>
    %913 = arith.addf %909, %912 : vector<2x128xf32>
    %c89_186 = arith.constant 89 : index
    %914 = memref.load %arg3[%c89_186] : memref<128xf32, #tpu.memory_space<smem>>
    %915 = vector.broadcast %914 : f32 to vector<2x128xf32>
    %916 = arith.mulf %11, %915 : vector<2x128xf32>
    %917 = arith.addf %913, %916 : vector<2x128xf32>
    %c90_187 = arith.constant 90 : index
    %918 = memref.load %arg3[%c90_187] : memref<128xf32, #tpu.memory_space<smem>>
    %919 = vector.broadcast %918 : f32 to vector<2x128xf32>
    %920 = arith.mulf %13, %919 : vector<2x128xf32>
    %921 = arith.addf %917, %920 : vector<2x128xf32>
    %c91_188 = arith.constant 91 : index
    %922 = memref.load %arg3[%c91_188] : memref<128xf32, #tpu.memory_space<smem>>
    %923 = vector.broadcast %922 : f32 to vector<2x128xf32>
    %924 = arith.mulf %15, %923 : vector<2x128xf32>
    %925 = arith.addf %921, %924 : vector<2x128xf32>
    %c22_189 = arith.constant 22 : index
    %926 = memref.load %arg4[%c22_189] : memref<32xf32, #tpu.memory_space<smem>>
    %927 = vector.broadcast %926 : f32 to vector<2x128xf32>
    %928 = arith.addf %925, %927 : vector<2x128xf32>
    %cst_190 = arith.constant 0.000000e+00 : f32
    %929 = vector.broadcast %cst_190 : f32 to vector<2x128xf32>
    %930 = arith.maximumf %928, %929 : vector<2x128xf32>
    %c22_191 = arith.constant 22 : index
    %931 = memref.load %arg5[%c22_191] : memref<32xf32, #tpu.memory_space<smem>>
    %932 = vector.broadcast %931 : f32 to vector<2x128xf32>
    %933 = arith.mulf %930, %932 : vector<2x128xf32>
    %934 = arith.addf %894, %933 : vector<2x128xf32>
    %c92 = arith.constant 92 : index
    %935 = memref.load %arg2[%c92] : memref<128xf32, #tpu.memory_space<smem>>
    %936 = vector.broadcast %935 : f32 to vector<2x128xf32>
    %937 = arith.mulf %1, %936 : vector<2x128xf32>
    %c93 = arith.constant 93 : index
    %938 = memref.load %arg2[%c93] : memref<128xf32, #tpu.memory_space<smem>>
    %939 = vector.broadcast %938 : f32 to vector<2x128xf32>
    %940 = arith.mulf %3, %939 : vector<2x128xf32>
    %941 = arith.addf %937, %940 : vector<2x128xf32>
    %c94 = arith.constant 94 : index
    %942 = memref.load %arg2[%c94] : memref<128xf32, #tpu.memory_space<smem>>
    %943 = vector.broadcast %942 : f32 to vector<2x128xf32>
    %944 = arith.mulf %5, %943 : vector<2x128xf32>
    %945 = arith.addf %941, %944 : vector<2x128xf32>
    %c95 = arith.constant 95 : index
    %946 = memref.load %arg2[%c95] : memref<128xf32, #tpu.memory_space<smem>>
    %947 = vector.broadcast %946 : f32 to vector<2x128xf32>
    %948 = arith.mulf %7, %947 : vector<2x128xf32>
    %949 = arith.addf %945, %948 : vector<2x128xf32>
    %c92_192 = arith.constant 92 : index
    %950 = memref.load %arg3[%c92_192] : memref<128xf32, #tpu.memory_space<smem>>
    %951 = vector.broadcast %950 : f32 to vector<2x128xf32>
    %952 = arith.mulf %9, %951 : vector<2x128xf32>
    %953 = arith.addf %949, %952 : vector<2x128xf32>
    %c93_193 = arith.constant 93 : index
    %954 = memref.load %arg3[%c93_193] : memref<128xf32, #tpu.memory_space<smem>>
    %955 = vector.broadcast %954 : f32 to vector<2x128xf32>
    %956 = arith.mulf %11, %955 : vector<2x128xf32>
    %957 = arith.addf %953, %956 : vector<2x128xf32>
    %c94_194 = arith.constant 94 : index
    %958 = memref.load %arg3[%c94_194] : memref<128xf32, #tpu.memory_space<smem>>
    %959 = vector.broadcast %958 : f32 to vector<2x128xf32>
    %960 = arith.mulf %13, %959 : vector<2x128xf32>
    %961 = arith.addf %957, %960 : vector<2x128xf32>
    %c95_195 = arith.constant 95 : index
    %962 = memref.load %arg3[%c95_195] : memref<128xf32, #tpu.memory_space<smem>>
    %963 = vector.broadcast %962 : f32 to vector<2x128xf32>
    %964 = arith.mulf %15, %963 : vector<2x128xf32>
    %965 = arith.addf %961, %964 : vector<2x128xf32>
    %c23_196 = arith.constant 23 : index
    %966 = memref.load %arg4[%c23_196] : memref<32xf32, #tpu.memory_space<smem>>
    %967 = vector.broadcast %966 : f32 to vector<2x128xf32>
    %968 = arith.addf %965, %967 : vector<2x128xf32>
    %cst_197 = arith.constant 0.000000e+00 : f32
    %969 = vector.broadcast %cst_197 : f32 to vector<2x128xf32>
    %970 = arith.maximumf %968, %969 : vector<2x128xf32>
    %c23_198 = arith.constant 23 : index
    %971 = memref.load %arg5[%c23_198] : memref<32xf32, #tpu.memory_space<smem>>
    %972 = vector.broadcast %971 : f32 to vector<2x128xf32>
    %973 = arith.mulf %970, %972 : vector<2x128xf32>
    %974 = arith.addf %934, %973 : vector<2x128xf32>
    %c96 = arith.constant 96 : index
    %975 = memref.load %arg2[%c96] : memref<128xf32, #tpu.memory_space<smem>>
    %976 = vector.broadcast %975 : f32 to vector<2x128xf32>
    %977 = arith.mulf %1, %976 : vector<2x128xf32>
    %c97 = arith.constant 97 : index
    %978 = memref.load %arg2[%c97] : memref<128xf32, #tpu.memory_space<smem>>
    %979 = vector.broadcast %978 : f32 to vector<2x128xf32>
    %980 = arith.mulf %3, %979 : vector<2x128xf32>
    %981 = arith.addf %977, %980 : vector<2x128xf32>
    %c98 = arith.constant 98 : index
    %982 = memref.load %arg2[%c98] : memref<128xf32, #tpu.memory_space<smem>>
    %983 = vector.broadcast %982 : f32 to vector<2x128xf32>
    %984 = arith.mulf %5, %983 : vector<2x128xf32>
    %985 = arith.addf %981, %984 : vector<2x128xf32>
    %c99 = arith.constant 99 : index
    %986 = memref.load %arg2[%c99] : memref<128xf32, #tpu.memory_space<smem>>
    %987 = vector.broadcast %986 : f32 to vector<2x128xf32>
    %988 = arith.mulf %7, %987 : vector<2x128xf32>
    %989 = arith.addf %985, %988 : vector<2x128xf32>
    %c96_199 = arith.constant 96 : index
    %990 = memref.load %arg3[%c96_199] : memref<128xf32, #tpu.memory_space<smem>>
    %991 = vector.broadcast %990 : f32 to vector<2x128xf32>
    %992 = arith.mulf %9, %991 : vector<2x128xf32>
    %993 = arith.addf %989, %992 : vector<2x128xf32>
    %c97_200 = arith.constant 97 : index
    %994 = memref.load %arg3[%c97_200] : memref<128xf32, #tpu.memory_space<smem>>
    %995 = vector.broadcast %994 : f32 to vector<2x128xf32>
    %996 = arith.mulf %11, %995 : vector<2x128xf32>
    %997 = arith.addf %993, %996 : vector<2x128xf32>
    %c98_201 = arith.constant 98 : index
    %998 = memref.load %arg3[%c98_201] : memref<128xf32, #tpu.memory_space<smem>>
    %999 = vector.broadcast %998 : f32 to vector<2x128xf32>
    %1000 = arith.mulf %13, %999 : vector<2x128xf32>
    %1001 = arith.addf %997, %1000 : vector<2x128xf32>
    %c99_202 = arith.constant 99 : index
    %1002 = memref.load %arg3[%c99_202] : memref<128xf32, #tpu.memory_space<smem>>
    %1003 = vector.broadcast %1002 : f32 to vector<2x128xf32>
    %1004 = arith.mulf %15, %1003 : vector<2x128xf32>
    %1005 = arith.addf %1001, %1004 : vector<2x128xf32>
    %c24_203 = arith.constant 24 : index
    %1006 = memref.load %arg4[%c24_203] : memref<32xf32, #tpu.memory_space<smem>>
    %1007 = vector.broadcast %1006 : f32 to vector<2x128xf32>
    %1008 = arith.addf %1005, %1007 : vector<2x128xf32>
    %cst_204 = arith.constant 0.000000e+00 : f32
    %1009 = vector.broadcast %cst_204 : f32 to vector<2x128xf32>
    %1010 = arith.maximumf %1008, %1009 : vector<2x128xf32>
    %c24_205 = arith.constant 24 : index
    %1011 = memref.load %arg5[%c24_205] : memref<32xf32, #tpu.memory_space<smem>>
    %1012 = vector.broadcast %1011 : f32 to vector<2x128xf32>
    %1013 = arith.mulf %1010, %1012 : vector<2x128xf32>
    %1014 = arith.addf %974, %1013 : vector<2x128xf32>
    %c100 = arith.constant 100 : index
    %1015 = memref.load %arg2[%c100] : memref<128xf32, #tpu.memory_space<smem>>
    %1016 = vector.broadcast %1015 : f32 to vector<2x128xf32>
    %1017 = arith.mulf %1, %1016 : vector<2x128xf32>
    %c101 = arith.constant 101 : index
    %1018 = memref.load %arg2[%c101] : memref<128xf32, #tpu.memory_space<smem>>
    %1019 = vector.broadcast %1018 : f32 to vector<2x128xf32>
    %1020 = arith.mulf %3, %1019 : vector<2x128xf32>
    %1021 = arith.addf %1017, %1020 : vector<2x128xf32>
    %c102 = arith.constant 102 : index
    %1022 = memref.load %arg2[%c102] : memref<128xf32, #tpu.memory_space<smem>>
    %1023 = vector.broadcast %1022 : f32 to vector<2x128xf32>
    %1024 = arith.mulf %5, %1023 : vector<2x128xf32>
    %1025 = arith.addf %1021, %1024 : vector<2x128xf32>
    %c103 = arith.constant 103 : index
    %1026 = memref.load %arg2[%c103] : memref<128xf32, #tpu.memory_space<smem>>
    %1027 = vector.broadcast %1026 : f32 to vector<2x128xf32>
    %1028 = arith.mulf %7, %1027 : vector<2x128xf32>
    %1029 = arith.addf %1025, %1028 : vector<2x128xf32>
    %c100_206 = arith.constant 100 : index
    %1030 = memref.load %arg3[%c100_206] : memref<128xf32, #tpu.memory_space<smem>>
    %1031 = vector.broadcast %1030 : f32 to vector<2x128xf32>
    %1032 = arith.mulf %9, %1031 : vector<2x128xf32>
    %1033 = arith.addf %1029, %1032 : vector<2x128xf32>
    %c101_207 = arith.constant 101 : index
    %1034 = memref.load %arg3[%c101_207] : memref<128xf32, #tpu.memory_space<smem>>
    %1035 = vector.broadcast %1034 : f32 to vector<2x128xf32>
    %1036 = arith.mulf %11, %1035 : vector<2x128xf32>
    %1037 = arith.addf %1033, %1036 : vector<2x128xf32>
    %c102_208 = arith.constant 102 : index
    %1038 = memref.load %arg3[%c102_208] : memref<128xf32, #tpu.memory_space<smem>>
    %1039 = vector.broadcast %1038 : f32 to vector<2x128xf32>
    %1040 = arith.mulf %13, %1039 : vector<2x128xf32>
    %1041 = arith.addf %1037, %1040 : vector<2x128xf32>
    %c103_209 = arith.constant 103 : index
    %1042 = memref.load %arg3[%c103_209] : memref<128xf32, #tpu.memory_space<smem>>
    %1043 = vector.broadcast %1042 : f32 to vector<2x128xf32>
    %1044 = arith.mulf %15, %1043 : vector<2x128xf32>
    %1045 = arith.addf %1041, %1044 : vector<2x128xf32>
    %c25_210 = arith.constant 25 : index
    %1046 = memref.load %arg4[%c25_210] : memref<32xf32, #tpu.memory_space<smem>>
    %1047 = vector.broadcast %1046 : f32 to vector<2x128xf32>
    %1048 = arith.addf %1045, %1047 : vector<2x128xf32>
    %cst_211 = arith.constant 0.000000e+00 : f32
    %1049 = vector.broadcast %cst_211 : f32 to vector<2x128xf32>
    %1050 = arith.maximumf %1048, %1049 : vector<2x128xf32>
    %c25_212 = arith.constant 25 : index
    %1051 = memref.load %arg5[%c25_212] : memref<32xf32, #tpu.memory_space<smem>>
    %1052 = vector.broadcast %1051 : f32 to vector<2x128xf32>
    %1053 = arith.mulf %1050, %1052 : vector<2x128xf32>
    %1054 = arith.addf %1014, %1053 : vector<2x128xf32>
    %c104 = arith.constant 104 : index
    %1055 = memref.load %arg2[%c104] : memref<128xf32, #tpu.memory_space<smem>>
    %1056 = vector.broadcast %1055 : f32 to vector<2x128xf32>
    %1057 = arith.mulf %1, %1056 : vector<2x128xf32>
    %c105 = arith.constant 105 : index
    %1058 = memref.load %arg2[%c105] : memref<128xf32, #tpu.memory_space<smem>>
    %1059 = vector.broadcast %1058 : f32 to vector<2x128xf32>
    %1060 = arith.mulf %3, %1059 : vector<2x128xf32>
    %1061 = arith.addf %1057, %1060 : vector<2x128xf32>
    %c106 = arith.constant 106 : index
    %1062 = memref.load %arg2[%c106] : memref<128xf32, #tpu.memory_space<smem>>
    %1063 = vector.broadcast %1062 : f32 to vector<2x128xf32>
    %1064 = arith.mulf %5, %1063 : vector<2x128xf32>
    %1065 = arith.addf %1061, %1064 : vector<2x128xf32>
    %c107 = arith.constant 107 : index
    %1066 = memref.load %arg2[%c107] : memref<128xf32, #tpu.memory_space<smem>>
    %1067 = vector.broadcast %1066 : f32 to vector<2x128xf32>
    %1068 = arith.mulf %7, %1067 : vector<2x128xf32>
    %1069 = arith.addf %1065, %1068 : vector<2x128xf32>
    %c104_213 = arith.constant 104 : index
    %1070 = memref.load %arg3[%c104_213] : memref<128xf32, #tpu.memory_space<smem>>
    %1071 = vector.broadcast %1070 : f32 to vector<2x128xf32>
    %1072 = arith.mulf %9, %1071 : vector<2x128xf32>
    %1073 = arith.addf %1069, %1072 : vector<2x128xf32>
    %c105_214 = arith.constant 105 : index
    %1074 = memref.load %arg3[%c105_214] : memref<128xf32, #tpu.memory_space<smem>>
    %1075 = vector.broadcast %1074 : f32 to vector<2x128xf32>
    %1076 = arith.mulf %11, %1075 : vector<2x128xf32>
    %1077 = arith.addf %1073, %1076 : vector<2x128xf32>
    %c106_215 = arith.constant 106 : index
    %1078 = memref.load %arg3[%c106_215] : memref<128xf32, #tpu.memory_space<smem>>
    %1079 = vector.broadcast %1078 : f32 to vector<2x128xf32>
    %1080 = arith.mulf %13, %1079 : vector<2x128xf32>
    %1081 = arith.addf %1077, %1080 : vector<2x128xf32>
    %c107_216 = arith.constant 107 : index
    %1082 = memref.load %arg3[%c107_216] : memref<128xf32, #tpu.memory_space<smem>>
    %1083 = vector.broadcast %1082 : f32 to vector<2x128xf32>
    %1084 = arith.mulf %15, %1083 : vector<2x128xf32>
    %1085 = arith.addf %1081, %1084 : vector<2x128xf32>
    %c26_217 = arith.constant 26 : index
    %1086 = memref.load %arg4[%c26_217] : memref<32xf32, #tpu.memory_space<smem>>
    %1087 = vector.broadcast %1086 : f32 to vector<2x128xf32>
    %1088 = arith.addf %1085, %1087 : vector<2x128xf32>
    %cst_218 = arith.constant 0.000000e+00 : f32
    %1089 = vector.broadcast %cst_218 : f32 to vector<2x128xf32>
    %1090 = arith.maximumf %1088, %1089 : vector<2x128xf32>
    %c26_219 = arith.constant 26 : index
    %1091 = memref.load %arg5[%c26_219] : memref<32xf32, #tpu.memory_space<smem>>
    %1092 = vector.broadcast %1091 : f32 to vector<2x128xf32>
    %1093 = arith.mulf %1090, %1092 : vector<2x128xf32>
    %1094 = arith.addf %1054, %1093 : vector<2x128xf32>
    %c108 = arith.constant 108 : index
    %1095 = memref.load %arg2[%c108] : memref<128xf32, #tpu.memory_space<smem>>
    %1096 = vector.broadcast %1095 : f32 to vector<2x128xf32>
    %1097 = arith.mulf %1, %1096 : vector<2x128xf32>
    %c109 = arith.constant 109 : index
    %1098 = memref.load %arg2[%c109] : memref<128xf32, #tpu.memory_space<smem>>
    %1099 = vector.broadcast %1098 : f32 to vector<2x128xf32>
    %1100 = arith.mulf %3, %1099 : vector<2x128xf32>
    %1101 = arith.addf %1097, %1100 : vector<2x128xf32>
    %c110 = arith.constant 110 : index
    %1102 = memref.load %arg2[%c110] : memref<128xf32, #tpu.memory_space<smem>>
    %1103 = vector.broadcast %1102 : f32 to vector<2x128xf32>
    %1104 = arith.mulf %5, %1103 : vector<2x128xf32>
    %1105 = arith.addf %1101, %1104 : vector<2x128xf32>
    %c111 = arith.constant 111 : index
    %1106 = memref.load %arg2[%c111] : memref<128xf32, #tpu.memory_space<smem>>
    %1107 = vector.broadcast %1106 : f32 to vector<2x128xf32>
    %1108 = arith.mulf %7, %1107 : vector<2x128xf32>
    %1109 = arith.addf %1105, %1108 : vector<2x128xf32>
    %c108_220 = arith.constant 108 : index
    %1110 = memref.load %arg3[%c108_220] : memref<128xf32, #tpu.memory_space<smem>>
    %1111 = vector.broadcast %1110 : f32 to vector<2x128xf32>
    %1112 = arith.mulf %9, %1111 : vector<2x128xf32>
    %1113 = arith.addf %1109, %1112 : vector<2x128xf32>
    %c109_221 = arith.constant 109 : index
    %1114 = memref.load %arg3[%c109_221] : memref<128xf32, #tpu.memory_space<smem>>
    %1115 = vector.broadcast %1114 : f32 to vector<2x128xf32>
    %1116 = arith.mulf %11, %1115 : vector<2x128xf32>
    %1117 = arith.addf %1113, %1116 : vector<2x128xf32>
    %c110_222 = arith.constant 110 : index
    %1118 = memref.load %arg3[%c110_222] : memref<128xf32, #tpu.memory_space<smem>>
    %1119 = vector.broadcast %1118 : f32 to vector<2x128xf32>
    %1120 = arith.mulf %13, %1119 : vector<2x128xf32>
    %1121 = arith.addf %1117, %1120 : vector<2x128xf32>
    %c111_223 = arith.constant 111 : index
    %1122 = memref.load %arg3[%c111_223] : memref<128xf32, #tpu.memory_space<smem>>
    %1123 = vector.broadcast %1122 : f32 to vector<2x128xf32>
    %1124 = arith.mulf %15, %1123 : vector<2x128xf32>
    %1125 = arith.addf %1121, %1124 : vector<2x128xf32>
    %c27_224 = arith.constant 27 : index
    %1126 = memref.load %arg4[%c27_224] : memref<32xf32, #tpu.memory_space<smem>>
    %1127 = vector.broadcast %1126 : f32 to vector<2x128xf32>
    %1128 = arith.addf %1125, %1127 : vector<2x128xf32>
    %cst_225 = arith.constant 0.000000e+00 : f32
    %1129 = vector.broadcast %cst_225 : f32 to vector<2x128xf32>
    %1130 = arith.maximumf %1128, %1129 : vector<2x128xf32>
    %c27_226 = arith.constant 27 : index
    %1131 = memref.load %arg5[%c27_226] : memref<32xf32, #tpu.memory_space<smem>>
    %1132 = vector.broadcast %1131 : f32 to vector<2x128xf32>
    %1133 = arith.mulf %1130, %1132 : vector<2x128xf32>
    %1134 = arith.addf %1094, %1133 : vector<2x128xf32>
    %c112 = arith.constant 112 : index
    %1135 = memref.load %arg2[%c112] : memref<128xf32, #tpu.memory_space<smem>>
    %1136 = vector.broadcast %1135 : f32 to vector<2x128xf32>
    %1137 = arith.mulf %1, %1136 : vector<2x128xf32>
    %c113 = arith.constant 113 : index
    %1138 = memref.load %arg2[%c113] : memref<128xf32, #tpu.memory_space<smem>>
    %1139 = vector.broadcast %1138 : f32 to vector<2x128xf32>
    %1140 = arith.mulf %3, %1139 : vector<2x128xf32>
    %1141 = arith.addf %1137, %1140 : vector<2x128xf32>
    %c114 = arith.constant 114 : index
    %1142 = memref.load %arg2[%c114] : memref<128xf32, #tpu.memory_space<smem>>
    %1143 = vector.broadcast %1142 : f32 to vector<2x128xf32>
    %1144 = arith.mulf %5, %1143 : vector<2x128xf32>
    %1145 = arith.addf %1141, %1144 : vector<2x128xf32>
    %c115 = arith.constant 115 : index
    %1146 = memref.load %arg2[%c115] : memref<128xf32, #tpu.memory_space<smem>>
    %1147 = vector.broadcast %1146 : f32 to vector<2x128xf32>
    %1148 = arith.mulf %7, %1147 : vector<2x128xf32>
    %1149 = arith.addf %1145, %1148 : vector<2x128xf32>
    %c112_227 = arith.constant 112 : index
    %1150 = memref.load %arg3[%c112_227] : memref<128xf32, #tpu.memory_space<smem>>
    %1151 = vector.broadcast %1150 : f32 to vector<2x128xf32>
    %1152 = arith.mulf %9, %1151 : vector<2x128xf32>
    %1153 = arith.addf %1149, %1152 : vector<2x128xf32>
    %c113_228 = arith.constant 113 : index
    %1154 = memref.load %arg3[%c113_228] : memref<128xf32, #tpu.memory_space<smem>>
    %1155 = vector.broadcast %1154 : f32 to vector<2x128xf32>
    %1156 = arith.mulf %11, %1155 : vector<2x128xf32>
    %1157 = arith.addf %1153, %1156 : vector<2x128xf32>
    %c114_229 = arith.constant 114 : index
    %1158 = memref.load %arg3[%c114_229] : memref<128xf32, #tpu.memory_space<smem>>
    %1159 = vector.broadcast %1158 : f32 to vector<2x128xf32>
    %1160 = arith.mulf %13, %1159 : vector<2x128xf32>
    %1161 = arith.addf %1157, %1160 : vector<2x128xf32>
    %c115_230 = arith.constant 115 : index
    %1162 = memref.load %arg3[%c115_230] : memref<128xf32, #tpu.memory_space<smem>>
    %1163 = vector.broadcast %1162 : f32 to vector<2x128xf32>
    %1164 = arith.mulf %15, %1163 : vector<2x128xf32>
    %1165 = arith.addf %1161, %1164 : vector<2x128xf32>
    %c28_231 = arith.constant 28 : index
    %1166 = memref.load %arg4[%c28_231] : memref<32xf32, #tpu.memory_space<smem>>
    %1167 = vector.broadcast %1166 : f32 to vector<2x128xf32>
    %1168 = arith.addf %1165, %1167 : vector<2x128xf32>
    %cst_232 = arith.constant 0.000000e+00 : f32
    %1169 = vector.broadcast %cst_232 : f32 to vector<2x128xf32>
    %1170 = arith.maximumf %1168, %1169 : vector<2x128xf32>
    %c28_233 = arith.constant 28 : index
    %1171 = memref.load %arg5[%c28_233] : memref<32xf32, #tpu.memory_space<smem>>
    %1172 = vector.broadcast %1171 : f32 to vector<2x128xf32>
    %1173 = arith.mulf %1170, %1172 : vector<2x128xf32>
    %1174 = arith.addf %1134, %1173 : vector<2x128xf32>
    %c116 = arith.constant 116 : index
    %1175 = memref.load %arg2[%c116] : memref<128xf32, #tpu.memory_space<smem>>
    %1176 = vector.broadcast %1175 : f32 to vector<2x128xf32>
    %1177 = arith.mulf %1, %1176 : vector<2x128xf32>
    %c117 = arith.constant 117 : index
    %1178 = memref.load %arg2[%c117] : memref<128xf32, #tpu.memory_space<smem>>
    %1179 = vector.broadcast %1178 : f32 to vector<2x128xf32>
    %1180 = arith.mulf %3, %1179 : vector<2x128xf32>
    %1181 = arith.addf %1177, %1180 : vector<2x128xf32>
    %c118 = arith.constant 118 : index
    %1182 = memref.load %arg2[%c118] : memref<128xf32, #tpu.memory_space<smem>>
    %1183 = vector.broadcast %1182 : f32 to vector<2x128xf32>
    %1184 = arith.mulf %5, %1183 : vector<2x128xf32>
    %1185 = arith.addf %1181, %1184 : vector<2x128xf32>
    %c119 = arith.constant 119 : index
    %1186 = memref.load %arg2[%c119] : memref<128xf32, #tpu.memory_space<smem>>
    %1187 = vector.broadcast %1186 : f32 to vector<2x128xf32>
    %1188 = arith.mulf %7, %1187 : vector<2x128xf32>
    %1189 = arith.addf %1185, %1188 : vector<2x128xf32>
    %c116_234 = arith.constant 116 : index
    %1190 = memref.load %arg3[%c116_234] : memref<128xf32, #tpu.memory_space<smem>>
    %1191 = vector.broadcast %1190 : f32 to vector<2x128xf32>
    %1192 = arith.mulf %9, %1191 : vector<2x128xf32>
    %1193 = arith.addf %1189, %1192 : vector<2x128xf32>
    %c117_235 = arith.constant 117 : index
    %1194 = memref.load %arg3[%c117_235] : memref<128xf32, #tpu.memory_space<smem>>
    %1195 = vector.broadcast %1194 : f32 to vector<2x128xf32>
    %1196 = arith.mulf %11, %1195 : vector<2x128xf32>
    %1197 = arith.addf %1193, %1196 : vector<2x128xf32>
    %c118_236 = arith.constant 118 : index
    %1198 = memref.load %arg3[%c118_236] : memref<128xf32, #tpu.memory_space<smem>>
    %1199 = vector.broadcast %1198 : f32 to vector<2x128xf32>
    %1200 = arith.mulf %13, %1199 : vector<2x128xf32>
    %1201 = arith.addf %1197, %1200 : vector<2x128xf32>
    %c119_237 = arith.constant 119 : index
    %1202 = memref.load %arg3[%c119_237] : memref<128xf32, #tpu.memory_space<smem>>
    %1203 = vector.broadcast %1202 : f32 to vector<2x128xf32>
    %1204 = arith.mulf %15, %1203 : vector<2x128xf32>
    %1205 = arith.addf %1201, %1204 : vector<2x128xf32>
    %c29_238 = arith.constant 29 : index
    %1206 = memref.load %arg4[%c29_238] : memref<32xf32, #tpu.memory_space<smem>>
    %1207 = vector.broadcast %1206 : f32 to vector<2x128xf32>
    %1208 = arith.addf %1205, %1207 : vector<2x128xf32>
    %cst_239 = arith.constant 0.000000e+00 : f32
    %1209 = vector.broadcast %cst_239 : f32 to vector<2x128xf32>
    %1210 = arith.maximumf %1208, %1209 : vector<2x128xf32>
    %c29_240 = arith.constant 29 : index
    %1211 = memref.load %arg5[%c29_240] : memref<32xf32, #tpu.memory_space<smem>>
    %1212 = vector.broadcast %1211 : f32 to vector<2x128xf32>
    %1213 = arith.mulf %1210, %1212 : vector<2x128xf32>
    %1214 = arith.addf %1174, %1213 : vector<2x128xf32>
    %c120 = arith.constant 120 : index
    %1215 = memref.load %arg2[%c120] : memref<128xf32, #tpu.memory_space<smem>>
    %1216 = vector.broadcast %1215 : f32 to vector<2x128xf32>
    %1217 = arith.mulf %1, %1216 : vector<2x128xf32>
    %c121 = arith.constant 121 : index
    %1218 = memref.load %arg2[%c121] : memref<128xf32, #tpu.memory_space<smem>>
    %1219 = vector.broadcast %1218 : f32 to vector<2x128xf32>
    %1220 = arith.mulf %3, %1219 : vector<2x128xf32>
    %1221 = arith.addf %1217, %1220 : vector<2x128xf32>
    %c122 = arith.constant 122 : index
    %1222 = memref.load %arg2[%c122] : memref<128xf32, #tpu.memory_space<smem>>
    %1223 = vector.broadcast %1222 : f32 to vector<2x128xf32>
    %1224 = arith.mulf %5, %1223 : vector<2x128xf32>
    %1225 = arith.addf %1221, %1224 : vector<2x128xf32>
    %c123 = arith.constant 123 : index
    %1226 = memref.load %arg2[%c123] : memref<128xf32, #tpu.memory_space<smem>>
    %1227 = vector.broadcast %1226 : f32 to vector<2x128xf32>
    %1228 = arith.mulf %7, %1227 : vector<2x128xf32>
    %1229 = arith.addf %1225, %1228 : vector<2x128xf32>
    %c120_241 = arith.constant 120 : index
    %1230 = memref.load %arg3[%c120_241] : memref<128xf32, #tpu.memory_space<smem>>
    %1231 = vector.broadcast %1230 : f32 to vector<2x128xf32>
    %1232 = arith.mulf %9, %1231 : vector<2x128xf32>
    %1233 = arith.addf %1229, %1232 : vector<2x128xf32>
    %c121_242 = arith.constant 121 : index
    %1234 = memref.load %arg3[%c121_242] : memref<128xf32, #tpu.memory_space<smem>>
    %1235 = vector.broadcast %1234 : f32 to vector<2x128xf32>
    %1236 = arith.mulf %11, %1235 : vector<2x128xf32>
    %1237 = arith.addf %1233, %1236 : vector<2x128xf32>
    %c122_243 = arith.constant 122 : index
    %1238 = memref.load %arg3[%c122_243] : memref<128xf32, #tpu.memory_space<smem>>
    %1239 = vector.broadcast %1238 : f32 to vector<2x128xf32>
    %1240 = arith.mulf %13, %1239 : vector<2x128xf32>
    %1241 = arith.addf %1237, %1240 : vector<2x128xf32>
    %c123_244 = arith.constant 123 : index
    %1242 = memref.load %arg3[%c123_244] : memref<128xf32, #tpu.memory_space<smem>>
    %1243 = vector.broadcast %1242 : f32 to vector<2x128xf32>
    %1244 = arith.mulf %15, %1243 : vector<2x128xf32>
    %1245 = arith.addf %1241, %1244 : vector<2x128xf32>
    %c30_245 = arith.constant 30 : index
    %1246 = memref.load %arg4[%c30_245] : memref<32xf32, #tpu.memory_space<smem>>
    %1247 = vector.broadcast %1246 : f32 to vector<2x128xf32>
    %1248 = arith.addf %1245, %1247 : vector<2x128xf32>
    %cst_246 = arith.constant 0.000000e+00 : f32
    %1249 = vector.broadcast %cst_246 : f32 to vector<2x128xf32>
    %1250 = arith.maximumf %1248, %1249 : vector<2x128xf32>
    %c30_247 = arith.constant 30 : index
    %1251 = memref.load %arg5[%c30_247] : memref<32xf32, #tpu.memory_space<smem>>
    %1252 = vector.broadcast %1251 : f32 to vector<2x128xf32>
    %1253 = arith.mulf %1250, %1252 : vector<2x128xf32>
    %1254 = arith.addf %1214, %1253 : vector<2x128xf32>
    %c124 = arith.constant 124 : index
    %1255 = memref.load %arg2[%c124] : memref<128xf32, #tpu.memory_space<smem>>
    %1256 = vector.broadcast %1255 : f32 to vector<2x128xf32>
    %1257 = arith.mulf %1, %1256 : vector<2x128xf32>
    %c125 = arith.constant 125 : index
    %1258 = memref.load %arg2[%c125] : memref<128xf32, #tpu.memory_space<smem>>
    %1259 = vector.broadcast %1258 : f32 to vector<2x128xf32>
    %1260 = arith.mulf %3, %1259 : vector<2x128xf32>
    %1261 = arith.addf %1257, %1260 : vector<2x128xf32>
    %c126 = arith.constant 126 : index
    %1262 = memref.load %arg2[%c126] : memref<128xf32, #tpu.memory_space<smem>>
    %1263 = vector.broadcast %1262 : f32 to vector<2x128xf32>
    %1264 = arith.mulf %5, %1263 : vector<2x128xf32>
    %1265 = arith.addf %1261, %1264 : vector<2x128xf32>
    %c127 = arith.constant 127 : index
    %1266 = memref.load %arg2[%c127] : memref<128xf32, #tpu.memory_space<smem>>
    %1267 = vector.broadcast %1266 : f32 to vector<2x128xf32>
    %1268 = arith.mulf %7, %1267 : vector<2x128xf32>
    %1269 = arith.addf %1265, %1268 : vector<2x128xf32>
    %c124_248 = arith.constant 124 : index
    %1270 = memref.load %arg3[%c124_248] : memref<128xf32, #tpu.memory_space<smem>>
    %1271 = vector.broadcast %1270 : f32 to vector<2x128xf32>
    %1272 = arith.mulf %9, %1271 : vector<2x128xf32>
    %1273 = arith.addf %1269, %1272 : vector<2x128xf32>
    %c125_249 = arith.constant 125 : index
    %1274 = memref.load %arg3[%c125_249] : memref<128xf32, #tpu.memory_space<smem>>
    %1275 = vector.broadcast %1274 : f32 to vector<2x128xf32>
    %1276 = arith.mulf %11, %1275 : vector<2x128xf32>
    %1277 = arith.addf %1273, %1276 : vector<2x128xf32>
    %c126_250 = arith.constant 126 : index
    %1278 = memref.load %arg3[%c126_250] : memref<128xf32, #tpu.memory_space<smem>>
    %1279 = vector.broadcast %1278 : f32 to vector<2x128xf32>
    %1280 = arith.mulf %13, %1279 : vector<2x128xf32>
    %1281 = arith.addf %1277, %1280 : vector<2x128xf32>
    %c127_251 = arith.constant 127 : index
    %1282 = memref.load %arg3[%c127_251] : memref<128xf32, #tpu.memory_space<smem>>
    %1283 = vector.broadcast %1282 : f32 to vector<2x128xf32>
    %1284 = arith.mulf %15, %1283 : vector<2x128xf32>
    %1285 = arith.addf %1281, %1284 : vector<2x128xf32>
    %c31_252 = arith.constant 31 : index
    %1286 = memref.load %arg4[%c31_252] : memref<32xf32, #tpu.memory_space<smem>>
    %1287 = vector.broadcast %1286 : f32 to vector<2x128xf32>
    %1288 = arith.addf %1285, %1287 : vector<2x128xf32>
    %cst_253 = arith.constant 0.000000e+00 : f32
    %1289 = vector.broadcast %cst_253 : f32 to vector<2x128xf32>
    %1290 = arith.maximumf %1288, %1289 : vector<2x128xf32>
    %c31_254 = arith.constant 31 : index
    %1291 = memref.load %arg5[%c31_254] : memref<32xf32, #tpu.memory_space<smem>>
    %1292 = vector.broadcast %1291 : f32 to vector<2x128xf32>
    %1293 = arith.mulf %1290, %1292 : vector<2x128xf32>
    %1294 = arith.addf %1254, %1293 : vector<2x128xf32>
    %c0_255 = arith.constant 0 : index
    %1295 = memref.load %arg6[%c0_255] : memref<1xf32, #tpu.memory_space<smem>>
    %1296 = vector.broadcast %1295 : f32 to vector<2x128xf32>
    %1297 = arith.addf %1294, %1296 : vector<2x128xf32>
    %cst_256 = arith.constant 0.000000e+00 : f32
    %1298 = vector.broadcast %cst_256 : f32 to vector<2x128xf32>
    %1299 = arith.subf %1298, %1297 : vector<2x128xf32>
    %1300 = math.exp %1299 : vector<2x128xf32>
    %cst_257 = arith.constant 1.000000e+00 : f32
    %1301 = vector.broadcast %cst_257 : f32 to vector<2x128xf32>
    %1302 = arith.addf %1301, %1300 : vector<2x128xf32>
    %1303 = tpu.reciprocal %1302 {approx = true} : vector<2x128xf32> -> vector<2x128xf32>
    %1304 = arith.mulf %9, %1303 : vector<2x128xf32>
    %1305 = arith.truncf %1304 : vector<2x128xf32> to vector<2x128xbf16>
    %c0_258 = arith.constant 0 : index
    %c0_259 = arith.constant 0 : index
    %c0_260 = arith.constant 0 : index
    %c0_261 = arith.constant 0 : index
    %1306 = vector.load %arg9[%c0_258, %c0_259, %c0_260, %c0_261] : memref<1x4x2x128xbf16, #tpu.memory_space<vmem>>, vector<1x1x2x128xbf16>
    %1307 = vector.shape_cast %1306 : vector<1x1x2x128xbf16> to vector<2x128xbf16>
    %1308 = vector.shape_cast %1305 : vector<2x128xbf16> to vector<1x1x2x128xbf16>
    tpu.vector_store %arg9[%c0_258, %c0_259, %c0_260, %c0_261], %1308 {strides = array<i32>} : memref<1x4x2x128xbf16, #tpu.memory_space<vmem>>, vector<1x1x2x128xbf16>,
    %1309 = arith.mulf %11, %1303 : vector<2x128xf32>
    %1310 = arith.truncf %1309 : vector<2x128xf32> to vector<2x128xbf16>
    %c0_262 = arith.constant 0 : index
    %c1_263 = arith.constant 1 : index
    %c0_264 = arith.constant 0 : index
    %c0_265 = arith.constant 0 : index
    %1311 = vector.load %arg9[%c0_262, %c1_263, %c0_264, %c0_265] : memref<1x4x2x128xbf16, #tpu.memory_space<vmem>>, vector<1x1x2x128xbf16>
    %1312 = vector.shape_cast %1311 : vector<1x1x2x128xbf16> to vector<2x128xbf16>
    %1313 = vector.shape_cast %1310 : vector<2x128xbf16> to vector<1x1x2x128xbf16>
    tpu.vector_store %arg9[%c0_262, %c1_263, %c0_264, %c0_265], %1313 {strides = array<i32>} : memref<1x4x2x128xbf16, #tpu.memory_space<vmem>>, vector<1x1x2x128xbf16>,
    %1314 = arith.mulf %13, %1303 : vector<2x128xf32>
    %1315 = arith.truncf %1314 : vector<2x128xf32> to vector<2x128xbf16>
    %c0_266 = arith.constant 0 : index
    %c2_267 = arith.constant 2 : index
    %c0_268 = arith.constant 0 : index
    %c0_269 = arith.constant 0 : index
    %1316 = vector.load %arg9[%c0_266, %c2_267, %c0_268, %c0_269] : memref<1x4x2x128xbf16, #tpu.memory_space<vmem>>, vector<1x1x2x128xbf16>
    %1317 = vector.shape_cast %1316 : vector<1x1x2x128xbf16> to vector<2x128xbf16>
    %1318 = vector.shape_cast %1315 : vector<2x128xbf16> to vector<1x1x2x128xbf16>
    tpu.vector_store %arg9[%c0_266, %c2_267, %c0_268, %c0_269], %1318 {strides = array<i32>} : memref<1x4x2x128xbf16, #tpu.memory_space<vmem>>, vector<1x1x2x128xbf16>,
    %1319 = arith.mulf %15, %1303 : vector<2x128xf32>
    %1320 = arith.truncf %1319 : vector<2x128xf32> to vector<2x128xbf16>
    %c0_270 = arith.constant 0 : index
    %c3_271 = arith.constant 3 : index
    %c0_272 = arith.constant 0 : index
    %c0_273 = arith.constant 0 : index
    %1321 = vector.load %arg9[%c0_270, %c3_271, %c0_272, %c0_273] : memref<1x4x2x128xbf16, #tpu.memory_space<vmem>>, vector<1x1x2x128xbf16>
    %1322 = vector.shape_cast %1321 : vector<1x1x2x128xbf16> to vector<2x128xbf16>
    %1323 = vector.shape_cast %1320 : vector<2x128xbf16> to vector<1x1x2x128xbf16>
    tpu.vector_store %arg9[%c0_270, %c3_271, %c0_272, %c0_273], %1323 {strides = array<i32>} : memref<1x4x2x128xbf16, #tpu.memory_space<vmem>>, vector<1x1x2x128xbf16>,
    return
  }
  func.func @transform_0(%arg0: i32, %arg1: i32) -> i32 {
    %c0_i32 = arith.constant 0 : i32
    %c0_i32_0 = arith.constant 0 : i32
    return %c0_i32 : i32
  }
  func.func @transform_1(%arg0: i32, %arg1: i32) -> i32 {
    %c0_i32 = arith.constant 0 : i32
    %c0_i32_0 = arith.constant 0 : i32
    return %c0_i32 : i32
  }
  func.func @transform_2(%arg0: i32, %arg1: i32) -> i32 {
    %c0_i32 = arith.constant 0 : i32
    %c0_i32_0 = arith.constant 0 : i32
    return %c0_i32 : i32
  }
  func.func @transform_3(%arg0: i32, %arg1: i32) -> i32 {
    %c0_i32 = arith.constant 0 : i32
    %c0_i32_0 = arith.constant 0 : i32
    return %c0_i32 : i32
  }
  func.func @transform_4(%arg0: i32, %arg1: i32) -> i32 {
    %c0_i32 = arith.constant 0 : i32
    %c0_i32_0 = arith.constant 0 : i32
    return %c0_i32 : i32
  }
  func.func @transform_5(%arg0: i32, %arg1: i32) -> (i32, i32, i32, i32) {
    %c0_i32 = arith.constant 0 : i32
    %c0_i32_0 = arith.constant 0 : i32
    %c0_i32_1 = arith.constant 0 : i32
    return %arg0, %c0_i32, %arg1, %c0_i32_0 : i32, i32, i32, i32
  }
  func.func @transform_6(%arg0: i32, %arg1: i32) -> (i32, i32, i32, i32) {
    %c0_i32 = arith.constant 0 : i32
    %c0_i32_0 = arith.constant 0 : i32
    %c0_i32_1 = arith.constant 0 : i32
    return %arg0, %c0_i32, %arg1, %c0_i32_0 : i32, i32, i32, i32
  }
  func.func @transform_7(%arg0: i32, %arg1: i32) -> (i32, i32, i32, i32) {
    %c0_i32 = arith.constant 0 : i32
    %c0_i32_0 = arith.constant 0 : i32
    %c0_i32_1 = arith.constant 0 : i32
    return %arg0, %c0_i32, %arg1, %c0_i32_0 : i32, i32, i32, i32
  }
}

</mosaic_0001>

<bundles_post_ra>
// kernel: _forward_impl.1
= control target key start
LH: loop header
LB: loop body
LE: loop exit
PB: predicated region body
PF: predicated region fallthrough
CT: control target
= control target key end

     0   :  { %s3812_s0 = inlined_call_operand.vmem [shape: f32[128], index: 0, kind: input, shape index: {}]   ;;  %s3813_s1 = inlined_call_operand.vmem [shape: f32[128], index: 1, kind: input, shape index: {}]   ;;  %s3814_s2 = inlined_call_operand.vmem [shape: f32[32], index: 2, kind: input, shape index: {}]   ;;  %s3815_s3 = inlined_call_operand.vmem [shape: f32[32], index: 3, kind: input, shape index: {}]   ;;  %s3816_s4 = inlined_call_operand.<no memory space> [shape: f32[1], index: 4, kind: input, shape index: {}]   ;;  %s3817_s5 = inlined_call_operand.vmem [shape: f32[2,4,2,128], index: 5, kind: input, shape index: {}]   ;;  %s3818_s6 = inlined_call_operand.vmem [shape: f32[2,4,2,128], index: 6, kind: input, shape index: {}]   ;;  %s3819_s7 = inlined_call_operand.vmem [shape: bf16[2,4,2,128], index: 7, kind: output, shape index: {}]  }
   0x1   :  { %3837 = sst [smem:[#allocation69_spill]] %s3812_s0 }
   0x2   :  { %3838 = sst [smem:[#allocation70_spill]] %s3813_s1 }
   0x3   :  { %3839 = sst [smem:[#allocation71_spill]] %s3814_s2 }
   0x4   :  { %3840 = sst [smem:[#allocation72_spill]] %s3815_s3 }
   0x5   :  { %3841 = sst [smem:[#allocation73_spill]] %s3817_s5 }
   0x6   :  { %3842 = sst [smem:[#allocation74_spill]] %s3818_s6 }
   0x7   :  { %3843 = sst [smem:[#allocation75_spill]] %s3819_s7 }
   0x8   :  { %12 = sst [smem:[#allocation2]] %s3816_s4 }
   0x9   :  { %13 = vsyncpa [#allocation4], 0 }
   0xa   :  { %14 = vsyncpa [#allocation6], 0 }
   0xb   :  { %15 = vsyncpa [#allocation9], 0  ;;  %s2388_s26 = smov 0   ;;  %s2390_s27 = smov 0  }
   0xc   :  { %s2392_s28 = smov 0  }
   0xd LB: > { %3844 = sst [smem:[#allocation13_spill]] %s2335_s27  ;;  %s1813_s8 = sadd.s32 4294967295, %s2339_s28   ;;  %s2339_s28 = sphi %s2392_s28, %s21_s28   ;;  %s2335_s27 = sphi %s2390_s27, %s4106_s27   ;;  %s2331_s26 = sphi %s2388_s26, %s4105_s26  }
   0xe   : > { %3845 = sst [smem:[#allocation14_spill]] %s2339_s28  ;;  %p1815_p0 = scmp.ge.s32.totalorder %s2339_s28, 1 }
   0xf   : > { %s3846_s1 = sld [smem:[#allocation70_spill]]  ;;  %p227_p1 = scmp.lt.s32.totalorder %s2339_s28, 3 }
  0x10   : > { %p2409_p2 = scmp.eq.s32.totalorder %s1813_s8, 0  ;;  %s33_s11 = sadd.s32 1, %s2335_s27 }
  0x11   : > { %p2413_p3 = pnand %p1815_p0, %p227_p1  ;;  %s3849_s0 = sld [smem:[#allocation69_spill]] }
  0x12   : > { %p35_p6 = scmp.ge.s32.totalorder %s33_s11, 2  ;;  %s3851_s2 = sld [smem:[#allocation71_spill]] }
  0x13   : > { %p2176_p4 = pneg %p2413_p3  ;;  %s2341_s19 = smov [#allocation5]  }
  0x14   : > { %s4108_s11 = smov (%p35_p6, %s33_s11), 0  ;;  %s2342_s20 = smov [#allocation3]  }
  0x15   : > { %s249_s30 = sshll.u32 %s3846_s1, 4  ;;  %p2425_p5 = pnand %p2409_p2, %p2176_p4  ;;  %s250_s30 = int_to_ptr.vmem [resolvable:$true] %s249_s30 }
  0x16   : > { %3852 = sst [smem:[#allocation15_spill]] %s4108_s11  ;;  %s2343_s21 = smov [#allocation7]  }
  0x17   : > { %s239_s14 = sshll.u32 %s3849_s0, 4  ;;  %s3853_s3 = sld [smem:[#allocation72_spill]]  ;;  %s240_s14 = int_to_ptr.vmem [resolvable:$true] %s239_s14 }
  0x18   : > { %s259_s18 = sshll.u32 %s3851_s2, 4  ;;  %s2344_s25 = smov [#allocation8]   ;;  %s260_s18 = int_to_ptr.vmem [resolvable:$true] %s259_s18 }
  0x19   : > { %2182 = dma.vmem_to_smem (!%p2425_p5), %s250_s30, 16, %s2341_s19, [#allocation6]  }
  0x1a   : > { %2179 = dma.vmem_to_smem (!%p2425_p5), %s240_s14, 16, %s2342_s20, [#allocation4]  }
  0x1b   : > { %2185 = dma.vmem_to_smem (!%p2425_p5), %s260_s18, 16, %s2343_s21, [#allocation6]  }
  0x1c   : > { %307 = sbr.rel (%p2413_p3) target bundleno = 659 (0x293), region = 48 }
  0x1d   : > { %s269_s24 = sshll.u32 %s3853_s3, 4  ;;  %s270_s24 = int_to_ptr.vmem [resolvable:$true] %s269_s24 }
  0x1e   : > { %2188 = dma.vmem_to_smem (!%p2425_p5), %s270_s24, 16, %s2344_s25, [#allocation9]  }
  0x21   : > { %2318 = dma.done.wait (%p2409_p2), [#allocation4], 16  }
  0x22   : > { %2320 = vsyncadd (%p2409_p2), [#allocation4], 4294967280 }
  0x23   : > { %2322 = dma.done.wait (%p2409_p2), [#allocation6], 32  }
  0x24   : > { %2324 = vsyncadd (%p2409_p2), [#allocation6], 4294967264 }
  0x25   : > { %2326 = dma.done.wait (%p2409_p2), [#allocation9], 16  }
  0x26   : > { %2328 = vsyncadd (%p2409_p2), [#allocation9], 4294967280 }
  0x27   : > { %329 = sfence }
  0x28   : > { %p369_p7 = scmp.lt.s32.totalorder %s2331_s26, 1  ;;  %s2460_s4 = sld [smem:[#allocation3]] }
  0x29   : > { %s2462_s29 = sld [smem:[#allocation3 + $0x1]] }
  0x2a   : > { %s4110_s26 = smov (!%p369_p7, %s2331_s26), 1  ;;  %s2467_s30 = sld [smem:[#allocation3 + $0x2]] }
  0x2b   : > { %3854 = sst [smem:[#allocation16_spill]] %s4110_s26 }
  0x2c   : > { %s2469_s8 = sld [smem:[#allocation3 + $0x3]] }
  0x2d   : > { %s2471_s10 = sld [smem:[#allocation5]] }
  0x2e   : > { %s2473_s12 = sld [smem:[#allocation5 + $0x1]]  ;;  %v407_v2 = vstv %s2460_s4 }
  0x2f   : > { %s2475_s9 = sld [smem:[#allocation5 + $0x2]]  ;;  %v410_v3 = vstv %s2462_s29 }
  0x30   : > { %s2477_s13 = sld [smem:[#allocation5 + $0x3]]  ;;  %v414_v9 = vstv %s2467_s30 }
  0x31   : > { %s2479_s14 = sld [smem:[#allocation7]] }
  0x32   : > { %s2481_s15 = sld [smem:[#allocation8]]  ;;  %v418_v18 = vstv %s2469_s8 }
  0x33   : > { %s2483_s16 = sld [smem:[#allocation3 + $0x4]]  ;;  %v422_v28 = vstv %s2471_s10 }
  0x34   : > { %s2485_s17 = sld [smem:[#allocation3 + $0x5]]  ;;  %v426_v38 = vstv %s2473_s12 }
  0x35   : > { %3855 = sst [smem:[#allocation17_spill]] %s2475_s9 }
  0x36   : > { %3856 = sst [smem:[#allocation18_spill]] %s2477_s13 }
  0x37   : > { %3857 = sst [smem:[#allocation19_spill]] %s2479_s14 }
  0x38   : > { %3858 = sst [smem:[#allocation20_spill]] %s2481_s15 }
  0x39   : > { %s2487_s18 = sld [smem:[#allocation3 + $0x6]]  ;;  %v445_v4 = vstv %s2483_s16 }
  0x3a   : > { %s2489_s19 = sld [smem:[#allocation3 + $0x7]]  ;;  %v448_v5 = vstv %s2485_s17 }
  0x3b   : > { %s2491_s20 = sld [smem:[#allocation5 + $0x4]] }
  0x3c   : > { %s2493_s21 = sld [smem:[#allocation5 + $0x5]] }
  0x3d   : > { %s2495_s22 = sld [smem:[#allocation5 + $0x6]] }
  0x3e   : > { %s2497_s23 = sld [smem:[#allocation5 + $0x7]] }
  0x3f   : > { %s2499_s24 = sld [smem:[#allocation7 + $0x1]]  ;;  %v452_v12 = vstv %s2487_s18  ;;  %s3903_s18 = sshll.u32 %s4110_s26, 3 }
  0x40   : > { %s2501_s25 = sld [smem:[#allocation8 + $0x1]]  ;;  %v456_v21 = vstv %s2489_s19 }
  0x41   : > { %s2503_s0 = sld [smem:[#allocation3 + $0x8]]  ;;  %v460_v31 = vstv %s2491_s20 }
  0x42   : > { %s2505_s1 = sld [smem:[#allocation3 + $0x9]]  ;;  %v464_v41 = vstv %s2493_s21 }
  0x43   : > { %3859 = sst [smem:[#allocation21_spill]] %s2495_s22 }
  0x44   : > { %3860 = sst [smem:[#allocation22_spill]] %s2497_s23 }
  0x45   : > { %3861 = sst [smem:[#allocation23_spill]] %s2499_s24 }
  0x46   : > { %3862 = sst [smem:[#allocation24_spill]] %s2501_s25 }
  0x47   : > { %s2507_s2 = sld [smem:[#allocation3 + $0xa]]  ;;  %v484_v13 = vstv %s2503_s0 }
  0x48   : > { %s2509_s3 = sld [smem:[#allocation3 + $0xb]]  ;;  %v487_v14 = vstv %s2505_s1 }
  0x49   : > { %s2511_s11 = sld [smem:[#allocation5 + $0x8]] }
  0x4a   : > { %s2513_s27 = sld [smem:[#allocation5 + $0x9]] }
  0x4b   : > { %s2515_s28 = sld [smem:[#allocation5 + $0xa]] }
  0x4c   : > { %s2517_s7 = sld [smem:[#allocation5 + $0xb]] }
  0x4d   : > { %s2519_s15 = sld [smem:[#allocation7 + $0x2]]  ;;  %v491_v24 = vstv %s2507_s2 }
  0x4e   : > { %s2521_s24 = sld [smem:[#allocation8 + $0x2]]  ;;  %v495_v34 = vstv %s2509_s3 }
  0x4f   : > { %s2523_s25 = sld [smem:[#allocation3 + $0xc]]  ;;  %v499_v44 = vstv %s2511_s11 }
  0x50   : > { %3863 = sst [smem:[#allocation25_spill]] %s2513_s27 }
  0x51   : > { %3864 = sst [smem:[#allocation26_spill]] %s2515_s28 }
  0x52   : > { %3865 = sst [smem:[#allocation27_spill]] %s2517_s7 }
  0x53   : > { %3866 = sst [smem:[#allocation28_spill]] %s2519_s15 }
  0x54   : > { %3867 = sst [smem:[#allocation29_spill]] %s2521_s24 }
  0x55   : > { %3868 = sst [smem:[#allocation30_spill]] %s2523_s25 }
  0x56   : > { %s2525_s14 = sld [smem:[#allocation3 + $0xd]] }
  0x57   : > { %s2527_s23 = sld [smem:[#allocation3 + $0xe]] }
  0x58   : > { %s2529_s13 = sld [smem:[#allocation3 + $0xf]] }
  0x59   : > { %s2531_s22 = sld [smem:[#allocation5 + $0xc]] }
  0x5a   : > { %s2533_s9 = sld [smem:[#allocation5 + $0xd]] }
  0x5b   : > { %s2535_s27 = sld [smem:[#allocation5 + $0xe]] }
  0x5c   : > { %3869 = sst [smem:[#allocation31_spill]] %s2525_s14 }
  0x5d   : > { %s2537_s28 = sld [smem:[#allocation5 + $0xf]] }
  0x5e   : > { %3870 = sst [smem:[#allocation32_spill]] %s2529_s13 }
  0x5f   : > { %3871 = sst [smem:[#allocation33_spill]] %s2531_s22 }
  0x60   : > { %3872 = sst [smem:[#allocation34_spill]] %s2533_s9 }
  0x61   : > { %3873 = sst [smem:[#allocation35_spill]] %s2535_s27 }
  0x62   : > { %s2539_s7 = sld [smem:[#allocation7 + $0x3]] }
  0x63   : > { %3874 = sst [smem:[#allocation36_spill]] %s2537_s28 }
  0x64   : > { %s2541_s15 = sld [smem:[#allocation8 + $0x3]] }
  0x65   : > { %s2543_s24 = sld [smem:[#allocation3 + $0x10]] }
  0x66   : > { %s2545_s25 = sld [smem:[#allocation3 + $0x11]] }
  0x67   : > { %s2547_s14 = sld [smem:[#allocation3 + $0x12]] }
  0x68   : > { %3875 = sst [smem:[#allocation37_spill]] %s2539_s7 }
  0x69   : > { %s2549_s13 = sld [smem:[#allocation3 + $0x13]] }
  0x6a   : > { %3876 = sst [smem:[#allocation38_spill]] %s2541_s15 }
  0x6b   : > { %3877 = sst [smem:[#allocation39_spill]] %s2543_s24 }
  0x6c   : > { %3878 = sst [smem:[#allocation40_spill]] %s2545_s25 }
  0x6d   : > { %3879 = sst [smem:[#allocation41_spill]] %s2547_s14 }
  0x6e   : > { %s2551_s22 = sld [smem:[#allocation5 + $0x10]] }
  0x6f   : > { %3880 = sst [smem:[#allocation42_spill]] %s2549_s13 }
  0x70   : > { %s2553_s9 = sld [smem:[#allocation5 + $0x11]] }
  0x71   : > { %s2555_s27 = sld [smem:[#allocation5 + $0x12]] }
  0x72   : > { %s2557_s28 = sld [smem:[#allocation5 + $0x13]] }
  0x73   : > { %s2559_s7 = sld [smem:[#allocation7 + $0x4]] }
  0x74   : > { %3881 = sst [smem:[#allocation43_spill]] %s2551_s22 }
  0x75   : > { %s2561_s15 = sld [smem:[#allocation8 + $0x4]] }
  0x76   : > { %3882 = sst [smem:[#allocation44_spill]] %s2553_s9 }
  0x77   : > { %3883 = sst [smem:[#allocation45_spill]] %s2555_s27 }
  0x78   : > { %3884 = sst [smem:[#allocation46_spill]] %s2557_s28 }
  0x79   : > { %3885 = sst [smem:[#allocation47_spill]] %s2559_s7 }
  0x7a   : > { %s2563_s24 = sld [smem:[#allocation3 + $0x14]] }
  0x7b   : > { %3886 = sst [smem:[#allocation48_spill]] %s2561_s15  ;;  %s3825_s15 = sshll.u32 %s4110_s26, 3 }
  0x7c   : > { %s2565_s25 = sld [smem:[#allocation3 + $0x15]] }
  0x7d   : > { %s2567_s14 = sld [smem:[#allocation3 + $0x16]] }
  0x7e   : > { %s2569_s13 = sld [smem:[#allocation3 + $0x17]] }
  0x7f   : > { %s2571_s9 = sld [smem:[#allocation5 + $0x14]] }
  0x80   : > { %3887 = sst [smem:[#allocation49_spill]] %s2563_s24 }
  0x81   : > { %s2573_s27 = sld [smem:[#allocation5 + $0x15]] }
  0x82   : > { %3888 = sst [smem:[#allocation50_spill]] %s2565_s25 }
  0x83   : > { %3889 = sst [smem:[#allocation51_spill]] %s2567_s14 }
  0x84   : > { %3890 = sst [smem:[#allocation52_spill]] %s2569_s13 }
  0x85   : > { %3891 = sst [smem:[#allocation53_spill]] %s2571_s9 }
  0x86   : > { %s2575_s28 = sld [smem:[#allocation5 + $0x16]] }
  0x87   : > { %3892 = sst [smem:[#allocation54_spill]] %s2573_s27 }
  0x88   : > { %s2577_s7 = sld [smem:[#allocation5 + $0x17]] }
  0x89   : > { %s2580_s22 = sld [smem:[#allocation7 + $0x5]] }
  0x8a   : > { %s2582_s25 = sld [smem:[#allocation8 + $0x5]] }
  0x8b   : > { %s2584_s14 = sld [smem:[#allocation3 + $0x18]] }
  0x8c   : > { %3893 = sst [smem:[#allocation55_spill]] %s2575_s28 }
  0x8d   : > { %s3897_s5 = sld [smem:[#allocation73_spill]] }
  0x8e   : > { %3894 = sst [smem:[#allocation56_spill]] %s2577_s7 }
  0x8f   : > { %3895 = sst [smem:[#allocation57_spill]] %s2580_s22 }
  0x90   : > { %3896 = sst [smem:[#allocation58_spill]] %s2582_s25 }
  0x91   : > { %s2593_s28 = sld [smem:[#allocation3 + $0x19]] }
  0x92   : > { %s2595_s7 = sld [smem:[#allocation3 + $0x1a]] }
  0x93   : > { %s2591_s9 = scalar_lea.vmem %s3897_s5, %s3825_s15  ;;  %s2597_s27 = sld [smem:[#allocation3 + $0x1b]] }
  0x94   : > { %3898 = sst [smem:[#allocation59_spill]] %s2591_s9  ;;  %v2600_v0 = vld [vmem:[%s2591_s9] sm:$0x3]  ;;  %v2603_v1 = vld [vmem:[%s2591_s9 + $0x2] sm:$0x3] }
  0x95   : > { %s2607_s13 = sld [smem:[#allocation5 + $0x18]]  ;;  %v408_v6 = vmul.f32 %v407_v2, %v2600_v0  ;;  %v411_v7 = vmul.f32 %v2603_v1, %v410_v3  ;;  %v2620_v8 = vld [vmem:[%s2591_s9 + $0x4] sm:$0x3]  ;;  %v446_v10 = vmul.f32 %v445_v4, %v2600_v0  ;;  %v449_v11 = vmul.f32 %v2603_v1, %v448_v5  ;;  %v2638_v17 = vld [vmem:[%s2591_s9 + $0x6] sm:$0x3] }
  0x96   : > { %s2611_s24 = sld [smem:[#allocation5 + $0x19]]  ;;  %v415_v16 = vmul.f32 %v2620_v8, %v414_v9  ;;  %v453_v20 = vmul.f32 %v2620_v8, %v452_v12  ;;  %v485_v22 = vmul.f32 %v484_v13, %v2600_v0  ;;  %v488_v23 = vmul.f32 %v2603_v1, %v487_v14 }
  0x97   : > { %s2613_s15 = sld [smem:[#allocation5 + $0x1a]]  ;;  %v412_v15 = vadd.f32 %v411_v7, %v408_v6  ;;  %v450_v19 = vadd.f32 %v449_v11, %v446_v10  ;;  %v419_v26 = vmul.f32 %v2638_v17, %v418_v18  ;;  %v457_v30 = vmul.f32 %v2638_v17, %v456_v21 }
  0x98   : > { %s2617_s5 = sld [smem:[#allocation5 + $0x1b]]  ;;  %v489_v32 = vadd.f32 %v488_v23, %v485_v22  ;;  %v492_v33 = vmul.f32 %v2620_v8, %v491_v24  ;;  %v496_v43 = vmul.f32 %v2638_v17, %v495_v34  ;;  %v530_v3 = vstv %s2527_s23 }
  0x99   : > { %s2625_s4 = sld [smem:[#allocation7 + $0x6]]  ;;  %v416_v25 = vadd.f32 %v415_v16, %v412_v15  ;;  %v454_v29 = vadd.f32 %v453_v20, %v450_v19  ;;  %v531_v11 = vmul.f32 %v2620_v8, %v530_v3 }
  0x9a   : > { %s2628_s29 = sld [smem:[#allocation8 + $0x6]]  ;;  %v493_v42 = vadd.f32 %v492_v33, %v489_v32 }
  0x9b   : > { %s2632_s16 = sld [smem:[#allocation3 + $0x1c]]  ;;  %v420_v35 = vadd.f32 %v419_v26, %v416_v25  ;;  %v458_v39 = vadd.f32 %v457_v30, %v454_v29 }
  0x9c   : > { %s2635_s30 = sld [smem:[#allocation3 + $0x1d]]  ;;  %v497_v54 = vadd.f32 %v496_v43, %v493_v42 }
  0x9d   : > { %3899 = sst [smem:[#allocation60_spill]] %s2613_s15 }
  0x9e   : > { %3900 = sst [smem:[#allocation61_spill]] %s2617_s5 }
  0x9f   : > { %3901 = sst [smem:[#allocation62_spill]] %s2625_s4 }
  0xa0   : > { %3902 = sst [smem:[#allocation63_spill]] %s2628_s29 }
  0xa1   : > { %s2642_s17 = sld [smem:[#allocation3 + $0x1e]] }
  0xa2   : > { %s3904_s6 = sld [smem:[#allocation74_spill]] }
  0xa3   : > { %s2654_s8 = sld [smem:[#allocation3 + $0x1f]] }
  0xa4   : > { %s2657_s9 = sld [smem:[#allocation5 + $0x1c]] }
  0xa5   : > { %s2660_s29 = sld [smem:[#allocation5 + $0x1d]] }
  0xa6   : > { %s2667_s19 = sld [smem:[#allocation5 + $0x1e]] }
  0xa7   : > { %s2671_s2 = sld [smem:[#allocation5 + $0x1f]] }
  0xa8   : > { %s2649_s1 = scalar_lea.vmem %s3904_s6, %s3903_s18  ;;  %s2674_s18 = sld [smem:[#allocation7 + $0x7]] }
  0xa9   : > { %3905 = sst [smem:[#allocation64_spill]] %s2649_s1  ;;  %v2663_v27 = vld [vmem:[%s2649_s1] sm:$0x3]  ;;  %v2680_v37 = vld [vmem:[%s2649_s1 + $0x2] sm:$0x3] }
  0xaa   : > { %s3910_s0 = sld [smem:[#allocation17_spill]]  ;;  %v423_v36 = vmul.f32 %v422_v28, %v2663_v27  ;;  %v461_v40 = vmul.f32 %v460_v31, %v2663_v27  ;;  %v427_v46 = vmul.f32 %v2680_v37, %v426_v38  ;;  %v2698_v48 = vld [vmem:[%s2649_s1 + $0x4] sm:$0x3]  ;;  %v465_v50 = vmul.f32 %v2680_v37, %v464_v41  ;;  %v2719_v61 = vld [vmem:[%s2649_s1 + $0x6] sm:$0x3] }
  0xab   : > { %3906 = sst [smem:[#allocation65_spill]] %s2660_s29  ;;  %v500_v55 = vmul.f32 %v499_v44, %v2663_v27 }
  0xac   : > { %3907 = sst [smem:[#allocation66_spill]] %s2667_s19  ;;  %v424_v45 = vadd.f32 %v423_v36, %v420_v35  ;;  %v462_v49 = vadd.f32 %v461_v40, %v458_v39 }
  0xad   : > { %3908 = sst [smem:[#allocation67_spill]] %s2671_s2  ;;  %v501_v5 = vadd.f32 %v500_v55, %v497_v54 }
  0xae   : > { %3909 = sst [smem:[#allocation68_spill]] %s2674_s18  ;;  %v428_v62 = vadd.f32 %v427_v46, %v424_v45  ;;  %v466_v63 = vadd.f32 %v465_v50, %v462_v49 }
  0xaf   : > { %s2677_s10 = sld [smem:[#allocation8 + $0x7]] }
  0xb0   : > { %s3912_s20 = sld [smem:[#allocation30_spill]]  ;;  %v430_v47 = vstv %s3910_s0 }
  0xb1   : > { %s3913_s6 = sld [smem:[#allocation31_spill]]  ;;  %v431_v57 = vmul.f32 %v2698_v48, %v430_v47 }
  0xb2   : > { %s2684_s26 = sld [smem:[#allocation3 + $0x20]] }
  0xb3   : > { %s3914_s3 = sld [smem:[#allocation21_spill]]  ;;  %v432_v12 = vadd.f32 %v431_v57, %v428_v62 }
  0xb4   : > { %s2688_s18 = sld [smem:[#allocation3 + $0x21]] }
  0xb5   : > { %3911 = sst [smem:[#allocation17_spill]] %s2677_s10 }
  0xb6   : > { %s3915_s10 = sld [smem:[#allocation25_spill]]  ;;  %v523_v51 = vstv %s3912_s20 }
  0xb7   : > { %s2691_s25 = sld [smem:[#allocation3 + $0x22]]  ;;  %v526_v52 = vstv %s3913_s6  ;;  %v524_v59 = vmul.f32 %v523_v51, %v2600_v0 }
  0xb8   : > { %s3916_s12 = sld [smem:[#allocation18_spill]]  ;;  %v527_v60 = vmul.f32 %v2603_v1, %v526_v52 }
  0xb9   : > { %s2695_s4 = sld [smem:[#allocation3 + $0x23]]  ;;  %v468_v53 = vstv %s3914_s3 }
  0xba   : > { %s2703_s21 = sld [smem:[#allocation5 + $0x20]]  ;;  %v469_v2 = vmul.f32 %v2698_v48, %v468_v53  ;;  %v528_v10 = vadd.f32 %v527_v60, %v524_v59 }
  0xbb   : > { %s3918_s11 = sld [smem:[#allocation22_spill]] }
  0xbc   : > { %s2707_s2 = sld [smem:[#allocation5 + $0x21]]  ;;  %v503_v56 = vstv %s3915_s10  ;;  %v470_v13 = vadd.f32 %v469_v2, %v466_v63  ;;  %v532_v20 = vadd.f32 %v531_v11, %v528_v10  ;;  %v640_v11 = vstv %s2584_s14 }
  0xbd   : > { %s2710_s0 = sld [smem:[#allocation5 + $0x22]]  ;;  %v504_v6 = vmul.f32 %v2680_v37, %v503_v56 }
  0xbe   : > { %s3921_s22 = sld [smem:[#allocation26_spill]]  ;;  %v434_v58 = vstv %s3916_s12 }
  0xbf   : > { %s2716_s6 = sld [smem:[#allocation5 + $0x23]]  ;;  %v435_v9 = vmul.f32 %v2719_v61, %v434_v58  ;;  %v505_v16 = vadd.f32 %v504_v6, %v501_v5 }
  0xc0   : > { %3917 = sst [smem:[#allocation30_spill]] %s2703_s21 }
  0xc1   : > { %s3923_s20 = sld [smem:[#allocation32_spill]]  ;;  %v472_v4 = vstv %s3918_s11  ;;  %v436_v22 = vadd.f32 %v435_v9, %v432_v12  ;;  %v643_v12 = vstv %s2593_s28 }
  0xc2   : > { %3919 = sst [smem:[#allocation31_spill]] %s2707_s2  ;;  %v473_v14 = vmul.f32 %v2719_v61, %v472_v4 }
  0xc3   : > { %3920 = sst [smem:[#allocation21_spill]] %s2710_s0 }
  0xc4   : > { %s2723_s10 = sld [smem:[#allocation7 + $0x8]]  ;;  %v507_v7 = vstv %s3921_s22  ;;  %v474_v23 = vadd.f32 %v473_v14, %v470_v13 }
  0xc5   : > { %3922 = sst [smem:[#allocation25_spill]] %s2716_s6  ;;  %v508_v18 = vmul.f32 %v2698_v48, %v507_v7 }
  0xc6   : > { %s3925_s3 = sld [smem:[#allocation27_spill]] }
  0xc7   : > { %s2727_s12 = sld [smem:[#allocation8 + $0x8]]  ;;  %v534_v15 = vstv %s3923_s20  ;;  %v509_v28 = vadd.f32 %v508_v18, %v505_v16 }
  0xc8   : > { %s2730_s0 = sld [smem:[#allocation3 + $0x24]]  ;;  %v535_v21 = vmul.f32 %v2638_v17, %v534_v15 }
  0xc9   : > { %s2734_s1 = sld [smem:[#allocation3 + $0x25]] }
  0xca   : > { %3924 = sst [smem:[#allocation18_spill]] %s2723_s10  ;;  %v536_v30 = vadd.f32 %v535_v21, %v532_v20 }
  0xcb   : > { %s3927_s23 = sld [smem:[#allocation33_spill]] }
  0xcc   : > { %s3928_s11 = sld [smem:[#allocation19_spill]]  ;;  %v511_v19 = vstv %s3925_s3 }
  0xcd   : > { %3926 = sst [smem:[#allocation22_spill]] %s2727_s12  ;;  %v512_v29 = vmul.f32 %v2719_v61, %v511_v19 }
  0xce   : > { %s3929_s10 = sld [smem:[#allocation23_spill]] }
  0xcf   : > { %s2738_s6 = sld [smem:[#allocation3 + $0x26]]  ;;  %v513_v35 = vadd.f32 %v512_v29, %v509_v28  ;;  %v647_v28 = vstv %s2595_s7 }
  0xd0   : > { %s2741_s22 = sld [smem:[#allocation3 + $0x27]] }
  0xd1   : > { %s2744_s12 = sld [smem:[#allocation5 + $0x24]]  ;;  %v538_v24 = vstv %s3927_s23 }
  0xd2   : > { %s2747_s2 = sld [smem:[#allocation5 + $0x25]]  ;;  %v438_v25 = vstv %s3928_s11  ;;  %v539_v31 = vmul.f32 %v538_v24, %v2663_v27 }
  0xd3   : > { %s3933_s19 = sld [smem:[#allocation34_spill]]  ;;  %v439_v32 = vadd.f32 %v438_v25, %v436_v22  ;;  %v641_v22 = vmul.f32 %v640_v11, %v2600_v0 }
  0xd4   : > { %s2750_s20 = sld [smem:[#allocation5 + $0x26]]  ;;  %v476_v26 = vstv %s3929_s10  ;;  %v540_v38 = vadd.f32 %v539_v31, %v536_v30  ;;  %v679_v31 = vstv %s2632_s16 }
  0xd5   : > { %s3935_s5 = sld [smem:[#allocation28_spill]]  ;;  %v477_v33 = vadd.f32 %v476_v26, %v474_v23  ;;  %v440_v42 = vmax.f32 %v439_v32, 0.0  ;;  %v644_v23 = vmul.f32 %v2603_v1, %v643_v12  ;;  %v682_v32 = vstv %s2635_s30 }
  0xd6   : > { %3930 = sst [smem:[#allocation26_spill]] %s2741_s22 }
  0xd7   : > { %3931 = sst [smem:[#allocation32_spill]] %s2744_s12  ;;  %v478_v43 = vmax.f32 %v477_v33, 0.0 }
  0xd8   : > { %3932 = sst [smem:[#allocation27_spill]] %s2747_s2 }
  0xd9   : > { %s3936_s3 = sld [smem:[#allocation39_spill]]  ;;  %v542_v34 = vstv %s3933_s19 }
  0xda   : > { %3934 = sst [smem:[#allocation33_spill]] %s2750_s20  ;;  %v543_v39 = vmul.f32 %v2680_v37, %v542_v34 }
  0xdb   : > { %s2755_s22 = sld [smem:[#allocation5 + $0x27]]  ;;  %v515_v36 = vstv %s3935_s5 }
  0xdc   : > { %s3938_s12 = sld [smem:[#allocation40_spill]]  ;;  %v516_v47 = vadd.f32 %v515_v36, %v513_v35  ;;  %v544_v51 = vadd.f32 %v543_v39, %v540_v38 }
  0xdd   : > { %s2757_s21 = sld [smem:[#allocation7 + $0x9]] }
  0xde   : > { %s2760_s2 = sld [smem:[#allocation8 + $0x9]]  ;;  %v517_v57 = vmax.f32 %v516_v47, 0.0 }
  0xdf   : > { %s3941_s23 = sld [smem:[#allocation35_spill]]  ;;  %v562_v40 = vstv %s3936_s3 }
  0xe0   : > { %s3942_s20 = sld [smem:[#allocation20_spill]]  ;;  %v563_v49 = vmul.f32 %v562_v40, %v2600_v0  ;;  %v645_v40 = vadd.f32 %v644_v23, %v641_v22 }
  0xe1   : > { %3937 = sst [smem:[#allocation19_spill]] %s2755_s22 }
  0xe2   : > { %s3943_s10 = sld [smem:[#allocation24_spill]]  ;;  %v565_v41 = vstv %s3938_s12 }
  0xe3   : > { %3939 = sst [smem:[#allocation23_spill]] %s2757_s21  ;;  %v566_v50 = vmul.f32 %v2603_v1, %v565_v41  ;;  %v648_v41 = vmul.f32 %v2620_v8, %v647_v28 }
  0xe4   : > { %3940 = sst [smem:[#allocation34_spill]] %s2760_s2 }
  0xe5   : > { %s2763_s11 = sld [smem:[#allocation3 + $0x28]]  ;;  %v546_v44 = vstv %s3941_s23  ;;  %v567_v62 = vadd.f32 %v566_v50, %v563_v49  ;;  %v686_v50 = vstv %s2642_s17 }
  0xe6   : > { %s2765_s29 = sld [smem:[#allocation3 + $0x29]]  ;;  %v442_v45 = vstv %s3942_s20  ;;  %v547_v52 = vmul.f32 %v2698_v48, %v546_v44  ;;  %v680_v44 = vmul.f32 %v679_v31, %v2600_v0 }
  0xe7   : > { %s2768_s22 = sld [smem:[#allocation3 + $0x2a]]  ;;  %v443_v54 = vmul.f32 %v442_v45, %v440_v42  ;;  %v683_v45 = vmul.f32 %v2603_v1, %v682_v32 }
  0xe8   : > { %s3947_s21 = sld [smem:[#allocation41_spill]]  ;;  %v480_v46 = vstv %s3943_s10  ;;  %v548_v2 = vadd.f32 %v547_v52, %v544_v51 }
  0xe9   : > { %s2773_s2 = sld [smem:[#allocation3 + $0x2b]]  ;;  %v481_v55 = vmul.f32 %v480_v46, %v478_v43  ;;  %v651_v43 = vstv %s2597_s27 }
  0xea   : > { %s3948_s19 = sld [smem:[#allocation36_spill]] }
  0xeb   : > { %3944 = sst [smem:[#allocation28_spill]] %s2763_s11  ;;  %v482_v5 = vadd.f32 %v481_v55, %v443_v54  ;;  %v721_v54 = vstv %s2688_s18 }
  0xec   : > { %3945 = sst [smem:[#allocation39_spill]] %s2765_s29 }
  0xed   : > { %3946 = sst [smem:[#allocation40_spill]] %s2768_s22 }
  0xee   : > { %s2776_s15 = sld [smem:[#allocation5 + $0x28]]  ;;  %v569_v53 = vstv %s3947_s21 }
  0xef   : > { %s3949_s11 = sld [smem:[#allocation49_spill]]  ;;  %v570_v63 = vmul.f32 %v2620_v8, %v569_v53  ;;  %v718_v53 = vstv %s2684_s26 }
  0xf0   : > { %s3950_s5 = sld [smem:[#allocation50_spill]]  ;;  %v550_v56 = vstv %s3948_s19 }
  0xf1   : > { %s2780_s22 = sld [smem:[#allocation5 + $0x29]]  ;;  %v551_v3 = vmul.f32 %v2719_v61, %v550_v56  ;;  %v571_v13 = vadd.f32 %v570_v63, %v567_v62  ;;  %v684_v62 = vadd.f32 %v683_v45, %v680_v44  ;;  %v687_v63 = vmul.f32 %v2620_v8, %v686_v50 }
  0xf2   : > { %s3952_s29 = sld [smem:[#allocation29_spill]] }
  0xf3   : > { %s2784_s12 = sld [smem:[#allocation5 + $0x2a]]  ;;  %v552_v15 = vadd.f32 %v551_v3, %v548_v2  ;;  %v690_v3 = vstv %s2654_s8 }
  0xf4   : > { %s3954_s3 = sld [smem:[#allocation42_spill]] }
  0xf5   : > { %s2788_s23 = sld [smem:[#allocation5 + $0x2b]]  ;;  %v601_v58 = vstv %s3949_s11 }
  0xf6   : > { %s2791_s20 = sld [smem:[#allocation7 + $0xa]]  ;;  %v604_v59 = vstv %s3950_s5  ;;  %v602_v6 = vmul.f32 %v601_v58, %v2600_v0  ;;  %v652_v58 = vmul.f32 %v2638_v17, %v651_v43 }
  0xf7   : > { %3951 = sst [smem:[#allocation35_spill]] %s2780_s22  ;;  %v605_v7 = vmul.f32 %v2603_v1, %v604_v59 }
  0xf8   : > { %s3957_s10 = sld [smem:[#allocation51_spill]]  ;;  %v519_v60 = vstv %s3952_s29 }
  0xf9   : > { %3953 = sst [smem:[#allocation20_spill]] %s2784_s12  ;;  %v520_v9 = vmul.f32 %v519_v60, %v517_v57  ;;  %v606_v20 = vadd.f32 %v605_v7, %v602_v6  ;;  %v649_v57 = vadd.f32 %v648_v41, %v645_v40  ;;  %v655_v60 = vstv %s2607_s13 }
  0xfa   : > { %s2795_s22 = sld [smem:[#allocation8 + $0xa]]  ;;  %v573_v4 = vstv %s3954_s3  ;;  %v725_v7 = vstv %s2691_s25 }
  0xfb   : > { %3955 = sst [smem:[#allocation24_spill]] %s2788_s23  ;;  %v574_v14 = vmul.f32 %v2638_v17, %v573_v4  ;;  %v2827_v24 = vadd.f32 %v520_v9, %v482_v5  ;;  %v719_v4 = vmul.f32 %v718_v53, %v2600_v0  ;;  %v722_v5 = vmul.f32 %v2603_v1, %v721_v54 }
  0xfc   : > { %3956 = sst [smem:[#allocation41_spill]] %s2791_s20  ;;  %v757_v9 = vstv %s2730_s0 }
  0xfd   : > { %s2799_s21 = sld [smem:[#allocation3 + $0x2c]]  ;;  %v575_v29 = vadd.f32 %v574_v14, %v571_v13  ;;  %v653_v13 = vadd.f32 %v652_v58, %v649_v57  ;;  %v656_v14 = vmul.f32 %v655_v60, %v2663_v27  ;;  %v758_v22 = vmul.f32 %v757_v9, %v2600_v0 }
  0xfe   : > { %s3959_s19 = sld [smem:[#allocation37_spill]]  ;;  %v608_v10 = vstv %s3957_s10 }
  0xff   : > { %s3960_s20 = sld [smem:[#allocation43_spill]]  ;;  %v609_v21 = vmul.f32 %v2620_v8, %v608_v10  ;;  %v760_v10 = vstv %s2734_s1 }
 0x100   : > { %3958 = sst [smem:[#allocation36_spill]] %s2795_s22  ;;  %v761_v23 = vmul.f32 %v2603_v1, %v760_v10 }
 0x101   : > { %s2803_s23 = sld [smem:[#allocation3 + $0x2d]]  ;;  %v610_v38 = vadd.f32 %v609_v21, %v606_v20  ;;  %v723_v20 = vadd.f32 %v722_v5, %v719_v4  ;;  %v726_v21 = vmul.f32 %v2620_v8, %v725_v7 }
 0x102   : > { %s3961_s11 = sld [smem:[#allocation44_spill]]  ;;  %v762_v43 = vadd.f32 %v761_v23, %v758_v22 }
 0x103   : > { %s2807_s29 = sld [smem:[#allocation3 + $0x2e]]  ;;  %v727_v41 = vadd.f32 %v726_v21, %v723_v20 }
 0x104   : > { %s3963_s5 = sld [smem:[#allocation38_spill]]  ;;  %v554_v16 = vstv %s3959_s19 }
 0x105   : > { %s2812_s22 = sld [smem:[#allocation3 + $0x2f]]  ;;  %v577_v18 = vstv %s3960_s20  ;;  %v2839_v33 = vadd.f32 %v554_v16, %v552_v15  ;;  %v659_v15 = vstv %s2611_s24  ;;  %v688_v16 = vadd.f32 %v687_v63, %v684_v62 }
 0x106   : > { %s3964_s12 = sld [smem:[#allocation52_spill]]  ;;  %v578_v30 = vmul.f32 %v577_v18, %v2663_v27  ;;  %v691_v18 = vmul.f32 %v2638_v17, %v690_v3 }
 0x107   : > { %s2815_s3 = sld [smem:[#allocation5 + $0x2c]]  ;;  %v556_v45 = vmax.f32 %v2839_v33, 0.0 }
 0x108   : > { %v581_v19 = vstv %s3961_s11  ;;  %s3965_s28 = sld [smem:[#allocation45_spill]]  ;;  %v579_v46 = vadd.f32 %v578_v30, %v575_v29  ;;  %v729_v29 = vstv %s2695_s4  ;;  %v764_v30 = vstv %s2738_s6 }
 0x109   : > { %3962 = sst [smem:[#allocation49_spill]] %s2807_s29  ;;  %v582_v34 = vmul.f32 %v2680_v37, %v581_v19  ;;  %v694_v19 = vstv %s2657_s9  ;;  %v765_v44 = vmul.f32 %v2620_v8, %v764_v30 }
 0x10a   : > { %s2820_s29 = sld [smem:[#allocation5 + $0x2d]]  ;;  %v558_v25 = vstv %s3963_s5 }
 0x10b   : > { %s3966_s14 = sld [smem:[#allocation46_spill]]  ;;  %v583_v2 = vadd.f32 %v582_v34, %v579_v46  ;;  %v657_v34 = vadd.f32 %v656_v14, %v653_v13  ;;  %v766_v62 = vadd.f32 %v765_v44, %v762_v43 }
 0x10c   : > { %s2825_s10 = sld [smem:[#allocation5 + $0x2e]]  ;;  %v612_v26 = vstv %s3964_s12 }
 0x10d   : > { %s2832_s20 = sld [smem:[#allocation5 + $0x2f]]  ;;  %v613_v39 = vmul.f32 %v2638_v17, %v612_v26 }
 0x10e   : > { %s3968_s19 = sld [smem:[#allocation53_spill]]  ;;  %v585_v35 = vstv %s3965_s28 }
 0x10f   : > { %s2837_s11 = sld [smem:[#allocation7 + $0xb]]  ;;  %v586_v47 = vmul.f32 %v2698_v48, %v585_v35  ;;  %v614_v55 = vadd.f32 %v613_v39, %v610_v38  ;;  %v660_v35 = vmul.f32 %v2680_v37, %v659_v15  ;;  %v692_v38 = vadd.f32 %v691_v18, %v688_v16 }
 0x110   : > { %s2844_s12 = sld [smem:[#allocation8 + $0xb]]  ;;  %v695_v39 = vmul.f32 %v694_v19, %v2663_v27  ;;  %v559_v19 = vmul.f32 %v558_v25, %v556_v45 }
 0x111   : > { %v589_v36 = vstv %s3966_s14  ;;  %s3971_s7 = sld [smem:[#allocation47_spill]]  ;;  %v587_v26 = vadd.f32 %v586_v47, %v583_v2  ;;  %v661_v54 = vadd.f32 %v660_v35, %v657_v34 }
 0x112   : > { %s2848_s16 = sld [smem:[#allocation3 + $0x30]]  ;;  %v2858_v49 = vmul.f32 %v2719_v61, %v589_v36  ;;  %v696_v33 = vadd.f32 %v695_v39, %v692_v38  ;;  %v560_v39 = vadd.f32 %v559_v19, %v2827_v24 }
 0x113   : > { %3967 = sst [smem:[#allocation50_spill]] %s2832_s20 }
 0x114   : > { %s3972_s20 = sld [smem:[#allocation54_spill]]  ;;  %v616_v42 = vstv %s3968_s19  ;;  %v591_v46 = vadd.f32 %v2858_v49, %v587_v26 }
 0x115   : > { %3969 = sst [smem:[#allocation29_spill]] %s2837_s11  ;;  %v617_v56 = vmul.f32 %v616_v42, %v2663_v27  ;;  %v730_v42 = vmul.f32 %v2638_v17, %v729_v29 }
 0x116   : > { %3970 = sst [smem:[#allocation42_spill]] %s2844_s12 }
 0x117   : > { %s2854_s30 = sld [smem:[#allocation3 + $0x31]]  ;;  %v593_v51 = vstv %s3971_s7  ;;  %v618_v11 = vadd.f32 %v617_v56, %v614_v55  ;;  %v731_v58 = vadd.f32 %v730_v42, %v727_v41 }
 0x118   : > { %s3973_s28 = sld [smem:[#allocation48_spill]]  ;;  %v594_v2 = vadd.f32 %v593_v51, %v591_v46 }
 0x119   : > { %s2861_s14 = sld [smem:[#allocation3 + $0x32]] }
 0x11a   : > { %v620_v52 = vstv %s3972_s20  ;;  %s2867_s27 = sld [smem:[#allocation3 + $0x33]]  ;;  %v595_v20 = vmax.f32 %v594_v2, 0.0 }
 0x11b   : > { %s2871_s19 = sld [smem:[#allocation5 + $0x30]]  ;;  %v621_v6 = vmul.f32 %v2680_v37, %v620_v52 }
 0x11c   : > { %s3974_s17 = sld [smem:[#allocation55_spill]] }
 0x11d   : > { %s2876_s26 = sld [smem:[#allocation5 + $0x31]]  ;;  %v622_v31 = vadd.f32 %v621_v6, %v618_v11 }
 0x11e   : > { %v597_v59 = vstv %s3973_s28  ;;  %s2881_s18 = sld [smem:[#allocation5 + $0x32]] }
 0x11f   : > { %s2887_s13 = sld [smem:[#allocation5 + $0x33]]  ;;  %v598_v42 = vmul.f32 %v597_v59, %v595_v20  ;;  %v835_v20 = vstv %s2799_s21 }
 0x120   : > { %s3978_s20 = sld [smem:[#allocation56_spill]] }
 0x121   : > { %s2891_s8 = sld [smem:[#allocation7 + $0xc]] }
 0x122   : > { %v624_v12 = vstv %s3974_s17  ;;  %s2896_s25 = sld [smem:[#allocation8 + $0xc]] }
 0x123   : > { %3975 = sst [smem:[#allocation51_spill]] %s2876_s26  ;;  %v625_v32 = vmul.f32 %v2698_v48, %v624_v12 }
 0x124   : > { %3976 = sst [smem:[#allocation37_spill]] %s2881_s18 }
 0x125   : > { %3977 = sst [smem:[#allocation43_spill]] %s2887_s13  ;;  %v626_v52 = vadd.f32 %v625_v32, %v622_v31 }
 0x126   : > { %s3981_s1 = sld [smem:[#allocation60_spill]]  ;;  %v628_v28 = vstv %s3978_s20 }
 0x127   : > { %3979 = sst [smem:[#allocation44_spill]] %s2891_s8  ;;  %v629_v53 = vmul.f32 %v2719_v61, %v628_v28 }
 0x128   : > { %3980 = sst [smem:[#allocation38_spill]] %s2896_s25 }
 0x129   : > { %s3982_s0 = sld [smem:[#allocation65_spill]]  ;;  %v630_v6 = vadd.f32 %v629_v53, %v626_v52  ;;  %v807_v52 = vstv %s2773_s2 }
 0x12a   : > { %s2901_s17 = sld [smem:[#allocation3 + $0x34]] }
 0x12b   : > { %s2906_s24 = sld [smem:[#allocation3 + $0x35]] }
 0x12c   : > { %s3983_s9 = sld [smem:[#allocation30_spill]]  ;;  %v663_v36 = vstv %s3981_s1 }
 0x12d   : > { %s3984_s25 = sld [smem:[#allocation26_spill]]  ;;  %v664_v55 = vmul.f32 %v2698_v48, %v663_v36 }
 0x12e   : > { %s2910_s8 = sld [smem:[#allocation3 + $0x36]] }
 0x12f   : > { %v698_v40 = vstv %s3982_s0  ;;  %s2915_s20 = sld [smem:[#allocation3 + $0x37]]  ;;  %v665_v7 = vadd.f32 %v664_v55, %v661_v54 }
 0x130   : > { %s3985_s4 = sld [smem:[#allocation61_spill]]  ;;  %v699_v49 = vmul.f32 %v2680_v37, %v698_v40 }
 0x131   : > { %s3986_s6 = sld [smem:[#allocation66_spill]] }
 0x132   : > { %s2919_s13 = sld [smem:[#allocation5 + $0x34]]  ;;  %v733_v47 = vstv %s3983_s9  ;;  %v700_v11 = vadd.f32 %v699_v49, %v696_v33  ;;  %v808_v49 = vmul.f32 %v2638_v17, %v807_v52 }
 0x133   : > { %v768_v50 = vstv %s3984_s25  ;;  %s2925_s1 = sld [smem:[#allocation5 + $0x35]]  ;;  %v734_v60 = vmul.f32 %v733_v47, %v2663_v27 }
 0x134   : > { %s3989_s0 = sld [smem:[#allocation57_spill]]  ;;  %v769_v63 = vmul.f32 %v2638_v17, %v768_v50 }
 0x135   : > { %s3990_s18 = sld [smem:[#allocation31_spill]]  ;;  %v735_v14 = vadd.f32 %v734_v60, %v731_v58 }
 0x136   : > { %s3991_s26 = sld [smem:[#allocation32_spill]]  ;;  %v667_v56 = vstv %s3985_s4  ;;  %v770_v16 = vadd.f32 %v769_v63, %v766_v62  ;;  %v811_v62 = vstv %s2776_s15 }
 0x137   : > { %s2929_s12 = sld [smem:[#allocation5 + $0x36]]  ;;  %v702_v57 = vstv %s3986_s6  ;;  %v668_v9 = vmul.f32 %v2719_v61, %v667_v56 }
 0x138   : > { %3987 = sst [smem:[#allocation52_spill]] %s2919_s13  ;;  %v703_v12 = vmul.f32 %v2698_v48, %v702_v57  ;;  %v599_v57 = vadd.f32 %v598_v42, %v560_v39  ;;  %v877_v39 = vstv %s2854_s30 }
 0x139   : > { %3988 = sst [smem:[#allocation45_spill]] %s2925_s1  ;;  %v669_v30 = vadd.f32 %v668_v9, %v665_v7  ;;  %v812_v9 = vmul.f32 %v811_v62, %v2663_v27 }
 0x13a   : > { %s3993_s9 = sld [smem:[#allocation67_spill]]  ;;  %v632_v3 = vstv %s3989_s0  ;;  %v704_v31 = vadd.f32 %v703_v12, %v700_v11 }
 0x13b   : > { %s2934_s25 = sld [smem:[#allocation5 + $0x37]]  ;;  %v737_v4 = vstv %s3990_s18  ;;  %v633_v23 = vadd.f32 %v632_v3, %v630_v6 }
 0x13c   : > { %s3995_s1 = sld [smem:[#allocation28_spill]]  ;;  %v772_v5 = vstv %s3991_s26  ;;  %v738_v15 = vmul.f32 %v2680_v37, %v737_v4 }
 0x13d   : > { %3992 = sst [smem:[#allocation46_spill]] %s2929_s12  ;;  %v773_v18 = vmul.f32 %v772_v5, %v2663_v27  ;;  %v634_v46 = vmax.f32 %v633_v23, 0.0 }
 0x13e   : > { %s3996_s13 = sld [smem:[#allocation39_spill]]  ;;  %v739_v34 = vadd.f32 %v738_v15, %v735_v14 }
 0x13f   : > { %s2938_s11 = sld [smem:[#allocation7 + $0xd]]  ;;  %v774_v36 = vadd.f32 %v773_v18, %v770_v16 }
 0x140   : > { %s2945_s4 = sld [smem:[#allocation8 + $0xd]]  ;;  %v706_v10 = vstv %s3993_s9 }
 0x141   : > { %3994 = sst [smem:[#allocation53_spill]] %s2934_s25  ;;  %v707_v25 = vmul.f32 %v2719_v61, %v706_v10 }
 0x142   : > { %s3999_s6 = sld [smem:[#allocation21_spill]]  ;;  %v796_v51 = vstv %s3995_s1 }
 0x143   : > { %s4000_s25 = sld [smem:[#allocation27_spill]]  ;;  %v797_v28 = vmul.f32 %v796_v51, %v2600_v0  ;;  %v708_v50 = vadd.f32 %v707_v25, %v704_v31  ;;  %v836_v31 = vmul.f32 %v835_v20, %v2600_v0 }
 0x144   : > { %s2949_s12 = sld [smem:[#allocation3 + $0x38]]  ;;  %v799_v13 = vstv %s3996_s13 }
 0x145   : > { %3997 = sst [smem:[#allocation47_spill]] %s2938_s11  ;;  %v800_v29 = vmul.f32 %v2603_v1, %v799_v13 }
 0x146   : > { %3998 = sst [smem:[#allocation54_spill]] %s2945_s4 }
 0x147   : > { %s4001_s11 = sld [smem:[#allocation62_spill]]  ;;  %v801_v44 = vadd.f32 %v800_v29, %v797_v28 }
 0x148   : > { %s2954_s7 = sld [smem:[#allocation3 + $0x39]]  ;;  %v741_v21 = vstv %s3999_s6 }
 0x149   : > { %s4002_s26 = sld [smem:[#allocation40_spill]]  ;;  %v776_v22 = vstv %s4000_s25  ;;  %v742_v35 = vmul.f32 %v2698_v48, %v741_v21  ;;  %v838_v21 = vstv %s2803_s23 }
 0x14a   : > { %s2958_s18 = sld [smem:[#allocation3 + $0x3a]]  ;;  %v777_v38 = vmul.f32 %v2680_v37, %v776_v22  ;;  %v839_v25 = vmul.f32 %v2603_v1, %v838_v21  ;;  %v889_v21 = vstv %s2871_s19 }
 0x14b   : > { %s2964_s0 = sld [smem:[#allocation3 + $0x3b]]  ;;  %v743_v24 = vadd.f32 %v742_v35, %v739_v34 }
 0x14c   : > { %s4003_s13 = sld [smem:[#allocation25_spill]]  ;;  %v778_v54 = vadd.f32 %v777_v38, %v774_v36  ;;  %v874_v38 = vstv %s2848_s16 }
 0x14d   : > { %v671_v26 = vstv %s4001_s11  ;;  %s4004_s1 = sld [smem:[#allocation33_spill]]  ;;  %v875_v52 = vmul.f32 %v874_v38, %v2600_v0 }
 0x14e   : > { %s2969_s9 = sld [smem:[#allocation5 + $0x38]]  ;;  %v672_v47 = vadd.f32 %v671_v26, %v669_v30 }
 0x14f   : > { %s4006_s4 = sld [smem:[#allocation58_spill]]  ;;  %v803_v32 = vstv %s4002_s26 }
 0x150   : > { %s2973_s5 = sld [smem:[#allocation5 + $0x39]]  ;;  %v804_v45 = vmul.f32 %v2620_v8, %v803_v32  ;;  %v673_v60 = vmax.f32 %v672_v47, 0.0 }
 0x151   : > { %s2977_s11 = sld [smem:[#allocation5 + $0x3a]] }
 0x152   : > { %v745_v40 = vstv %s4003_s13  ;;  %s2982_s25 = sld [smem:[#allocation5 + $0x3b]]  ;;  %v805_v33 = vadd.f32 %v804_v45, %v801_v44  ;;  %v840_v45 = vadd.f32 %v839_v25, %v836_v31  ;;  %v959_v25 = vstv %s2958_s18 }
 0x153   : > { %v780_v41 = vstv %s4004_s1  ;;  %s4010_s6 = sld [smem:[#allocation68_spill]]  ;;  %v746_v53 = vmul.f32 %v2719_v61, %v745_v40 }
 0x154   : > { %4005 = sst [smem:[#allocation48_spill]] %s2969_s9  ;;  %v781_v59 = vmul.f32 %v2698_v48, %v780_v41  ;;  %v809_v7 = vadd.f32 %v808_v49, %v805_v33 }
 0x155   : > { %s4011_s26 = sld [smem:[#allocation19_spill]]  ;;  %v636_v43 = vstv %s4006_s4  ;;  %v747_v2 = vadd.f32 %v746_v53, %v743_v24  ;;  %v878_v24 = vmul.f32 %v2603_v1, %v877_v39  ;;  %v881_v53 = vstv %s2861_s14 }
 0x156   : > { %4007 = sst [smem:[#allocation55_spill]] %s2973_s5  ;;  %v637_v58 = vmul.f32 %v636_v43, %v634_v46  ;;  %v782_v3 = vadd.f32 %v781_v59, %v778_v54  ;;  %v813_v18 = vadd.f32 %v812_v9, %v809_v7  ;;  %v890_v39 = vmul.f32 %v889_v21, %v2663_v27 }
 0x157   : > { %4008 = sst [smem:[#allocation56_spill]] %s2977_s11 }
 0x158   : > { %4009 = sst [smem:[#allocation60_spill]] %s2982_s25  ;;  %v638_v10 = vadd.f32 %v637_v58, %v599_v57  ;;  %v850_v58 = vstv %s2815_s3 }
 0x159   : > { %s2988_s5 = sld [smem:[#allocation7 + $0xe]]  ;;  %v710_v55 = vstv %s4010_s6  ;;  %v851_v9 = vmul.f32 %v850_v58, %v2663_v27 }
 0x15a   : > { %s2991_s11 = sld [smem:[#allocation8 + $0xe]]  ;;  %v711_v63 = vadd.f32 %v710_v55, %v708_v50  ;;  %v846_v50 = vstv %s2812_s22  ;;  %v913_v55 = vstv %s2901_s17 }
 0x15b   : > { %s2995_s28 = sld [smem:[#allocation3 + $0x3c]]  ;;  %v784_v56 = vstv %s4011_s26  ;;  %v847_v57 = vmul.f32 %v2638_v17, %v846_v50 }
 0x15c   : > { %s4014_s4 = sld [smem:[#allocation63_spill]]  ;;  %v785_v4 = vmul.f32 %v2719_v61, %v784_v56  ;;  %v712_v51 = vmax.f32 %v711_v63, 0.0  ;;  %v916_v56 = vstv %s2906_s24  ;;  %v879_v63 = vadd.f32 %v878_v24, %v875_v52 }
 0x15d   : > { %s4015_s13 = sld [smem:[#allocation18_spill]]  ;;  %v963_v24 = vstv %s2964_s0 }
 0x15e   : > { %s2999_s1 = sld [smem:[#allocation3 + $0x3d]]  ;;  %v786_v14 = vadd.f32 %v785_v4, %v782_v3  ;;  %v854_v3 = vstv %s2820_s29  ;;  %v885_v4 = vstv %s2867_s27  ;;  %v964_v58 = vmul.f32 %v2638_v17, %v963_v24 }
 0x15f   : > { %4012 = sst [smem:[#allocation65_spill]] %s2988_s5 }
 0x160   : > { %4013 = sst [smem:[#allocation30_spill]] %s2991_s11 }
 0x161   : > { %s3002_s2 = sld [smem:[#allocation3 + $0x3e]] }
 0x162   : > { %s4017_s11 = sld [smem:[#allocation35_spill]]  ;;  %v675_v5 = vstv %s4014_s4 }
 0x163   : > { %s3005_s5 = sld [smem:[#allocation3 + $0x3f]]  ;;  %v749_v6 = vstv %s4015_s13  ;;  %v676_v12 = vmul.f32 %v675_v5, %v673_v60  ;;  %v914_v5 = vmul.f32 %v913_v55, %v2600_v0 }
 0x164   : > { %s4019_s6 = sld [smem:[#allocation17_spill]]  ;;  %v750_v13 = vadd.f32 %v749_v6, %v747_v2  ;;  %v882_v2 = vmul.f32 %v2620_v8, %v881_v53  ;;  %v917_v6 = vmul.f32 %v2603_v1, %v916_v56 }
 0x165   : > { %s3008_s26 = sld [smem:[#allocation5 + $0x3c]]  ;;  %v677_v23 = vadd.f32 %v676_v12, %v638_v10  ;;  %v858_v10 = vstv %s2825_s10 }
 0x166   : > { %s4021_s25 = sld [smem:[#allocation23_spill]]  ;;  %v751_v28 = vmax.f32 %v750_v13, 0.0  ;;  %v952_v13 = vstv %s2949_s12  ;;  %v859_v20 = vmul.f32 %v2698_v48, %v858_v10 }
 0x167   : > { %4016 = sst [smem:[#allocation26_spill]] %s3002_s2 }
 0x168   : > { %s3012_s9 = sld [smem:[#allocation5 + $0x3d]]  ;;  %v815_v11 = vstv %s4017_s11 }
 0x169   : > { %4018 = sst [smem:[#allocation61_spill]] %s3005_s5  ;;  %v816_v19 = vmul.f32 %v2680_v37, %v815_v11  ;;  %v920_v11 = vstv %s2910_s8 }
 0x16a   : > { %s3015_s15 = sld [smem:[#allocation5 + $0x3e]]  ;;  %v714_v15 = vstv %s4019_s6 }
 0x16b   : > { %4020 = sst [smem:[#allocation66_spill]] %s3008_s26  ;;  %v715_v26 = vmul.f32 %v714_v15, %v712_v51  ;;  %v817_v32 = vadd.f32 %v816_v19, %v813_v18  ;;  %v883_v18 = vadd.f32 %v882_v2, %v879_v63  ;;  %v886_v19 = vmul.f32 %v2638_v17, %v885_v4 }
 0x16c   : > { %s4024_s5 = sld [smem:[#allocation20_spill]]  ;;  %v788_v16 = vstv %s4021_s25 }
 0x16d   : > { %s3018_s2 = sld [smem:[#allocation5 + $0x3f]]  ;;  %v789_v29 = vadd.f32 %v788_v16, %v786_v14  ;;  %v716_v40 = vadd.f32 %v715_v26, %v677_v23  ;;  %v955_v14 = vstv %s2954_s7  ;;  %v855_v16 = vmul.f32 %v2680_v37, %v854_v3 }
 0x16e   : > { %4022 = sst [smem:[#allocation57_spill]] %s3012_s9  ;;  %v921_v23 = vmul.f32 %v2620_v8, %v920_v11  ;;  %v887_v38 = vadd.f32 %v886_v19, %v883_v18 }
 0x16f   : > { %s3020_s4 = sld [smem:[#allocation7 + $0xf]]  ;;  %v790_v42 = vmax.f32 %v789_v29, 0.0  ;;  %v953_v29 = vmul.f32 %v952_v13, %v2600_v0 }
 0x170   : > { %4023 = sst [smem:[#allocation31_spill]] %s3015_s15 }
 0x171   : > { %s4026_s13 = sld [smem:[#allocation22_spill]] }
 0x172   : > { %s3024_s9 = sld [smem:[#allocation8 + $0xf]]  ;;  %v819_v22 = vstv %s4024_s5 }
 0x173   : > { %4025 = sst [smem:[#allocation32_spill]] %s3018_s2  ;;  %v820_v34 = vmul.f32 %v2698_v48, %v819_v22  ;;  %v918_v22 = vadd.f32 %v917_v6, %v914_v5 }
 0x174   : > { %s4028_s15 = sld [smem:[#allocation24_spill]] }
 0x175   : > { %s4029_s11 = sld [smem:[#allocation49_spill]]  ;;  %v821_v47 = vadd.f32 %v820_v34, %v817_v32  ;;  %v991_v32 = vstv %s2995_s28  ;;  %v994_v34 = vstv %s2999_s1 }
 0x176   : > { %s3029_s26 = sld [smem:[#allocation3 + $0x40]] }
 0x177   : > { %s3032_s2 = sld [smem:[#allocation3 + $0x41]]  ;;  %v753_v30 = vstv %s4026_s13 }
 0x178   : > { %4027 = sst [smem:[#allocation67_spill]] %s3024_s9  ;;  %v754_v41 = vmul.f32 %v753_v30, %v751_v28  ;;  %v924_v28 = vstv %s2915_s20  ;;  %v956_v30 = vmul.f32 %v2603_v1, %v955_v14 }
 0x179   : > { %s3034_s25 = sld [smem:[#allocation3 + $0x42]] }
 0x17a   : > { %s4030_s6 = sld [smem:[#allocation34_spill]]  ;;  %v823_v35 = vstv %s4028_s15  ;;  %v755_v54 = vadd.f32 %v754_v41, %v716_v40  ;;  %v922_v41 = vadd.f32 %v921_v23, %v918_v22 }
 0x17b   : > { %s3039_s23 = sld [smem:[#allocation3 + $0x43]]  ;;  %v842_v36 = vstv %s4029_s11  ;;  %v824_v44 = vmul.f32 %v2719_v61, %v823_v35 }
 0x17c   : > { %s3044_s21 = sld [smem:[#allocation5 + $0x40]]  ;;  %v843_v46 = vmul.f32 %v2620_v8, %v842_v36  ;;  %v1030_v55 = vstv %s3029_s26 }
 0x17d   : > { %s3048_s5 = sld [smem:[#allocation5 + $0x41]]  ;;  %v825_v60 = vadd.f32 %v824_v44, %v821_v47  ;;  %v957_v44 = vadd.f32 %v956_v30, %v953_v29  ;;  %v995_v47 = vmul.f32 %v2603_v1, %v994_v34 }
 0x17e   : > { %s3050_s13 = sld [smem:[#allocation5 + $0x42]]  ;;  %v844_v49 = vadd.f32 %v843_v46, %v840_v45  ;;  %v960_v45 = vmul.f32 %v2620_v8, %v959_v25  ;;  %v992_v46 = vmul.f32 %v991_v32, %v2600_v0  ;;  %v1033_v0 = vstv %s3032_s2 }
 0x17f   : > { %s4031_s15 = sld [smem:[#allocation41_spill]]  ;;  %v1037_v11 = vstv %s3034_s25 }
 0x180   : > { %v792_v43 = vstv %s4030_s6  ;;  %s3055_s11 = sld [smem:[#allocation5 + $0x43]]  ;;  %v848_v12 = vadd.f32 %v847_v57, %v844_v49  ;;  %v961_v57 = vadd.f32 %v960_v45, %v957_v44 }
 0x181   : > { %s4032_s16 = sld [smem:[#allocation36_spill]]  ;;  %v793_v59 = vmul.f32 %v792_v43, %v790_v42  ;;  %v925_v42 = vmul.f32 %v2638_v17, %v924_v28  ;;  %v1041_v25 = vstv %s3039_s23 }
 0x182   : > { %s3060_s30 = sld [smem:[#allocation7 + $0x10]]  ;;  %v852_v31 = vadd.f32 %v851_v9, %v848_v12 }
 0x183   : > { %s3063_s6 = sld [smem:[#allocation8 + $0x10]]  ;;  %v3084_v7 = vadd.f32 %v793_v59, %v755_v54  ;;  %v891_v54 = vadd.f32 %v890_v39, %v887_v38  ;;  %v926_v56 = vadd.f32 %v925_v42, %v922_v41 }
 0x184   : > { %s3067_s9 = sld [smem:[#allocation3 + $0x44]]  ;;  %v856_v52 = vadd.f32 %v855_v16, %v852_v31 }
 0x185   : > { %v827_v33 = vstv %s4031_s15  ;;  %s3072_s22 = sld [smem:[#allocation3 + $0x45]] }
 0x186   : > { %s4034_s14 = sld [smem:[#allocation50_spill]]  ;;  %v3096_v15 = vadd.f32 %v827_v33, %v825_v60  ;;  %v996_v60 = vadd.f32 %v995_v47, %v992_v46  ;;  %v860_v17 = vadd.f32 %v859_v20, %v856_v52  ;;  %v1045_v52 = vstv %s3044_s21 }
 0x187   : > { %v831_v62 = vstv %s4032_s16  ;;  %s3076_s17 = sld [smem:[#allocation3 + $0x46]] }
 0x188   : > { %s3082_s24 = sld [smem:[#allocation3 + $0x47]]  ;;  %v829_v50 = vmax.f32 %v3096_v15, 0.0  ;;  %v965_v15 = vadd.f32 %v964_v58, %v961_v57 }
 0x189   : > { %4033 = sst [smem:[#allocation28_spill]] %s3063_s6 }
 0x18a   : > { %s3089_s3 = sld [smem:[#allocation5 + $0x44]]  ;;  %v832_v32 = vmul.f32 %v831_v62, %v829_v50 }
 0x18b   : > { %s3094_s29 = sld [smem:[#allocation5 + $0x45]] }
 0x18c   : > { %v862_v51 = vstv %s4034_s14  ;;  %s3100_s10 = sld [smem:[#allocation5 + $0x46]] }
 0x18d   : > { %s4036_s27 = sld [smem:[#allocation29_spill]]  ;;  %v3108_v26 = vmul.f32 %v2719_v61, %v862_v51 }
 0x18e   : > { %s4037_s8 = sld [smem:[#allocation42_spill]] }
 0x18f   : > { %s3105_s12 = sld [smem:[#allocation5 + $0x47]] }
 0x190   : > { %s4039_s7 = sld [smem:[#allocation51_spill]] }
 0x191   : > { %s4040_s15 = sld [smem:[#allocation52_spill]] }
 0x192   : > { %4035 = sst [smem:[#allocation39_spill]] %s3100_s10 }
 0x193   : > { %s3113_s14 = sld [smem:[#allocation7 + $0x11]]  ;;  %v866_v35 = vstv %s4036_s27 }
 0x194   : > { %s3118_s19 = sld [smem:[#allocation8 + $0x11]]  ;;  %v870_v36 = vstv %s4037_s8 }
 0x195   : > { %4038 = sst [smem:[#allocation21_spill]] %s3105_s12 }
 0x196   : > { %s4043_s6 = sld [smem:[#allocation26_spill]]  ;;  %v893_v40 = vstv %s4039_s7 }
 0x197   : > { %s3123_s20 = sld [smem:[#allocation3 + $0x48]]  ;;  %v928_v43 = vstv %s4040_s15  ;;  %v894_v59 = vmul.f32 %v2680_v37, %v893_v40 }
 0x198   : > { %s3128_s18 = sld [smem:[#allocation3 + $0x49]]  ;;  %v929_v33 = vmul.f32 %v928_v43, %v2663_v27 }
 0x199   : > { %4041 = sst [smem:[#allocation27_spill]] %s3113_s14  ;;  %v895_v10 = vadd.f32 %v894_v59, %v891_v54  ;;  %v1069_v54 = vstv %s3067_s9  ;;  %v1072_v59 = vstv %s3072_s22 }
 0x19a   : > { %4042 = sst [smem:[#allocation62_spill]] %s3118_s19  ;;  %v930_v51 = vadd.f32 %v929_v33, %v926_v56 }
 0x19b   : > { %s4044_s28 = sld [smem:[#allocation37_spill]] }
 0x19c   : > { %s4045_s1 = sld [smem:[#allocation45_spill]]  ;;  %v998_v53 = vstv %s4043_s6 }
 0x19d   : > { %s3133_s19 = sld [smem:[#allocation3 + $0x4a]]  ;;  %v999_v63 = vmul.f32 %v2620_v8, %v998_v53 }
 0x19e   : > { %s3138_s7 = sld [smem:[#allocation3 + $0x4b]] }
 0x19f   : > { %s4046_s15 = sld [smem:[#allocation48_spill]]  ;;  %v1000_v18 = vadd.f32 %v999_v63, %v996_v60 }
 0x1a0   : > { %s4047_s14 = sld [smem:[#allocation61_spill]] }
 0x1a1   : > { %s4048_s12 = sld [smem:[#allocation59_spill]]  ;;  %v897_v1 = vstv %s4044_s28 }
 0x1a2   : > { %s3143_s10 = sld [smem:[#allocation5 + $0x48]]  ;;  %v932_v49 = vstv %s4045_s1  ;;  %v898_v8 = vmul.f32 %v2698_v48, %v897_v1 }
 0x1a3   : > { %s3148_s0 = sld [smem:[#allocation5 + $0x49]]  ;;  %v933_v13 = vmul.f32 %v2680_v37, %v932_v49 }
 0x1a4   : > { %s4050_s6 = sld [smem:[#allocation43_spill]]  ;;  %v899_v30 = vadd.f32 %v898_v8, %v895_v10 }
 0x1a5   : > { %s3152_s26 = sld [smem:[#allocation5 + $0x4a]]  ;;  %v967_v2 = vstv %s4046_s15  ;;  %v934_v34 = vadd.f32 %v933_v13, %v930_v51 }
 0x1a6   : > { %s4052_s2 = sld [smem:[#allocation46_spill]]  ;;  %v1002_v3 = vstv %s4047_s14  ;;  %v968_v16 = vmul.f32 %v967_v2, %v2663_v27  ;;  %v864_v27 = vadd.f32 %v3108_v26, %v860_v17  ;;  %v1076_v17 = vstv %s3076_s17 }
 0x1a7   : > { %v3157_v4 = vld [vmem:[%s4048_s12] sm:$0x3]  ;;  %v3161_v6 = vld [vmem:[%s4048_s12 + $0x2] sm:$0x3]  ;;  %s3164_s28 = sld [smem:[#allocation5 + $0x4b]] }
 0x1a8   : > { %v1031_v5 = vmul.f32 %v3157_v4, %v1030_v55  ;;  %v1034_v9 = vmul.f32 %v3161_v6, %v1033_v0  ;;  %s4054_s1 = sld [smem:[#allocation55_spill]]  ;;  %v3177_v19 = vld [vmem:[%s4048_s12 + $0x6] sm:$0x3]  ;;  %v3185_v28 = vld [vmem:[%s4048_s12 + $0x4] sm:$0x3]  ;;  %v969_v26 = vadd.f32 %v968_v16, %v965_v15  ;;  %v867_v47 = vadd.f32 %v866_v35, %v864_v27 }
 0x1a9   : > { %4049 = sst [smem:[#allocation40_spill]] %s3148_s0  ;;  %v1003_v20 = vmul.f32 %v3177_v19, %v1002_v3  ;;  %v1038_v29 = vmul.f32 %v3185_v28, %v1037_v11  ;;  %v1042_v46 = vmul.f32 %v3177_v19, %v1041_v25  ;;  %v1070_v63 = vmul.f32 %v3157_v4, %v1069_v54 }
 0x1aa   : > { %s4055_s0 = sld [smem:[#allocation66_spill]]  ;;  %v901_v12 = vstv %s4050_s6  ;;  %v1035_v23 = vadd.f32 %v1034_v9, %v1031_v5  ;;  %v868_v60 = vmax.f32 %v867_v47, 0.0  ;;  %v1073_v2 = vmul.f32 %v3161_v6, %v1072_v59 }
 0x1ab   : > { %4051 = sst [smem:[#allocation25_spill]] %s3152_s26  ;;  %v902_v31 = vmul.f32 %v2719_v61, %v901_v12  ;;  %v1004_v41 = vadd.f32 %v1003_v20, %v1000_v18  ;;  %v833_v16 = vadd.f32 %v832_v32, %v3084_v7  ;;  %v1077_v20 = vmul.f32 %v3185_v28, %v1076_v17 }
 0x1ac   : > { %s3168_s14 = sld [smem:[#allocation7 + $0x12]]  ;;  %v936_v14 = vstv %s4052_s2  ;;  %v1039_v45 = vadd.f32 %v1038_v29, %v1035_v23  ;;  %v1074_v18 = vadd.f32 %v1073_v2, %v1070_v63  ;;  %v1080_v29 = vstv %s3082_s24 }
 0x1ad   : > { %4053 = sst [smem:[#allocation33_spill]] %s3164_s28  ;;  %v937_v38 = vmul.f32 %v2698_v48, %v936_v14  ;;  %v1022_v47 = vstv %s3020_s4 }
 0x1ae   : > { %s3173_s15 = sld [smem:[#allocation8 + $0x12]]  ;;  %v971_v21 = vstv %s4054_s1  ;;  %v1043_v57 = vadd.f32 %v1042_v46, %v1039_v45 }
 0x1af   : > { %s4058_s25 = sld [smem:[#allocation53_spill]]  ;;  %v972_v40 = vmul.f32 %v2680_v37, %v971_v21  ;;  %v903_v37 = vadd.f32 %v902_v31, %v899_v30  ;;  %v938_v24 = vadd.f32 %v937_v38, %v934_v34  ;;  %v871_v21 = vmul.f32 %v870_v36, %v868_v60 }
 0x1b0   : > { %s3180_s28 = sld [smem:[#allocation3 + $0x4c]]  ;;  %v1006_v22 = vstv %s4055_s0  ;;  %v1057_v38 = vstv %s3055_s11  ;;  %v1115_v60 = vstv %s3133_s19 }
 0x1b1   : > { %s4059_s6 = sld [smem:[#allocation64_spill]]  ;;  %v973_v55 = vadd.f32 %v972_v40, %v969_v26  ;;  %v1081_v26 = vmul.f32 %v3177_v19, %v1080_v29  ;;  %v872_v40 = vadd.f32 %v871_v21, %v833_v16 }
 0x1b2   : > { %4056 = sst [smem:[#allocation58_spill]] %s3168_s14 }
 0x1b3   : > { %s3188_s2 = sld [smem:[#allocation3 + $0x4d]] }
 0x1b4   : > { %4057 = sst [smem:[#allocation68_spill]] %s3173_s15 }
 0x1b5   : > { %s4060_s15 = sld [smem:[#allocation56_spill]]  ;;  %v940_v39 = vstv %s4058_s25 }
 0x1b6   : > { %s4061_s14 = sld [smem:[#allocation57_spill]]  ;;  %v941_v53 = vmul.f32 %v2719_v61, %v940_v39  ;;  %v1078_v39 = vadd.f32 %v1077_v20, %v1074_v18  ;;  %v1147_v16 = vstv %s3180_s28 }
 0x1b7   : > { %s3193_s26 = sld [smem:[#allocation3 + $0x4e]]  ;;  %v3203_v42 = vld [vmem:[%s4059_s6] sm:$0x3]  ;;  %v3226_v35 = vld [vmem:[%s4059_s6 + $0x2] sm:$0x3] }
 0x1b8   : > { %s4062_s0 = sld [smem:[#allocation44_spill]]  ;;  %v1007_v43 = vmul.f32 %v3203_v42, %v1006_v22  ;;  %v1046_v58 = vmul.f32 %v3203_v42, %v1045_v52  ;;  %v942_v5 = vadd.f32 %v941_v53, %v938_v24  ;;  %v3247_v12 = vld [vmem:[%s4059_s6 + $0x4] sm:$0x3]  ;;  %v3268_v7 = vld [vmem:[%s4059_s6 + $0x6] sm:$0x3]  ;;  %v1108_v52 = vstv %s3123_s20 }
 0x1b9   : > { %s3199_s1 = sld [smem:[#allocation3 + $0x4f]]  ;;  %v1111_v24 = vstv %s3128_s18  ;;  %v1082_v53 = vadd.f32 %v1081_v26, %v1078_v39 }
 0x1ba   : > { %s3206_s23 = sld [smem:[#allocation5 + $0x4c]]  ;;  %v1008_v1 = vadd.f32 %v1007_v43, %v1004_v41  ;;  %v1047_v14 = vadd.f32 %v1046_v58, %v1043_v57 }
 0x1bb   : > { %v975_v62 = vstv %s4060_s15  ;;  %s3211_s16 = sld [smem:[#allocation5 + $0x4d]] }
 0x1bc   : > { %v1010_v44 = vstv %s4061_s14  ;;  %s4064_s25 = sld [smem:[#allocation60_spill]]  ;;  %v976_v0 = vmul.f32 %v2698_v48, %v975_v62  ;;  %v1049_v48 = vstv %s3048_s5  ;;  %v1084_v62 = vstv %s3089_s3 }
 0x1bd   : > { %s4065_s12 = sld [smem:[#allocation31_spill]]  ;;  %v1011_v56 = vmul.f32 %v3226_v35, %v1010_v44  ;;  %v1050_v15 = vmul.f32 %v3226_v35, %v1049_v48  ;;  %v1085_v54 = vmul.f32 %v3203_v42, %v1084_v62  ;;  %v1061_v48 = vstv %s3060_s30 }
 0x1be   : > { %v905_v50 = vstv %s4062_s0  ;;  %s3222_s14 = sld [smem:[#allocation5 + $0x4f]]  ;;  %v977_v10 = vadd.f32 %v976_v0, %v973_v55  ;;  %v1088_v0 = vstv %s3094_s29 }
 0x1bf   : > { %4063 = sst [smem:[#allocation19_spill]] %s3199_s1  ;;  %v906_v3 = vadd.f32 %v905_v50, %v903_v37  ;;  %v1012_v11 = vadd.f32 %v1011_v56, %v1008_v1  ;;  %v1051_v34 = vadd.f32 %v1050_v15, %v1047_v14  ;;  %v1058_v50 = vmul.f32 %v3268_v7, %v1057_v38 }
 0x1c0   : > { %s3217_s1 = sld [smem:[#allocation5 + $0x4e]]  ;;  %v1086_v63 = vadd.f32 %v1085_v54, %v1082_v53  ;;  %v1089_v2 = vmul.f32 %v3226_v35, %v1088_v0 }
 0x1c1   : > { %s4066_s27 = sld [smem:[#allocation47_spill]]  ;;  %v907_v22 = vmax.f32 %v906_v3, 0.0 }
 0x1c2   : > { %s3229_s21 = sld [smem:[#allocation7 + $0x13]]  ;;  %v979_v33 = vstv %s4064_s25  ;;  %v1090_v14 = vadd.f32 %v1089_v2, %v1086_v63 }
 0x1c3   : > { %v1014_v49 = vstv %s4065_s12  ;;  %s3234_s9 = sld [smem:[#allocation8 + $0x13]]  ;;  %v980_v8 = vmul.f32 %v2719_v61, %v979_v33  ;;  %v1053_v61 = vstv %s3050_s13  ;;  %v1109_v33 = vmul.f32 %v3157_v4, %v1108_v52 }
 0x1c4   : > { %s4069_s22 = sld [smem:[#allocation32_spill]]  ;;  %v1015_v51 = vmul.f32 %v3247_v12, %v1014_v49  ;;  %v1054_v36 = vmul.f32 %v3247_v12, %v1053_v61  ;;  %v1112_v49 = vmul.f32 %v3161_v6, %v1111_v24  ;;  %v1150_v61 = vstv %s3188_s2 }
 0x1c5   : > { %s3239_s15 = sld [smem:[#allocation3 + $0x50]]  ;;  %v981_v30 = vadd.f32 %v980_v8, %v977_v10  ;;  %v1116_v8 = vmul.f32 %v3185_v28, %v1115_v60  ;;  %v1162_v60 = vstv %s3206_s23 }
 0x1c6   : > { %s3243_s12 = sld [smem:[#allocation3 + $0x51]]  ;;  %v1016_v31 = vadd.f32 %v1015_v51, %v1012_v11  ;;  %v1055_v37 = vadd.f32 %v1054_v36, %v1051_v34  ;;  %v1113_v10 = vadd.f32 %v1112_v49, %v1109_v33  ;;  %v1154_v36 = vstv %s3193_s26 }
 0x1c7   : > { %v944_v9 = vstv %s4066_s27  ;;  %s4070_s5 = sld [smem:[#allocation38_spill]] }
 0x1c8   : > { %4067 = sst [smem:[#allocation63_spill]] %s3229_s21  ;;  %v945_v23 = vadd.f32 %v944_v9, %v942_v5  ;;  %v1059_v58 = vadd.f32 %v1058_v50, %v1055_v37 }
 0x1c9   : > { %4068 = sst [smem:[#allocation18_spill]] %s3234_s9 }
 0x1ca   : > { %s3250_s0 = sld [smem:[#allocation3 + $0x52]]  ;;  %v1018_v13 = vstv %s4069_s22  ;;  %v946_v43 = vmax.f32 %v945_v23, 0.0  ;;  %v1062_v51 = vadd.f32 %v1061_v48, %v1059_v58 }
 0x1cb   : > { %s3254_s17 = sld [smem:[#allocation3 + $0x53]]  ;;  %v1019_v25 = vmul.f32 %v3268_v7, %v1018_v13  ;;  %v1119_v13 = vstv %s3138_s7  ;;  %v1186_v38 = vstv %s3239_s15 }
 0x1cc   : > { %s4071_s25 = sld [smem:[#allocation65_spill]]  ;;  %v1120_v23 = vmul.f32 %v3177_v19, %v1119_v13  ;;  %v1063_v29 = vmax.f32 %v1062_v51, 0.0  ;;  %v1189_v39 = vstv %s3243_s12  ;;  %v1187_v37 = vmul.f32 %v3157_v4, %v1186_v38 }
 0x1cd   : > { %s3259_s27 = sld [smem:[#allocation5 + $0x50]]  ;;  %v909_v27 = vstv %s4070_s5  ;;  %v1020_v46 = vadd.f32 %v1019_v25, %v1016_v31  ;;  %v1151_v31 = vmul.f32 %v3161_v6, %v1150_v61  ;;  %v1190_v50 = vmul.f32 %v3161_v6, %v1189_v39 }
 0x1ce   : > { %s3264_s22 = sld [smem:[#allocation5 + $0x51]]  ;;  %v910_v41 = vmul.f32 %v909_v27, %v907_v22  ;;  %v1117_v22 = vadd.f32 %v1116_v8, %v1113_v10  ;;  %v1123_v27 = vstv %s3143_s10 }
 0x1cf   : > { %s4072_s13 = sld [smem:[#allocation54_spill]]  ;;  %v1023_v56 = vadd.f32 %v1022_v47, %v1020_v46  ;;  %v1191_v48 = vadd.f32 %v1190_v50, %v1187_v37 }
 0x1d0   : > { %s3271_s9 = sld [smem:[#allocation5 + $0x52]]  ;;  %v911_v59 = vadd.f32 %v910_v41, %v872_v40  ;;  %v1121_v26 = vadd.f32 %v1120_v23, %v1117_v22  ;;  %v1124_v40 = vmul.f32 %v3203_v42, %v1123_v27  ;;  %v1193_v54 = vstv %s3250_s0 }
 0x1d1   : > { %s3275_s8 = sld [smem:[#allocation5 + $0x53]]  ;;  %v1024_v17 = vmax.f32 %v1023_v56, 0.0  ;;  %v1194_v63 = vmul.f32 %v3185_v28, %v1193_v54 }
 0x1d2   : > { %v983_v32 = vstv %s4071_s25  ;;  %s3279_s24 = sld [smem:[#allocation7 + $0x14]] }
 0x1d3   : > { %s3282_s5 = sld [smem:[#allocation8 + $0x14]]  ;;  %v984_v45 = vadd.f32 %v983_v32, %v981_v30  ;;  %v1148_v30 = vmul.f32 %v3157_v4, %v1147_v16  ;;  %v1166_v16 = vstv %s3211_s16  ;;  %v1195_v61 = vadd.f32 %v1194_v63, %v1191_v48 }
 0x1d4   : > { %s3286_s25 = sld [smem:[#allocation3 + $0x54]]  ;;  %v1205_v38 = vstv %s3264_s22 }
 0x1d5   : > { %v948_v44 = vstv %s4072_s13  ;;  %s4075_s11 = sld [smem:[#allocation30_spill]]  ;;  %v985_v1 = vmax.f32 %v984_v45, 0.0  ;;  %v1155_v45 = vmul.f32 %v3185_v28, %v1154_v36  ;;  %v1170_v36 = vstv %s3217_s1 }
 0x1d6   : > { %s3291_s6 = sld [smem:[#allocation3 + $0x55]]  ;;  %v949_v55 = vmul.f32 %v948_v44, %v946_v43  ;;  %v1152_v44 = vadd.f32 %v1151_v31, %v1148_v30 }
 0x1d7   : > { %s3294_s3 = sld [smem:[#allocation3 + $0x56]] }
 0x1d8   : > { %4073 = sst [smem:[#allocation35_spill]] %s3279_s24  ;;  %v950_v3 = vadd.f32 %v949_v55, %v911_v59  ;;  %v1125_v59 = vadd.f32 %v1124_v40, %v1121_v26  ;;  %v1156_v49 = vadd.f32 %v1155_v45, %v1152_v44 }
 0x1d9   : > { %4074 = sst [smem:[#allocation17_spill]] %s3282_s5 }
 0x1da   : > { %s4076_s4 = sld [smem:[#allocation39_spill]]  ;;  %v1225_v0 = vstv %s3286_s25 }
 0x1db   : > { %s3297_s13 = sld [smem:[#allocation3 + $0x57]]  ;;  %v987_v57 = vstv %s4075_s11 }
 0x1dc   : > { %s3301_s20 = sld [smem:[#allocation5 + $0x54]]  ;;  %v988_v9 = vmul.f32 %v987_v57, %v985_v1  ;;  %v1228_v1 = vstv %s3291_s6 }
 0x1dd   : > { %s4077_s18 = sld [smem:[#allocation67_spill]]  ;;  %v1232_v10 = vstv %s3294_s3 }
 0x1de   : > { %s3305_s5 = sld [smem:[#allocation5 + $0x55]]  ;;  %v989_v20 = vadd.f32 %v988_v9, %v950_v3  ;;  %v1197_v3 = vstv %s3254_s17  ;;  %v1229_v9 = vmul.f32 %v3161_v6, %v1228_v1  ;;  %v1233_v22 = vmul.f32 %v3185_v28, %v1232_v10 }
 0x1df   : > { %s3309_s29 = sld [smem:[#allocation5 + $0x56]]  ;;  %v1209_v1 = vstv %s3271_s9 }
 0x1e0   : > { %v1092_v5 = vstv %s4076_s4  ;;  %s4079_s24 = sld [smem:[#allocation21_spill]] }
 0x1e1   : > { %s3312_s21 = sld [smem:[#allocation5 + $0x57]]  ;;  %v1093_v15 = vmul.f32 %v3247_v12, %v1092_v5  ;;  %v1226_v5 = vmul.f32 %v3157_v4, %v1225_v0  ;;  %v1236_v31 = vstv %s3297_s13  ;;  %v1206_v0 = vmul.f32 %v3226_v35, %v1205_v38 }
 0x1e2   : > { %s3315_s19 = sld [smem:[#allocation7 + $0x15]]  ;;  %v1240_v37 = vstv %s3301_s20 }
 0x1e3   : > { %v1026_v11 = vstv %s4077_s18  ;;  %s3319_s30 = sld [smem:[#allocation8 + $0x15]]  ;;  %v1094_v32 = vadd.f32 %v1093_v15, %v1090_v14  ;;  %v1163_v15 = vmul.f32 %v3203_v42, %v1162_v60 }
 0x1e4   : > { %s4083_s11 = sld [smem:[#allocation28_spill]]  ;;  %v1027_v21 = vmul.f32 %v1026_v11, %v1024_v17 }
 0x1e5   : > { %4078 = sst [smem:[#allocation23_spill]] %s3309_s29 }
 0x1e6   : > { %s3324_s4 = sld [smem:[#allocation3 + $0x58]]  ;;  %v1096_v18 = vstv %s4079_s24  ;;  %v1028_v43 = vadd.f32 %v1027_v21, %v989_v20  ;;  %v1201_v20 = vstv %s3259_s27  ;;  %v1230_v21 = vadd.f32 %v1229_v9, %v1226_v5 }
 0x1e7   : > { %4080 = sst [smem:[#allocation20_spill]] %s3312_s21  ;;  %v1097_v34 = vmul.f32 %v3268_v7, %v1096_v18  ;;  %v1198_v18 = vmul.f32 %v3177_v19, %v1197_v3  ;;  %v1202_v26 = vmul.f32 %v3203_v42, %v1201_v20 }
 0x1e8   : > { %4081 = sst [smem:[#allocation22_spill]] %s3315_s19 }
 0x1e9   : > { %4082 = sst [smem:[#allocation24_spill]] %s3319_s30  ;;  %v1098_v46 = vadd.f32 %v1097_v34, %v1094_v32  ;;  %v1167_v34 = vmul.f32 %v3226_v35, %v1166_v16  ;;  %v1199_v39 = vadd.f32 %v1198_v18, %v1195_v61 }
 0x1ea   : > { %s3327_s21 = sld [smem:[#allocation3 + $0x59]]  ;;  %v1065_v25 = vstv %s4083_s11 }
 0x1eb   : > { %s3330_s7 = sld [smem:[#allocation3 + $0x5a]]  ;;  %v1066_v62 = vmul.f32 %v1065_v25, %v1063_v29 }
 0x1ec   : > { %s4084_s18 = sld [smem:[#allocation40_spill]]  ;;  %v1264_v8 = vstv %s3324_s4 }
 0x1ed   : > { %s3335_s28 = sld [smem:[#allocation3 + $0x5b]]  ;;  %v3369_v56 = vadd.f32 %v1066_v62, %v1028_v43  ;;  %v1265_v23 = vmul.f32 %v3157_v4, %v1264_v8  ;;  %v1234_v43 = vadd.f32 %v1233_v22, %v1230_v21  ;;  %v1237_v62 = vmul.f32 %v3177_v19, %v1236_v31 }
 0x1ee   : > { %s4085_s2 = sld [smem:[#allocation19_spill]] }
 0x1ef   : > { %s3340_s24 = sld [smem:[#allocation5 + $0x58]] }
 0x1f0   : > { %s4086_s30 = sld [smem:[#allocation27_spill]]  ;;  %v1267_v11 = vstv %s3327_s21 }
 0x1f1   : > { %s3344_s19 = sld [smem:[#allocation5 + $0x59]]  ;;  %v1268_v29 = vmul.f32 %v3161_v6, %v1267_v11  ;;  %v1271_v25 = vstv %s3330_s7  ;;  %v1213_v11 = vstv %s3275_s8 }
 0x1f2   : > { %s4087_s10 = sld [smem:[#allocation62_spill]]  ;;  %v1127_v41 = vstv %s4084_s18  ;;  %v1272_v45 = vmul.f32 %v3185_v28, %v1271_v25  ;;  %v1214_v25 = vmul.f32 %v3268_v7, %v1213_v11 }
 0x1f3   : > { %s3348_s29 = sld [smem:[#allocation5 + $0x5a]]  ;;  %v1128_v53 = vmul.f32 %v3226_v35, %v1127_v41  ;;  %v1269_v44 = vadd.f32 %v1268_v29, %v1265_v23  ;;  %v1275_v50 = vstv %s3335_s28 }
 0x1f4   : > { %s4088_s11 = sld [smem:[#allocation25_spill]]  ;;  %v1158_v47 = vstv %s4085_s2  ;;  %v1276_v60 = vmul.f32 %v3177_v19, %v1275_v50 }
 0x1f5   : > { %s3351_s26 = sld [smem:[#allocation5 + $0x5b]]  ;;  %v1159_v57 = vmul.f32 %v3177_v19, %v1158_v47  ;;  %v1129_v17 = vadd.f32 %v1128_v53, %v1125_v59  ;;  %v1174_v47 = vstv %s3222_s14  ;;  %v1171_v53 = vmul.f32 %v3247_v12, %v1170_v36 }
 0x1f6   : > { %s4089_s15 = sld [smem:[#allocation33_spill]]  ;;  %v1100_v52 = vstv %s4086_s30  ;;  %v1279_v3 = vstv %s3340_s24  ;;  %v1175_v9 = vmul.f32 %v3268_v7, %v1174_v47 }
 0x1f7   : > { %s3356_s12 = sld [smem:[#allocation7 + $0x16]]  ;;  %v3375_v58 = vadd.f32 %v1100_v52, %v1098_v46  ;;  %v1160_v14 = vadd.f32 %v1159_v57, %v1156_v49  ;;  %v1238_v49 = vadd.f32 %v1237_v62, %v1234_v43  ;;  %v1241_v57 = vmul.f32 %v3203_v42, %v1240_v37 }
 0x1f8   : > { %v1104_v24 = vstv %s4087_s10  ;;  %s3362_s18 = sld [smem:[#allocation8 + $0x16]]  ;;  %v1280_v16 = vmul.f32 %v3203_v42, %v1279_v3  ;;  %v1283_v21 = vstv %s3344_s19 }
 0x1f9   : > { %s3367_s2 = sld [smem:[#allocation3 + $0x5c]]  ;;  %v1102_v27 = vmax.f32 %v3375_v58, 0.0  ;;  %v1164_v32 = vadd.f32 %v1163_v15, %v1160_v14  ;;  %v1273_v58 = vadd.f32 %v1272_v45, %v1269_v44  ;;  %v1284_v38 = vmul.f32 %v3226_v35, %v1283_v21 }
 0x1fa   : > { %v1131_v55 = vstv %s4088_s11  ;;  %s3373_s30 = sld [smem:[#allocation3 + $0x5d]] }
 0x1fb   : > { %s4090_s0 = sld [smem:[#allocation58_spill]]  ;;  %v1132_v2 = vmul.f32 %v3247_v12, %v1131_v55  ;;  %v1168_v52 = vadd.f32 %v1167_v34, %v1164_v32  ;;  %v1203_v55 = vadd.f32 %v1202_v26, %v1199_v39  ;;  %v1105_v48 = vmul.f32 %v1104_v24, %v1102_v27 }
 0x1fc   : > { %v1135_v33 = vstv %s4089_s15  ;;  %s3379_s6 = sld [smem:[#allocation3 + $0x5e]]  ;;  %v1210_v24 = vmul.f32 %v3247_v12, %v1209_v1  ;;  %v1277_v15 = vadd.f32 %v1276_v60, %v1273_v58 }
 0x1fd   : > { %s3385_s25 = sld [smem:[#allocation3 + $0x5f]]  ;;  %v1136_v51 = vmul.f32 %v3268_v7, %v1135_v33  ;;  %v1133_v30 = vadd.f32 %v1132_v2, %v1129_v17  ;;  %v1244_v2 = vstv %s3305_s5  ;;  %v1172_v5 = vadd.f32 %v1171_v53, %v1168_v52 }
 0x1fe   : > { %s3390_s23 = sld [smem:[#allocation5 + $0x5c]]  ;;  %v1207_v8 = vadd.f32 %v1206_v0, %v1203_v55  ;;  %v1245_v14 = vmul.f32 %v3226_v35, %v1244_v2  ;;  %v1106_v22 = vadd.f32 %v1105_v48, %v3369_v56  ;;  %v1281_v36 = vadd.f32 %v1280_v16, %v1277_v15 }
 0x1ff   : > { %s3395_s17 = sld [smem:[#allocation5 + $0x5d]]  ;;  %v1303_v40 = vstv %s3367_s2  ;;  %v1137_v46 = vadd.f32 %v1136_v51, %v1133_v30  ;;  %v1176_v30 = vadd.f32 %v1175_v9, %v1172_v5  ;;  %v1291_v0 = vstv %s3351_s26 }
 0x200   : > { %s3400_s21 = sld [smem:[#allocation5 + $0x5e]]  ;;  %v1306_v41 = vstv %s3373_s30  ;;  %v1304_v54 = vmul.f32 %v3157_v4, %v1303_v40  ;;  %v1211_v31 = vadd.f32 %v1210_v24, %v1207_v8 }
 0x201   : > { %v1139_v13 = vstv %s4090_s0  ;;  %s3405_s3 = sld [smem:[#allocation5 + $0x5f]]  ;;  %v1307_v59 = vmul.f32 %v3161_v6, %v1306_v41  ;;  %v1287_v41 = vstv %s3348_s29 }
 0x202   : > { %s3410_s16 = sld [smem:[#allocation7 + $0x17]]  ;;  %v1310_v33 = vstv %s3379_s6  ;;  %v1140_v63 = vadd.f32 %v1139_v13, %v1137_v46  ;;  %v1242_v13 = vadd.f32 %v1241_v57, %v1238_v49  ;;  %v1215_v47 = vadd.f32 %v1214_v25, %v1211_v31 }
 0x203   : > { %s3415_s27 = sld [smem:[#allocation8 + $0x17]]  ;;  %v1308_v17 = vadd.f32 %v1307_v59, %v1304_v54  ;;  %v1311_v10 = vmul.f32 %v3185_v28, %v1310_v33  ;;  %v1314_v51 = vstv %s3385_s25  ;;  %v1285_v54 = vadd.f32 %v1284_v38, %v1281_v36 }
 0x204   : > { %s3420_s4 = sld [smem:[#allocation3 + $0x60]]  ;;  %v1141_v61 = vmax.f32 %v1140_v63, 0.0  ;;  %v1315_v27 = vmul.f32 %v3177_v19, %v1314_v51  ;;  %v1318_v32 = vstv %s3390_s23  ;;  %v1246_v34 = vadd.f32 %v1245_v14, %v1242_v13 }
 0x205   : > { %s3424_s1 = sld [smem:[#allocation3 + $0x61]]  ;;  %v1312_v29 = vadd.f32 %v1311_v10, %v1308_v17  ;;  %v1319_v62 = vmul.f32 %v3203_v42, %v1318_v32  ;;  %v1322_v50 = vstv %s3395_s17  ;;  %v1288_v59 = vmul.f32 %v3247_v12, %v1287_v41 }
 0x206   : > { %s3429_s22 = sld [smem:[#allocation3 + $0x62]]  ;;  %v1323_v57 = vmul.f32 %v3226_v35, %v1322_v50  ;;  %v1326_v58 = vstv %s3400_s21  ;;  %v1292_v10 = vmul.f32 %v3268_v7, %v1291_v0 }
 0x207   : > { %s3434_s13 = sld [smem:[#allocation3 + $0x63]]  ;;  %v1316_v43 = vadd.f32 %v1315_v27, %v1312_v29  ;;  %v1289_v17 = vadd.f32 %v1288_v59, %v1285_v54  ;;  %v1327_v8 = vmul.f32 %v3247_v12, %v1326_v58  ;;  %v1330_v24 = vstv %s3405_s3 }
 0x208   : > { %s3439_s14 = sld [smem:[#allocation5 + $0x60]]  ;;  %v1295_v29 = vstv %s3356_s12  ;;  %v1334_v59 = vstv %s3410_s16 }
 0x209   : > { %s3443_s20 = sld [smem:[#allocation5 + $0x61]]  ;;  %v1320_v49 = vadd.f32 %v1319_v62, %v1316_v43 }
 0x20a   : > { %s3449_s7 = sld [smem:[#allocation5 + $0x62]]  ;;  %v1342_v44 = vstv %s3420_s4 }
 0x20b   : > { %s4091_s9 = sld [smem:[#allocation68_spill]]  ;;  %v1345_v45 = vstv %s3424_s1  ;;  %v1343_v1 = vmul.f32 %v3157_v4, %v1342_v44  ;;  %v1324_v13 = vadd.f32 %v1323_v57, %v1320_v49  ;;  %v1299_v57 = vstv %s3362_s18 }
 0x20c   : > { %s4092_s28 = sld [smem:[#allocation23_spill]]  ;;  %v1346_v33 = vmul.f32 %v3161_v6, %v1345_v45  ;;  %v1349_v60 = vstv %s3429_s22 }
 0x20d   : > { %s3453_s11 = sld [smem:[#allocation5 + $0x63]]  ;;  %v1350_v51 = vmul.f32 %v3185_v28, %v1349_v60  ;;  %v1353_v14 = vstv %s3434_s13 }
 0x20e   : > { %s4093_s10 = sld [smem:[#allocation63_spill]]  ;;  %v1347_v11 = vadd.f32 %v1346_v33, %v1343_v1  ;;  %v1354_v25 = vmul.f32 %v3177_v19, %v1353_v14 }
 0x20f   : > { %s3458_s5 = sld [smem:[#allocation7 + $0x18]] }
 0x210   : > { %s3462_s24 = sld [smem:[#allocation8 + $0x18]]  ;;  %v1351_v31 = vadd.f32 %v1350_v51, %v1347_v11 }
 0x211   : > { %v1143_v18 = vstv %s4091_s9  ;;  %s3467_s15 = sld [smem:[#allocation3 + $0x64]] }
 0x212   : > { %v1248_v20 = vstv %s4092_s28  ;;  %s4094_s8 = sld [smem:[#allocation18_spill]]  ;;  %v1144_v39 = vmul.f32 %v1143_v18, %v1141_v61 }
 0x213   : > { %s4095_s2 = sld [smem:[#allocation20_spill]]  ;;  %v1249_v56 = vmul.f32 %v3247_v12, %v1248_v20 }
 0x214   : > { %v1178_v23 = vstv %s4093_s10  ;;  %s3472_s30 = sld [smem:[#allocation3 + $0x65]]  ;;  %v1145_v55 = vadd.f32 %v1144_v39, %v1106_v22 }
 0x215   : > { %s3476_s19 = sld [smem:[#allocation3 + $0x66]]  ;;  %v1179_v46 = vadd.f32 %v1178_v23, %v1176_v30  ;;  %v1250_v52 = vadd.f32 %v1249_v56, %v1246_v34  ;;  %v1293_v23 = vadd.f32 %v1292_v10, %v1289_v17  ;;  %v1331_v30 = vmul.f32 %v3268_v7, %v1330_v24 }
 0x216   : > { %s4096_s0 = sld [smem:[#allocation35_spill]]  ;;  %v1328_v34 = vadd.f32 %v1327_v8, %v1324_v13  ;;  %v1357_v56 = vstv %s3439_s14 }
 0x217   : > { %s3480_s6 = sld [smem:[#allocation3 + $0x67]]  ;;  %v1180_v48 = vmax.f32 %v1179_v46, 0.0  ;;  %v1381_v2 = vstv %s3467_s15  ;;  %v1296_v46 = vadd.f32 %v1295_v29, %v1293_v23 }
 0x218   : > { %v1182_v26 = vstv %s4094_s8  ;;  %s3485_s25 = sld [smem:[#allocation5 + $0x64]]  ;;  %v1382_v15 = vmul.f32 %v3157_v4, %v1381_v2  ;;  %v1332_v50 = vadd.f32 %v1331_v30, %v1328_v34  ;;  %v1365_v2 = vstv %s3449_s7 }
 0x219   : > { %v1252_v40 = vstv %s4095_s2  ;;  %s3490_s23 = sld [smem:[#allocation5 + $0x65]]  ;;  %v1183_v61 = vmul.f32 %v1182_v26, %v1180_v48  ;;  %v1297_v60 = vmax.f32 %v1296_v46, 0.0 }
 0x21a   : > { %s3494_s9 = sld [smem:[#allocation5 + $0x66]]  ;;  %v1253_v53 = vmul.f32 %v3268_v7, %v1252_v40  ;;  %v1384_v3 = vstv %s3472_s30 }
 0x21b   : > { %s3498_s29 = sld [smem:[#allocation5 + $0x67]]  ;;  %v1385_v16 = vmul.f32 %v3161_v6, %v1384_v3  ;;  %v1388_v21 = vstv %s3476_s19  ;;  %v1184_v41 = vadd.f32 %v1183_v61, %v1145_v55  ;;  %v1335_v3 = vadd.f32 %v1334_v59, %v1332_v50 }
 0x21c   : > { %v1217_v37 = vstv %s4096_s0  ;;  %s4097_s4 = sld [smem:[#allocation22_spill]]  ;;  %v1254_v5 = vadd.f32 %v1253_v53, %v1250_v52  ;;  %v1389_v38 = vmul.f32 %v3185_v28, %v1388_v21  ;;  %v1361_v52 = vstv %s3443_s20 }
 0x21d   : > { %s3503_s17 = sld [smem:[#allocation7 + $0x19]]  ;;  %v1218_v63 = vadd.f32 %v1217_v37, %v1215_v47  ;;  %v1386_v36 = vadd.f32 %v1385_v16, %v1382_v15  ;;  %v1392_v39 = vstv %s3480_s6  ;;  %v1355_v47 = vadd.f32 %v1354_v25, %v1351_v31 }
 0x21e   : > { %s3508_s1 = sld [smem:[#allocation3 + $0x68]]  ;;  %v1358_v37 = vmul.f32 %v3203_v42, %v1357_v56  ;;  %v1393_v54 = vmul.f32 %v3177_v19, %v1392_v39  ;;  %v1396_v55 = vstv %s3485_s25  ;;  %v1366_v61 = vmul.f32 %v3247_v12, %v1365_v2 }
 0x21f   : > { %s3512_s26 = sld [smem:[#allocation3 + $0x69]]  ;;  %v1219_v18 = vmax.f32 %v1218_v63, 0.0  ;;  %v1390_v53 = vadd.f32 %v1389_v38, %v1386_v36  ;;  %v1362_v63 = vmul.f32 %v3226_v35, %v1361_v52  ;;  %v1400_v10 = vstv %s3490_s23 }
 0x220   : > { %s4098_s28 = sld [smem:[#allocation17_spill]]  ;;  %v1359_v48 = vadd.f32 %v1358_v37, %v1355_v47  ;;  %v1369_v21 = vstv %s3453_s11  ;;  %v1401_v23 = vmul.f32 %v3226_v35, %v1400_v10  ;;  %v1336_v29 = vmax.f32 %v1335_v3, 0.0 }
 0x221   : > { %s3516_s10 = sld [smem:[#allocation3 + $0x6a]]  ;;  %v1338_v25 = vstv %s3415_s27  ;;  %v1370_v38 = vmul.f32 %v3268_v7, %v1369_v21 }
 0x222   : > { %v1256_v9 = vstv %s4097_s4  ;;  %s3521_s21 = sld [smem:[#allocation8 + $0x19]]  ;;  %v1363_v16 = vadd.f32 %v1362_v63, %v1359_v48 }
 0x223   : > { %s3526_s22 = sld [smem:[#allocation3 + $0x6b]]  ;;  %v1257_v22 = vadd.f32 %v1256_v9, %v1254_v5  ;;  %v1394_v5 = vadd.f32 %v1393_v54, %v1390_v53  ;;  %v1397_v9 = vmul.f32 %v3203_v42, %v1396_v55 }
 0x224   : > { %s3530_s3 = sld [smem:[#allocation5 + $0x68]]  ;;  %v1420_v27 = vstv %s3508_s1  ;;  %v1367_v36 = vadd.f32 %v1366_v61, %v1363_v16 }
 0x225   : > { %s3534_s13 = sld [smem:[#allocation5 + $0x69]]  ;;  %v1423_v32 = vstv %s3512_s26  ;;  %v1421_v26 = vmul.f32 %v3157_v4, %v1420_v27  ;;  %v1258_v62 = vmax.f32 %v1257_v22, 0.0  ;;  %v1398_v22 = vadd.f32 %v1397_v9, %v1394_v5 }
 0x226   : > { %v1221_v20 = vstv %s4098_s28  ;;  %s4099_s15 = sld [smem:[#allocation24_spill]]  ;;  %v1424_v40 = vmul.f32 %v3161_v6, %v1423_v32  ;;  %v1404_v27 = vstv %s3494_s9  ;;  %v1371_v53 = vadd.f32 %v1370_v38, %v1367_v36 }
 0x227   : > { %s3539_s8 = sld [smem:[#allocation5 + $0x6a]]  ;;  %v1222_v43 = vmul.f32 %v1221_v20, %v1219_v18  ;;  %v1427_v44 = vstv %s3516_s10  ;;  %v1300_v20 = vmul.f32 %v1299_v57, %v1297_v60 }
 0x228   : > { %s3543_s2 = sld [smem:[#allocation5 + $0x6b]]  ;;  %v1425_v0 = vadd.f32 %v1424_v40, %v1421_v26  ;;  %v1428_v1 = vmul.f32 %v3185_v28, %v1427_v44  ;;  %v1373_v40 = vstv %s3458_s5  ;;  %v1408_v44 = vstv %s3498_s29 }
 0x229   : > { %s3548_s12 = sld [smem:[#allocation7 + $0x1a]]  ;;  %v1223_v33 = vadd.f32 %v1222_v43, %v1184_v41  ;;  %v1431_v58 = vstv %s3526_s22  ;;  %v1402_v41 = vadd.f32 %v1401_v23, %v1398_v22  ;;  %v1405_v43 = vmul.f32 %v3247_v12, %v1404_v27 }
 0x22a   : > { %s3551_s14 = sld [smem:[#allocation3 + $0x6c]]  ;;  %v1429_v8 = vadd.f32 %v1428_v1, %v1425_v0  ;;  %v1432_v24 = vmul.f32 %v3177_v19, %v1431_v58  ;;  %v1435_v51 = vstv %s3530_s3  ;;  %v1409_v1 = vmul.f32 %v3268_v7, %v1408_v44 }
 0x22b   : > { %s3555_s30 = sld [smem:[#allocation3 + $0x6d]]  ;;  %v1436_v31 = vmul.f32 %v3203_v42, %v1435_v51  ;;  %v1439_v32 = vstv %s3534_s13  ;;  %v1406_v0 = vadd.f32 %v1405_v43, %v1402_v41 }
 0x22c   : > { %v1260_v45 = vstv %s4099_s15  ;;  %s3559_s19 = sld [smem:[#allocation3 + $0x6e]]  ;;  %v1433_v30 = vadd.f32 %v1432_v24, %v1429_v8  ;;  %v1440_v46 = vmul.f32 %v3226_v35, %v1439_v32  ;;  %v1377_v8 = vstv %s3462_s24 }
 0x22d   : > { %s3564_s0 = sld [smem:[#allocation8 + $0x1a]]  ;;  %v1261_v49 = vmul.f32 %v1260_v45, %v1258_v62  ;;  %v1339_v62 = vmul.f32 %v1338_v25, %v1336_v29  ;;  %v1443_v47 = vstv %s3539_s8  ;;  %v1412_v24 = vstv %s3503_s17 }
 0x22e   : > { %s3568_s20 = sld [smem:[#allocation3 + $0x6f]]  ;;  %v1437_v45 = vadd.f32 %v1436_v31, %v1433_v30  ;;  %v1444_v58 = vmul.f32 %v3247_v12, %v1443_v47  ;;  %v1447_v48 = vstv %s3543_s2 }
 0x22f   : > { %s3572_s16 = sld [smem:[#allocation5 + $0x6c]]  ;;  %v1262_v15 = vadd.f32 %v1261_v49, %v1223_v33  ;;  %v1448_v51 = vmul.f32 %v3268_v7, %v1447_v48  ;;  %v1451_v22 = vstv %s3548_s12 }
 0x230   : > { %v1459_v17 = vstv %s3551_s14  ;;  %s3576_s6 = sld [smem:[#allocation5 + $0x6d]]  ;;  %v1441_v57 = vadd.f32 %v1440_v46, %v1437_v45 }
 0x231   : > { %v1462_v11 = vstv %s3555_s30  ;;  %s3581_s18 = sld [smem:[#allocation5 + $0x6e]]  ;;  %v1460_v13 = vmul.f32 %v3157_v4, %v1459_v17  ;;  %v1301_v26 = vadd.f32 %v1300_v20, %v1262_v15 }
 0x232   : > { %v1463_v14 = vmul.f32 %v3161_v6, %v1462_v11  ;;  %s3586_s7 = sld [smem:[#allocation5 + $0x6f]]  ;;  %v1466_v18 = vstv %s3559_s19  ;;  %v1445_v11 = vadd.f32 %v1444_v58, %v1441_v57 }
 0x233   : > { %s3590_s25 = sld [smem:[#allocation7 + $0x1b]]  ;;  %v1467_v56 = vmul.f32 %v3185_v28, %v1466_v18 }
 0x234   : > { %s3594_s23 = sld [smem:[#allocation3 + $0x70]]  ;;  %v1464_v34 = vadd.f32 %v1463_v14, %v1460_v13  ;;  %v1470_v39 = vstv %s3568_s20  ;;  %v1340_v13 = vadd.f32 %v1339_v62, %v1301_v26  ;;  %v1449_v27 = vadd.f32 %v1448_v51, %v1445_v11 }
 0x235   : > { %s3598_s4 = sld [smem:[#allocation3 + $0x71]]  ;;  %v1471_v50 = vmul.f32 %v3177_v19, %v1470_v39  ;;  %v1474_v54 = vstv %s3572_s16 }
 0x236   : > { %s3603_s11 = sld [smem:[#allocation3 + $0x72]]  ;;  %v1468_v37 = vadd.f32 %v1467_v56, %v1464_v34  ;;  %v1475_v2 = vmul.f32 %v3203_v42, %v1474_v54  ;;  %v1478_v5 = vstv %s3576_s6 }
 0x237   : > { %s3607_s9 = sld [smem:[#allocation3 + $0x73]]  ;;  %v1479_v15 = vmul.f32 %v3226_v35, %v1478_v5  ;;  %v1482_v61 = vstv %s3581_s18 }
 0x238   : > { %s3611_s27 = sld [smem:[#allocation5 + $0x70]]  ;;  %v1472_v63 = vadd.f32 %v1471_v50, %v1468_v37  ;;  %v1486_v30 = vstv %s3586_s7  ;;  %v1483_v34 = vmul.f32 %v3247_v12, %v1482_v61  ;;  %v1452_v50 = vadd.f32 %v1451_v22, %v1449_v27 }
 0x239   : > { %s3615_s1 = sld [smem:[#allocation8 + $0x1b]] }
 0x23a   : > { %v1498_v52 = vstv %s3594_s23  ;;  %s3620_s5 = sld [smem:[#allocation5 + $0x71]]  ;;  %v1476_v14 = vadd.f32 %v1475_v2, %v1472_v63  ;;  %v1455_v63 = vstv %s3564_s0  ;;  %v1490_v2 = vstv %s3590_s25 }
 0x23b   : > { %v1499_v59 = vmul.f32 %v3157_v4, %v1498_v52  ;;  %v1501_v55 = vstv %s3598_s4  ;;  %s3625_s29 = sld [smem:[#allocation5 + $0x72]] }
 0x23c   : > { %v1502_v33 = vmul.f32 %v3161_v6, %v1501_v55  ;;  %v1505_v49 = vstv %s3603_s11  ;;  %s3630_s26 = sld [smem:[#allocation5 + $0x73]]  ;;  %v1374_v6 = vadd.f32 %v1373_v40, %v1371_v53 }
 0x23d   : > { %v1506_v60 = vmul.f32 %v3185_v28, %v1505_v49  ;;  %v1509_v4 = vstv %s3607_s9  ;;  %s3635_s28 = sld [smem:[#allocation7 + $0x1c]]  ;;  %v1410_v28 = vadd.f32 %v1409_v1, %v1406_v0 }
 0x23e   : > { %v1503_v3 = vadd.f32 %v1502_v33, %v1499_v59  ;;  %s3639_s10 = sld [smem:[#allocation3 + $0x74]]  ;;  %v1510_v9 = vmul.f32 %v3177_v19, %v1509_v4  ;;  %v1513_v10 = vstv %s3611_s27  ;;  %v1416_v19 = vstv %s3521_s21 }
 0x23f   : > { %s3643_s22 = sld [smem:[#allocation3 + $0x75]]  ;;  %v1375_v16 = vmax.f32 %v1374_v6, 0.0  ;;  %v1514_v20 = vmul.f32 %v3203_v42, %v1513_v10  ;;  %v1413_v21 = vadd.f32 %v1412_v24, %v1410_v28  ;;  %v1480_v42 = vadd.f32 %v1479_v15, %v1476_v14 }
 0x240   : > { %v1507_v17 = vadd.f32 %v1506_v60, %v1503_v3  ;;  %s3646_s3 = sld [smem:[#allocation3 + $0x76]]  ;;  %v1517_v23 = vstv %s3620_s5  ;;  %v1487_v59 = vmul.f32 %v3268_v7, %v1486_v30  ;;  %v1453_v6 = vmax.f32 %v1452_v50, 0.0 }
 0x241   : > { %s3651_s13 = sld [smem:[#allocation3 + $0x77]]  ;;  %v1518_v26 = vmul.f32 %v3226_v35, %v1517_v23  ;;  %v1378_v62 = vmul.f32 %v1377_v8, %v1375_v16  ;;  %v1521_v44 = vstv %s3625_s29  ;;  %v1414_v37 = vmax.f32 %v1413_v21, 0.0 }
 0x242   : > { %s4100_s15 = sld [smem:[#allocation59_spill]]  ;;  %v1511_v18 = vadd.f32 %v1510_v9, %v1507_v17  ;;  %v1484_v54 = vadd.f32 %v1483_v34, %v1480_v42  ;;  %v1522_v49 = vmul.f32 %v3247_v12, %v1521_v44  ;;  %v1525_v58 = vstv %s3630_s26 }
 0x243   : > { %s3655_s8 = sld [smem:[#allocation5 + $0x74]]  ;;  %v1379_v57 = vadd.f32 %v1378_v62, %v1340_v13  ;;  %v1417_v48 = vmul.f32 %v1416_v19, %v1414_v37  ;;  %v1456_v61 = vmul.f32 %v1455_v63, %v1453_v6  ;;  %v1529_v22 = vstv %s3635_s28 }
 0x244   : > { %s3659_s24 = sld [smem:[#allocation5 + $0x75]]  ;;  %v1537_v29 = vstv %s3639_s10  ;;  %v1515_v39 = vadd.f32 %v1514_v20, %v1511_v18  ;;  %v1488_v5 = vadd.f32 %v1487_v59, %v1484_v54  ;;  %v1494_v34 = vstv %s3615_s1 }
 0x245   : > { %s3663_s17 = sld [smem:[#allocation8 + $0x1c]]  ;;  %v1540_v32 = vstv %s3643_s22  ;;  %v1418_v19 = vadd.f32 %v1417_v48, %v1379_v57 }
 0x246   : > { %s3672_s21 = sld [smem:[#allocation5 + $0x76]]  ;;  %v1544_v38 = vstv %s3646_s3  ;;  %v1519_v33 = vadd.f32 %v1518_v26, %v1515_v39  ;;  %v1491_v18 = vadd.f32 %v1490_v2, %v1488_v5 }
 0x247   : > { %s3680_s2 = sld [smem:[#allocation5 + $0x77]]  ;;  %v1548_v43 = vstv %s3651_s13 }
 0x248   : > { %v3668_v31 = vld [vmem:[%s4100_s15] sm:$0x3]  ;;  %v3676_v56 = vld [vmem:[%s4100_s15 + $0x2] sm:$0x3]  ;;  %v3684_v40 = vld [vmem:[%s4100_s15 + $0x4] sm:$0x3]  ;;  %v1523_v17 = vadd.f32 %v1522_v49, %v1519_v33 }
 0x249   : > { %v1538_v25 = vmul.f32 %v3668_v31, %v1537_v29  ;;  %v1541_v36 = vmul.f32 %v3676_v56, %v1540_v32  ;;  %v1545_v41 = vmul.f32 %v3684_v40, %v1544_v38  ;;  %s4101_s12 = sld [smem:[#allocation64_spill]]  ;;  %v3692_v46 = vld [vmem:[%s4100_s15 + $0x6] sm:$0x3]  ;;  %v1552_v52 = vstv %s3655_s8 }
 0x24a   : > { %s3688_s14 = sld [smem:[#allocation7 + $0x1d]]  ;;  %v1549_v47 = vmul.f32 %v3692_v46, %v1548_v43  ;;  %v1556_v53 = vstv %s3659_s24  ;;  %v1492_v26 = vmax.f32 %v1491_v18, 0.0 }
 0x24b   : > { %v1542_v45 = vadd.f32 %v1541_v36, %v1538_v25  ;;  %s3695_s30 = sld [smem:[#allocation3 + $0x78]]  ;;  %v1557_v4 = vmul.f32 %v3226_v35, %v1556_v53  ;;  %v1526_v35 = vmul.f32 %v3268_v7, %v1525_v58  ;;  %v1533_v50 = vstv %s3663_s17 }
 0x24c   : > { %s3699_s19 = sld [smem:[#allocation3 + $0x79]]  ;;  %v1560_v3 = vstv %s3672_s21  ;;  %v1495_v57 = vmul.f32 %v1494_v34, %v1492_v26 }
 0x24d   : > { %v1546_v55 = vadd.f32 %v1545_v41, %v1542_v45  ;;  %s3706_s20 = sld [smem:[#allocation3 + $0x7a]]  ;;  %v1561_v11 = vmul.f32 %v3247_v12, %v1560_v3  ;;  %v1564_v14 = vstv %s3680_s2  ;;  %v1527_v21 = vadd.f32 %v1526_v35, %v1523_v17 }
 0x24e   : > { %s3709_s16 = sld [smem:[#allocation3 + $0x7b]]  ;;  %v1565_v30 = vmul.f32 %v3268_v7, %v1564_v14  ;;  %v1457_v7 = vadd.f32 %v1456_v61, %v1418_v19 }
 0x24f   : > { %v3703_v0 = vld [vmem:[%s4101_s12] sm:$0x3]  ;;  %v1550_v60 = vadd.f32 %v1549_v47, %v1546_v55  ;;  %s3713_s6 = sld [smem:[#allocation5 + $0x78]]  ;;  %v3755_v38 = vld [vmem:[%s4101_s12 + $0x2] sm:$0x3]  ;;  %v1530_v41 = vadd.f32 %v1529_v22, %v1527_v21 }
 0x250   : > { %v1553_v1 = vmul.f32 %v3703_v0, %v1552_v52  ;;  %s3718_s18 = sld [smem:[#allocation5 + $0x79]]  ;;  %v3764_v45 = vld [vmem:[%s4101_s12 + $0x4] sm:$0x3]  ;;  %v1568_v52 = vstv %s3688_s14  ;;  %v3777_v55 = vld [vmem:[%s4101_s12 + $0x6] sm:$0x3]  ;;  %v1496_v17 = vadd.f32 %v1495_v57, %v1457_v7 }
 0x251   : > { %v1576_v28 = vstv %s3695_s30  ;;  %s3721_s7 = sld [smem:[#allocation5 + $0x7a]]  ;;  %v1531_v58 = vmax.f32 %v1530_v41, 0.0 }
 0x252   : > { %v1554_v9 = vadd.f32 %v1553_v1, %v1550_v60  ;;  %v1577_v10 = vmul.f32 %v3668_v31, %v1576_v28  ;;  %v1579_v8 = vstv %s3699_s19  ;;  %s3726_s0 = sld [smem:[#allocation5 + $0x7b]] }
 0x253   : > { %s3729_s25 = sld [smem:[#allocation8 + $0x1d]]  ;;  %v1580_v51 = vmul.f32 %v3676_v56, %v1579_v8  ;;  %v1583_v13 = vstv %s3706_s20  ;;  %v1534_v35 = vmul.f32 %v1533_v50, %v1531_v58 }
 0x254   : > { %v1558_v24 = vadd.f32 %v1557_v4, %v1554_v9  ;;  %v1584_v15 = vmul.f32 %v3684_v40, %v1583_v13  ;;  %v1587_v16 = vstv %s3709_s16  ;;  %s3736_s23 = sld [smem:[#allocation7 + $0x1e]] }
 0x255   : > { %v1581_v20 = vadd.f32 %v1580_v51, %v1577_v10  ;;  %v1588_v12 = vmul.f32 %v3692_v46, %v1587_v16  ;;  %s3739_s4 = sld [smem:[#allocation3 + $0x7c]]  ;;  %v1591_v23 = vstv %s3713_s6  ;;  %v1535_v14 = vadd.f32 %v1534_v35, %v1496_v17 }
 0x256   : > { %v1595_v29 = vstv %s3718_s18  ;;  %s3744_s11 = sld [smem:[#allocation3 + $0x7d]]  ;;  %v1562_v27 = vadd.f32 %v1561_v11, %v1558_v24  ;;  %v1592_v32 = vmul.f32 %v3703_v0, %v1591_v23 }
 0x257   : > { %v1585_v25 = vadd.f32 %v1584_v15, %v1581_v20  ;;  %s3748_s9 = sld [smem:[#allocation3 + $0x7e]]  ;;  %v1599_v42 = vstv %s3721_s7  ;;  %v1596_v39 = vmul.f32 %v3755_v38, %v1595_v29 }
 0x258   : > { %s3751_s27 = sld [smem:[#allocation3 + $0x7f]]  ;;  %v1603_v43 = vstv %s3726_s0  ;;  %v1566_v62 = vadd.f32 %v1565_v30, %v1562_v27  ;;  %v1600_v47 = vmul.f32 %v3764_v45, %v1599_v42 }
 0x259   : > { %v1589_v36 = vadd.f32 %v1588_v12, %v1585_v25  ;;  %s3758_s5 = sld [smem:[#allocation5 + $0x7c]]  ;;  %v1604_v1 = vmul.f32 %v3777_v55, %v1603_v43 }
 0x25a   : > { %s3761_s29 = sld [smem:[#allocation5 + $0x7d]]  ;;  %v1569_v4 = vadd.f32 %v1568_v52, %v1566_v62  ;;  %v1607_v3 = vstv %s3736_s23 }
 0x25b   : > { %v1593_v44 = vadd.f32 %v1592_v32, %v1589_v36  ;;  %v1615_v37 = vstv %s3739_s4  ;;  %s3768_s1 = sld [smem:[#allocation5 + $0x7e]] }
 0x25c   : > { %v1616_v53 = vmul.f32 %v3668_v31, %v1615_v37  ;;  %v1618_v54 = vstv %s3744_s11  ;;  %s3774_s26 = sld [smem:[#allocation5 + $0x7f]] }
 0x25d   : > { %v1597_v59 = vadd.f32 %v1596_v39, %v1593_v44  ;;  %v1619_v33 = vmul.f32 %v3676_v56, %v1618_v54  ;;  %v1622_v49 = vstv %s3748_s9  ;;  %s2142_s28 = sld [smem:[#allocation8 + $0x1e]] }
 0x25e   : > { %v1623_v60 = vmul.f32 %v3684_v40, %v1622_v49  ;;  %v1626_v31 = vstv %s3751_s27  ;;  %s2151_s10 = sld [smem:[#allocation7 + $0x1f]]  ;;  %v1570_v40 = vmax.f32 %v1569_v4, 0.0 }
 0x25f   : > { %v1601_v48 = vadd.f32 %v1600_v47, %v1597_v59  ;;  %v1620_v63 = vadd.f32 %v1619_v33, %v1616_v53  ;;  %v1627_v2 = vmul.f32 %v3692_v46, %v1626_v31  ;;  %v1630_v6 = vstv %s3758_s5  ;;  %s2152_s22 = sld [smem:[#allocation8 + $0x1f]] }
 0x260   : > { %v1634_v5 = vstv %s3761_s29  ;;  %v1631_v28 = vmul.f32 %v3703_v0, %v1630_v6  ;;  %v1572_v46 = vstv %s3729_s25  ;;  %s1653_s3 = sld [smem:[#allocation2]] }
 0x261   : > { %v1605_v9 = vadd.f32 %v1604_v1, %v1601_v48  ;;  %v1624_v56 = vadd.f32 %v1623_v60, %v1620_v63  ;;  %v1638_v10 = vstv %s3768_s1  ;;  %v1635_v11 = vmul.f32 %v3755_v38, %v1634_v5  ;;  %s4102_s13 = sld [smem:[#allocation16_spill]] }
 0x262   : > { %v1642_v51 = vstv %s3774_s26  ;;  %v1639_v19 = vmul.f32 %v3764_v45, %v1638_v10  ;;  %v1573_v15 = vmul.f32 %v1572_v46, %v1570_v40  ;;  %s4103_s17 = sld [smem:[#allocation75_spill]] }
 0x263   : > { %v1608_v8 = vadd.f32 %v1607_v3, %v1605_v9  ;;  %v1628_v24 = vadd.f32 %v1627_v2, %v1624_v56  ;;  %v1643_v18 = vmul.f32 %v3777_v55, %v1642_v51  ;;  %v1611_v20 = vstv %s2142_s28 }
 0x264   : > { %v1646_v21 = vstv %s2151_s10  ;;  %v1574_v22 = vadd.f32 %v1573_v15, %v1535_v14 }
 0x265   : > { %v1632_v13 = vadd.f32 %v1631_v28, %v1628_v24  ;;  %v1609_v16 = vmax.f32 %v1608_v8, 0.0  ;;  %v1650_v30 = vstv %s2152_s22 }
 0x266   : > { %v1654_v34 = vstv %s1653_s3 }
 0x267   : > { %v1636_v61 = vadd.f32 %v1635_v11, %v1632_v13  ;;  %v1612_v23 = vmul.f32 %v1611_v20, %v1609_v16  ;;  %s1830_s15 = sshll.u32 %s4102_s13, 2 }
 0x268   : > { %s391_s21 = scalar_lea.vmem %s4103_s17, %s1830_s15 }
 0x269   : > { %v1640_v12 = vadd.f32 %v1639_v19, %v1636_v61  ;;  %v1613_v25 = vadd.f32 %v1612_v23, %v1574_v22 }
 0x26b   : > { %v1644_v29 = vadd.f32 %v1643_v18, %v1640_v12 }
 0x26d   : > { %v1647_v27 = vadd.f32 %v1646_v21, %v1644_v29 }
 0x26f   : > { %v1648_v32 = vmax.f32 %v1647_v27, 0.0 }
 0x271   : > { %v1651_v42 = vmul.f32 %v1650_v30, %v1648_v32 }
 0x273   : > { %v1652_v36 = vadd.f32 %v1651_v42, %v1613_v25 }
 0x275   : > { %v1655_v39 = vadd.f32 %v1654_v34, %v1652_v36 }
 0x277   : > { %v1656_v7 = vsub.f32 0.0, %v1655_v39 }
 0x279   : > { %v1657_v26 = vmul.f32 1.442695, %v1656_v7 }
 0x27b   : > { %2225 = vpow2.f32 %v1657_v26 }
 0x281   : > { %v2226_v41 = vpop.eup %2225 }
 0x282   : > { %v1659_v43 = vadd.f32 1.0, %v2226_v41 }
 0x284   : > { %2227 = vrcp.f32 %v1659_v43 }
 0x28a   : > { %v2228_v62 = vpop.eup %2227 }
 0x28b   : > { %v1661_v44 = vmul.f32 %v3703_v0, %v2228_v62  ;;  %v1664_v47 = vmul.f32 %v3755_v38, %v2228_v62  ;;  %v1668_v37 = vmul.f32 %v3764_v45, %v2228_v62  ;;  %v1672_v50 = vmul.f32 %v3777_v55, %v2228_v62 }
 0x28d   : > { %v1662_v52 = vpack.c.bf16 %v1661_v44, %v1661_v44  ;;  %v1665_v53 = vpack.c.bf16 %v1664_v47, %v1664_v47  ;;  %v1669_v54 = vpack.c.bf16 %v1668_v37, %v1668_v37  ;;  %v1673_v59 = vpack.c.bf16 %v1672_v50, %v1672_v50 }
 0x28f   : > { %1663 = vst [vmem:[%s391_s21] sm:$0x1] %v1662_v52 }
 0x290   : > { %2153 = vst [vmem:[%s391_s21 + $0x1] sm:$0x1] %v1665_v53 }
 0x291   : > { %2154 = vst [vmem:[%s391_s21 + $0x2] sm:$0x1] %v1669_v54 }
 0x292   : > { %2155 = vst [vmem:[%s391_s21 + $0x3] sm:$0x1] %v1673_v59 }
 0x293 PF: > { %s4104_s2 = sld [smem:[#allocation14_spill]] }
 0x294   : > { %s4105_s26 = sld [smem:[#allocation13_spill]] }
 0x295   : > { %s4106_s27 = sld [smem:[#allocation15_spill]] }
 0x299   : > { %s21_s28 = sadd.s32 1, %s4104_s2  }
 0x29a   : > { %p18_p8 = scmp.ge.s32.totalorder %s21_s28, 4  }
 0x29c   :  { %20 = sbr.rel (!%p18_p8) target bundleno = 13 (0xd), region = 107 }
 0x2a1   :  { %1701 = vsyncpa [#allocation4], 1 }
 0x2a2   :  { %1703 = vsyncpa [#allocation4 + $0x1], 1 }
 0x2a3   :  { %1704 = vsyncpa [#allocation6], 1 }
 0x2a4   :  { %1705 = vsyncpa [#allocation9], 1 }

</bundles_post_ra>
